<compile_context>
chip_gen: v6e
topology: v6e:2x2x1
jax: 0.10.0
libtpu: 0.0.40
codegen_flags: <defaults>
</compile_context>

<pallas_src>
import functools

import jax
import jax.numpy as jnp
from jax import lax
from jax.experimental import pallas as pl
from jax.experimental.pallas import tpu as pltpu


def _pick_strip(h: int) -> int:
    """Row-strip size: largest of (32, 16, 8) dividing h (prefer >= 2 strips)."""
    for s in (32, 16, 8):
        if h % s == 0 and h // s >= 2:
            return s
    for s in (32, 16, 8):
        if h % s == 0:
            return s
    return h


def _cbam_kernel(x_ref, w1t_ref, w2_ref, a_ref, o_ref, maps_ref, *, K, hs, top):
    # x_ref   : VMEM (C, H, W)            input slab for this batch element.
    # w1t_ref : VMEM (C, 1, Cr)           == w1.T  (shared-MLP fc1, no bias)
    # w2_ref  : VMEM (C, 1, Cr)           == w2    (shared-MLP fc2, no bias)
    # a_ref   : VMEM (2K, W, W)           banded matrices = horizontal conv taps
    # o_ref   : VMEM (C, H, W)            output slab (also used as staging).
    # maps_ref: VMEM (2, H + 2*top, W)    H-halo scratch: [0]=channel max, [1]=mean.
    C, H, W = x_ref.shape
    p = K // 2
    n_strips = H // hs
    inv_hw = 1.0 / float(H * W)
    inv_c = 1.0 / float(C)

    # ---------------- phase 1: channel max/avg pooling (strip-mined over H) ----
    def _pool(i, carry):
        mx, sm = carry
        h0 = pl.multiple_of(i * hs, hs)
        xs = x_ref[:, pl.ds(h0, hs), :].astype(jnp.float32)          # (C, hs, W)
        smx = jnp.max(jnp.max(xs, axis=2, keepdims=True), axis=1, keepdims=True)
        ssm = jnp.sum(jnp.sum(xs, axis=2, keepdims=True), axis=1, keepdims=True)
        return jnp.maximum(mx, smx), sm + ssm

    mx0 = jnp.full((C, 1, 1), -jnp.inf, jnp.float32)
    sm0 = jnp.zeros((C, 1, 1), jnp.float32)
    mx, sm = lax.fori_loop(0, n_strips, _pool, (mx0, sm0))
    av = sm * inv_hw                                                  # (C,1,1)

    # Shared MLP applied to both descriptors; sigmoid of the sum.  (tiny; VPU)
    w1t = w1t_ref[...]                                                # (C,1,Cr)
    w2r = w2_ref[...]                                                 # (C,1,Cr)
    h_mx = jnp.maximum(jnp.sum(mx * w1t, axis=0, keepdims=True), 0.0)  # (1,1,Cr)
    h_av = jnp.maximum(jnp.sum(av * w1t, axis=0, keepdims=True), 0.0)  # (1,1,Cr)
    e = (jnp.sum(h_mx * w2r, axis=2, keepdims=True) +
         jnp.sum(h_av * w2r, axis=2, keepdims=True))                  # (C,1,1)
    ch_att = jax.nn.sigmoid(e)                                        # (C,1,1)

    # Zero only the p halo rows the conv actually reads (scratch persists across
    # grid steps; the interior is fully overwritten below every step).
    if p > 0:
        zeros_halo = jnp.zeros((2, p, W), jnp.float32)
        maps_ref[:, top - p:top, :] = zeros_halo
        maps_ref[:, top + H:top + H + p, :] = zeros_halo

    # ---------------- phase 2: apply ch_att, stage into o_ref, build maps ------
    def _apply(i, carry):
        h0 = pl.multiple_of(i * hs, hs)
        xs = x_ref[:, pl.ds(h0, hs), :].astype(jnp.float32)          # (C, hs, W)
        x1 = xs * ch_att
        o_ref[:, pl.ds(h0, hs), :] = x1.astype(o_ref.dtype)
        maps_ref[0, pl.ds(top + h0, hs), :] = jnp.max(x1, axis=0)     # (hs, W)
        maps_ref[1, pl.ds(top + h0, hs), :] = jnp.sum(x1, axis=0) * inv_c
        return carry

    lax.fori_loop(0, n_strips, _apply, 0)

    # ---------------- phase 3: 7x7 conv as banded MXU matmuls, in-place scale --
    def _spatial(i, carry):
        h0 = pl.multiple_of(i * hs, hs)
        acc = jnp.zeros((hs, W), jnp.float32)
        for cin in range(2):                       # [channel-max map, mean map]
            for dy in range(K):                    # vertical taps via H halo rows
                rows = maps_ref[cin, pl.ds((top - p) + h0 + dy, hs), :]  # (hs, W)
                acc = acc + jnp.dot(rows, a_ref[cin * K + dy],
                                    preferred_element_type=jnp.float32,
                                    precision=lax.Precision.HIGHEST)
        sp = jax.nn.sigmoid(acc)                                      # (hs, W)
        o1 = o_ref[:, pl.ds(h0, hs), :].astype(jnp.float32)
        o_ref[:, pl.ds(h0, hs), :] = (o1 * sp[None, :, :]).astype(o_ref.dtype)
        return carry

    lax.fori_loop(0, n_strips, _spatial, 0)


def cbam_layer(x, w1, w2, wk, *, strip_rows=None):
    """CBAM forward.

    x : (B, C, H, W) float32 or bfloat16
    w1: (Cr, C)   mlp[0] 1x1-conv weight (no bias)
    w2: (C, Cr)   mlp[2] 1x1-conv weight (no bias)
    wk: (2, K, K) spatial conv weight (out=1, in=[max, avg], no bias)
    """
    B, C, H, W = x.shape
    Cr = w1.shape[0]
    K = wk.shape[-1]
    p = K // 2
    top = max(8, -(-p // 8) * 8)          # sublane-aligned H halo region
    hs = strip_rows or _pick_strip(H)

    # MLP weights in the layout the kernel contracts with.
    w1t3 = jnp.transpose(w1).reshape(C, 1, Cr).astype(jnp.float32)
    w23 = w2.reshape(C, 1, Cr).astype(jnp.float32)

    # Banded (W, W) matrices: the conv's horizontal (lane) taps become MXU
    # matmuls, so no lane-offset slices / rolls; W-boundary zero padding is
    # built into the clipped band.
    src = jnp.arange(W)[:, None]
    dst = jnp.arange(W)[None, :]
    dxm = src - dst + p                                    # tap index per (src, out)
    valid = (dxm >= 0) & (dxm < K)
    wk2 = wk.reshape(2 * K, K).astype(jnp.float32)
    a_band = jnp.where(valid[None], wk2[:, jnp.clip(dxm, 0, K - 1)], 0.0)  # (2K,W,W)

    # VMEM budget: in+out slabs double-buffered, resident conv/MLP weights,
    # halo scratch, a few f32 strip temporaries, plus slack; clamped to device.
    itemsize = x.dtype.itemsize
    slab = C * H * W * itemsize
    needed = (4 * slab
              + 2 * int(a_band.size) * 4
              + 2 * int(w1t3.size + w23.size) * 4
              + 2 * (H + 2 * top) * W * 4
              + 6 * C * hs * W * 4
              + (16 << 20))
    try:
        cap = pltpu.get_tpu_info().vmem_capacity_bytes
    except Exception:
        cap = 64 << 20                     # smallest target (v7x per-TC VMEM)
    vmem_limit = int(min(needed, int(cap * 0.9)))

    flops = B * (6 * C * H * W + 4 * K * H * W * W + 8 * C * Cr)
    cost = pl.CostEstimate(
        flops=int(flops),
        transcendentals=int(B * (C + H * W)),
        bytes_accessed=int(2 * B * slab + int(a_band.size) * 4
                           + int(w1.size + w2.size) * 4),
    )

    kernel = functools.partial(_cbam_kernel, K=K, hs=hs, top=top)
    return pl.pallas_call(
        kernel,
        out_shape=jax.ShapeDtypeStruct((B, C, H, W), x.dtype),
        grid_spec=pltpu.PrefetchScalarGridSpec(
            num_scalar_prefetch=0,
            grid=(B,),
            in_specs=[
                pl.BlockSpec((None, C, H, W), lambda b: (b, 0, 0, 0)),   # x slab
                pl.BlockSpec((C, 1, Cr), lambda b: (0, 0, 0)),           # w1.T
                pl.BlockSpec((C, 1, Cr), lambda b: (0, 0, 0)),           # w2
                pl.BlockSpec((2 * K, W, W), lambda b: (0, 0, 0)),        # conv bands
            ],
            out_specs=pl.BlockSpec((None, C, H, W), lambda b: (b, 0, 0, 0)),
            scratch_shapes=[pltpu.VMEM((2, H + 2 * top, W), jnp.float32)],
        ),
        compiler_params=pltpu.CompilerParams(
            dimension_semantics=("parallel",),
            vmem_limit_bytes=vmem_limit,
        ),
        cost_estimate=cost,
    )(x, w1t3, w23, a_band)


def _reference(x, w1, w2, wk):
    """Pure-JAX CBAM reference (matches the PyTorch module)."""
    mx = jnp.max(x, axis=(2, 3))
    av = jnp.mean(x, axis=(2, 3))

    def mlp(v):
        h = jax.nn.relu(jnp.dot(v, w1.T, precision=jax.lax.Precision.HIGHEST))
        return jnp.dot(h, w2.T, precision=jax.lax.Precision.HIGHEST)

    ch = jax.nn.sigmoid(mlp(mx) + mlp(av))                    # (B,C)
    x1 = x * ch[:, :, None, None]
    mx_map = jnp.max(x1, axis=1, keepdims=True)
    av_map = jnp.mean(x1, axis=1, keepdims=True)
    sp_in = jnp.concatenate([mx_map, av_map], axis=1)         # (B,2,H,W)
    K = wk.shape[-1]
    p = K // 2
    conv = jax.lax.conv_general_dilated(
        sp_in, wk.reshape(1, 2, K, K), window_strides=(1, 1),
        padding=((p, p), (p, p)),
        dimension_numbers=("NCHW", "OIHW", "NCHW"),
        precision=jax.lax.Precision.HIGHEST)
    return x1 * jax.nn.sigmoid(conv)


if __name__ == "__main__":
    key = jax.random.PRNGKey(0)
    B, C, H, W = 2, 16, 16, 16
    reduction, spatial_kernel = 4, 7
    Cr = C // reduction

    k_x, k_w1, k_w2, k_wk = jax.random.split(key, 4)
    x = jax.random.normal(k_x, (B, C, H, W), dtype=jnp.float32)
    # deterministic synthetic Conv2d-style weights (CBAM has no biases)
    w1 = jax.random.uniform(k_w1, (Cr, C), jnp.float32, -0.5, 0.5)
    w2 = jax.random.uniform(k_w2, (C, Cr), jnp.float32, -0.5, 0.5)
    wk = jax.random.uniform(k_wk, (2, spatial_kernel, spatial_kernel),
                            jnp.float32, -0.2, 0.2)

    out = jax.block_until_ready(cbam_layer(x, w1, w2, wk))
    ref = _reference(x, w1, w2, wk)
    assert out.shape == (B, C, H, W)
    max_err = float(jnp.max(jnp.abs(out - ref)))
    assert jnp.allclose(out, ref, atol=2e-3, rtol=2e-3), max_err

    # bf16 I/O path (halves HBM traffic; internals stay f32 per strip).
    out_bf = jax.block_until_ready(cbam_layer(x.astype(jnp.bfloat16), w1, w2, wk))
    assert out_bf.shape == (B, C, H, W) and out_bf.dtype == jnp.bfloat16
    out_bf32 = out_bf.astype(jnp.float32)
    assert bool(jnp.isfinite(out_bf32).all())
    assert jnp.allclose(out_bf32, ref, atol=1e-1, rtol=1e-1)

    print("KERNEL_OK")
</pallas_src>

<mosaic_0001>
module attributes {stable_mosaic.version = 11 : i64} {
  func.func @_cbam_kernel(%arg0: i32, %arg1: memref<1x16x16x16xf32, #tpu.memory_space<vmem>>, %arg2: memref<16x1x4xf32, #tpu.memory_space<vmem>>, %arg3: memref<16x1x4xf32, #tpu.memory_space<vmem>>, %arg4: memref<14x16x16xf32, #tpu.memory_space<vmem>>, %arg5: memref<1x16x16x16xf32, #tpu.memory_space<vmem>>, %arg6: memref<2x32x16xf32, #tpu.memory_space<vmem>>) attributes {dimension_semantics = [#tpu.dimension_semantics<parallel>], iteration_bounds = array<i64: 2>, scalar_prefetch = 0 : i64, scratch_operands = 1 : i64, tpu.core_type = #tpu.core_type<tc>, window_params = [{transform_indices = @transform_0, window_bounds = array<i64: 1, 16, 16, 16>}, {pipeline_mode = #tpu.pipeline_mode<synchronous>, transform_indices = @transform_1, window_bounds = array<i64: 16, 1, 4>}, {pipeline_mode = #tpu.pipeline_mode<synchronous>, transform_indices = @transform_2, window_bounds = array<i64: 16, 1, 4>}, {pipeline_mode = #tpu.pipeline_mode<synchronous>, transform_indices = @transform_3, window_bounds = array<i64: 14, 16, 16>}, {transform_indices = @transform_4, window_bounds = array<i64: 1, 16, 16, 16>}]} {
    %cst = arith.constant 0xFF800000 : f32
    %0 = vector.broadcast %cst : f32 to vector<16x1x1xf32>
    %cst_0 = arith.constant 0.000000e+00 : f32
    %1 = vector.broadcast %cst_0 : f32 to vector<16x1x1xf32>
    %c0_i32 = arith.constant 0 : i32
    %c2_i32 = arith.constant 2 : i32
    %2 = arith.addi %c0_i32, %c2_i32 : i32
    %c1_i32 = arith.constant 1 : i32
    %3:2 = scf.for %arg7 = %c0_i32 to %2 step %c1_i32 iter_args(%arg8 = %0, %arg9 = %1) -> (vector<16x1x1xf32>, vector<16x1x1xf32>)  : i32 {
      %c8_i32 = arith.constant 8 : i32
      %39 = arith.muli %arg7, %c8_i32 : i32
      %40 = tpu.assume_multiple %39, 8 : i32
      %c0_28 = arith.constant 0 : index
      %c0_29 = arith.constant 0 : index
      %41 = arith.index_cast %40 : i32 to index
      %c0_30 = arith.constant 0 : index
      %42 = vector.load %arg1[%c0_28, %c0_29, %41, %c0_30] : memref<1x16x16x16xf32, #tpu.memory_space<vmem>>, vector<1x16x8x16xf32>
      %43 = vector.shape_cast %42 : vector<1x16x8x16xf32> to vector<16x8x16xf32>
      %cst_31 = arith.constant dense<0xFF800000> : vector<16x8xf32>
      %44 = vector.multi_reduction <maximumf>, %43, %cst_31 [2] : vector<16x8x16xf32> to vector<16x8xf32>
      %45 = vector.shape_cast %44 : vector<16x8xf32> to vector<16x8x1xf32>
      %cst_32 = arith.constant dense<0xFF800000> : vector<16x1xf32>
      %46 = vector.multi_reduction <maximumf>, %45, %cst_32 [1] : vector<16x8x1xf32> to vector<16x1xf32>
      %47 = vector.shape_cast %46 : vector<16x1xf32> to vector<16x1x1xf32>
      %cst_33 = arith.constant dense<0.000000e+00> : vector<16x8xf32>
      %48 = vector.multi_reduction <add>, %43, %cst_33 [2] : vector<16x8x16xf32> to vector<16x8xf32>
      %49 = vector.shape_cast %48 : vector<16x8xf32> to vector<16x8x1xf32>
      %cst_34 = arith.constant dense<0.000000e+00> : vector<16x1xf32>
      %50 = vector.multi_reduction <add>, %49, %cst_34 [1] : vector<16x8x1xf32> to vector<16x1xf32>
      %51 = vector.shape_cast %50 : vector<16x1xf32> to vector<16x1x1xf32>
      %52 = arith.maximumf %arg8, %47 : vector<16x1x1xf32>
      %53 = arith.addf %arg9, %51 : vector<16x1x1xf32>
      scf.yield %52, %53 : vector<16x1x1xf32>, vector<16x1x1xf32>
    }
    %c2_i32_1 = arith.constant 2 : i32
    %cst_2 = arith.constant 3.906250e-03 : f32
    %4 = vector.broadcast %cst_2 : f32 to vector<16x1x1xf32>
    %5 = arith.mulf %3#1, %4 : vector<16x1x1xf32>
    %c0 = arith.constant 0 : index
    %c0_3 = arith.constant 0 : index
    %c0_4 = arith.constant 0 : index
    %6 = vector.load %arg2[%c0, %c0_3, %c0_4] : memref<16x1x4xf32, #tpu.memory_space<vmem>>, vector<16x1x4xf32>
    %c0_5 = arith.constant 0 : index
    %c0_6 = arith.constant 0 : index
    %c0_7 = arith.constant 0 : index
    %7 = vector.load %arg3[%c0_5, %c0_6, %c0_7] : memref<16x1x4xf32, #tpu.memory_space<vmem>>, vector<16x1x4xf32>
    %8 = vector.broadcast %3#0 : vector<16x1x1xf32> to vector<16x1x4xf32>
    %9 = arith.mulf %8, %6 : vector<16x1x4xf32>
    %cst_8 = arith.constant dense<0.000000e+00> : vector<1x4xf32>
    %10 = vector.multi_reduction <add>, %9, %cst_8 [0] : vector<16x1x4xf32> to vector<1x4xf32>
    %11 = vector.shape_cast %10 : vector<1x4xf32> to vector<1x1x4xf32>
    %cst_9 = arith.constant 0.000000e+00 : f32
    %12 = vector.broadcast %cst_9 : f32 to vector<1x1x4xf32>
    %13 = arith.maximumf %11, %12 : vector<1x1x4xf32>
    %14 = vector.broadcast %5 : vector<16x1x1xf32> to vector<16x1x4xf32>
    %15 = arith.mulf %14, %6 : vector<16x1x4xf32>
    %cst_10 = arith.constant dense<0.000000e+00> : vector<1x4xf32>
    %16 = vector.multi_reduction <add>, %15, %cst_10 [0] : vector<16x1x4xf32> to vector<1x4xf32>
    %17 = vector.shape_cast %16 : vector<1x4xf32> to vector<1x1x4xf32>
    %cst_11 = arith.constant 0.000000e+00 : f32
    %18 = vector.broadcast %cst_11 : f32 to vector<1x1x4xf32>
    %19 = arith.maximumf %17, %18 : vector<1x1x4xf32>
    %20 = vector.broadcast %13 : vector<1x1x4xf32> to vector<16x1x4xf32>
    %21 = arith.mulf %20, %7 : vector<16x1x4xf32>
    %cst_12 = arith.constant dense<0.000000e+00> : vector<16x1xf32>
    %22 = vector.multi_reduction <add>, %21, %cst_12 [2] : vector<16x1x4xf32> to vector<16x1xf32>
    %23 = vector.shape_cast %22 : vector<16x1xf32> to vector<16x1x1xf32>
    %24 = vector.broadcast %19 : vector<1x1x4xf32> to vector<16x1x4xf32>
    %25 = arith.mulf %24, %7 : vector<16x1x4xf32>
    %cst_13 = arith.constant dense<0.000000e+00> : vector<16x1xf32>
    %26 = vector.multi_reduction <add>, %25, %cst_13 [2] : vector<16x1x4xf32> to vector<16x1xf32>
    %27 = vector.shape_cast %26 : vector<16x1xf32> to vector<16x1x1xf32>
    %28 = arith.addf %23, %27 : vector<16x1x1xf32>
    %29 = arith.negf %28 : vector<16x1x1xf32>
    %30 = math.exp %29 : vector<16x1x1xf32>
    %cst_14 = arith.constant 1.000000e+00 : f32
    %31 = vector.broadcast %cst_14 : f32 to vector<16x1x1xf32>
    %32 = arith.addf %31, %30 : vector<16x1x1xf32>
    %33 = arith.divf %31, %32 : vector<16x1x1xf32>
    %cst_15 = arith.constant 0.000000e+00 : f32
    %34 = vector.broadcast %cst_15 : f32 to vector<2x3x16xf32>
    %c0_16 = arith.constant 0 : index
    %c5 = arith.constant 5 : index
    %c0_17 = arith.constant 0 : index
    %35 = vector.load %arg6[%c0_16, %c5, %c0_17] : memref<2x32x16xf32, #tpu.memory_space<vmem>>, vector<2x3x16xf32>
    tpu.vector_store %arg6[%c0_16, %c5, %c0_17], %34 {strides = array<i32>} : memref<2x32x16xf32, #tpu.memory_space<vmem>>, vector<2x3x16xf32>,
    %c0_18 = arith.constant 0 : index
    %c24 = arith.constant 24 : index
    %c0_19 = arith.constant 0 : index
    %36 = vector.load %arg6[%c0_18, %c24, %c0_19] : memref<2x32x16xf32, #tpu.memory_space<vmem>>, vector<2x3x16xf32>
    tpu.vector_store %arg6[%c0_18, %c24, %c0_19], %34 {strides = array<i32>} : memref<2x32x16xf32, #tpu.memory_space<vmem>>, vector<2x3x16xf32>,
    %c0_i32_20 = arith.constant 0 : i32
    %c2_i32_21 = arith.constant 2 : i32
    %37 = arith.addi %c0_i32_20, %c2_i32_21 : i32
    %c1_i32_22 = arith.constant 1 : i32
    scf.for %arg7 = %c0_i32_20 to %37 step %c1_i32_22  : i32 {
      %c8_i32 = arith.constant 8 : i32
      %39 = arith.muli %arg7, %c8_i32 : i32
      %40 = tpu.assume_multiple %39, 8 : i32
      %c0_28 = arith.constant 0 : index
      %c0_29 = arith.constant 0 : index
      %41 = arith.index_cast %40 : i32 to index
      %c0_30 = arith.constant 0 : index
      %42 = vector.load %arg1[%c0_28, %c0_29, %41, %c0_30] : memref<1x16x16x16xf32, #tpu.memory_space<vmem>>, vector<1x16x8x16xf32>
      %43 = vector.shape_cast %42 : vector<1x16x8x16xf32> to vector<16x8x16xf32>
      %44 = vector.broadcast %33 : vector<16x1x1xf32> to vector<16x8x16xf32>
      %45 = arith.mulf %43, %44 : vector<16x8x16xf32>
      %c0_31 = arith.constant 0 : index
      %c0_32 = arith.constant 0 : index
      %46 = arith.index_cast %40 : i32 to index
      %c0_33 = arith.constant 0 : index
      %47 = vector.load %arg5[%c0_31, %c0_32, %46, %c0_33] : memref<1x16x16x16xf32, #tpu.memory_space<vmem>>, vector<1x16x8x16xf32>
      %48 = vector.shape_cast %47 : vector<1x16x8x16xf32> to vector<16x8x16xf32>
      %49 = vector.shape_cast %45 : vector<16x8x16xf32> to vector<1x16x8x16xf32>
      tpu.vector_store %arg5[%c0_31, %c0_32, %46, %c0_33], %49 {strides = array<i32>} : memref<1x16x16x16xf32, #tpu.memory_space<vmem>>, vector<1x16x8x16xf32>,
      %cst_34 = arith.constant dense<0xFF800000> : vector<8x16xf32>
      %50 = vector.multi_reduction <maximumf>, %45, %cst_34 [0] : vector<16x8x16xf32> to vector<8x16xf32>
      %c8_i32_35 = arith.constant 8 : i32
      %51 = arith.addi %c8_i32_35, %40 : i32
      %c0_36 = arith.constant 0 : index
      %52 = arith.index_cast %51 : i32 to index
      %c0_37 = arith.constant 0 : index
      %53 = vector.load %arg6[%c0_36, %52, %c0_37] : memref<2x32x16xf32, #tpu.memory_space<vmem>>, vector<1x8x16xf32>
      %54 = vector.shape_cast %53 : vector<1x8x16xf32> to vector<8x16xf32>
      %55 = vector.shape_cast %50 : vector<8x16xf32> to vector<1x8x16xf32>
      tpu.vector_store %arg6[%c0_36, %52, %c0_37], %55 {strides = array<i32>} : memref<2x32x16xf32, #tpu.memory_space<vmem>>, vector<1x8x16xf32>,
      %cst_38 = arith.constant dense<0.000000e+00> : vector<8x16xf32>
      %56 = vector.multi_reduction <add>, %45, %cst_38 [0] : vector<16x8x16xf32> to vector<8x16xf32>
      %cst_39 = arith.constant 6.250000e-02 : f32
      %57 = vector.broadcast %cst_39 : f32 to vector<8x16xf32>
      %58 = arith.mulf %56, %57 : vector<8x16xf32>
      %c8_i32_40 = arith.constant 8 : i32
      %59 = arith.addi %c8_i32_40, %40 : i32
      %c1 = arith.constant 1 : index
      %60 = arith.index_cast %59 : i32 to index
      %c0_41 = arith.constant 0 : index
      %61 = vector.load %arg6[%c1, %60, %c0_41] : memref<2x32x16xf32, #tpu.memory_space<vmem>>, vector<1x8x16xf32>
      %62 = vector.shape_cast %61 : vector<1x8x16xf32> to vector<8x16xf32>
      %63 = vector.shape_cast %58 : vector<8x16xf32> to vector<1x8x16xf32>
      tpu.vector_store %arg6[%c1, %60, %c0_41], %63 {strides = array<i32>} : memref<2x32x16xf32, #tpu.memory_space<vmem>>, vector<1x8x16xf32>,
    }
    %c2_i32_23 = arith.constant 2 : i32
    %c0_i32_24 = arith.constant 0 : i32
    %c2_i32_25 = arith.constant 2 : i32
    %38 = arith.addi %c0_i32_24, %c2_i32_25 : i32
    %c1_i32_26 = arith.constant 1 : i32
    scf.for %arg7 = %c0_i32_24 to %38 step %c1_i32_26  : i32 {
      %c8_i32 = arith.constant 8 : i32
      %39 = arith.muli %arg7, %c8_i32 : i32
      %40 = tpu.assume_multiple %39, 8 : i32
      %cst_28 = arith.constant 0.000000e+00 : f32
      %41 = vector.broadcast %cst_28 : f32 to vector<8x16xf32>
      %c5_i32 = arith.constant 5 : i32
      %42 = arith.addi %c5_i32, %40 : i32
      %c0_i32_29 = arith.constant 0 : i32
      %43 = arith.addi %42, %c0_i32_29 : i32
      %c0_30 = arith.constant 0 : index
      %44 = arith.index_cast %43 : i32 to index
      %c0_31 = arith.constant 0 : index
      %45 = vector.load %arg6[%c0_30, %44, %c0_31] : memref<2x32x16xf32, #tpu.memory_space<vmem>>, vector<1x8x16xf32>
      %46 = vector.shape_cast %45 : vector<1x8x16xf32> to vector<8x16xf32>
      %c0_32 = arith.constant 0 : index
      %c0_33 = arith.constant 0 : index
      %c0_34 = arith.constant 0 : index
      %47 = vector.load %arg4[%c0_32, %c0_33, %c0_34] : memref<14x16x16xf32, #tpu.memory_space<vmem>>, vector<1x16x16xf32>
      %48 = vector.shape_cast %47 : vector<1x16x16xf32> to vector<16x16xf32>
      %cst_35 = arith.constant dense<0.000000e+00> : vector<8x16xf32>
      %49 = tpu.matmul %46, %48, %cst_35 {dimension_numbers = #tpu.dot_dimension_numbers<[1], [0], [0], [1], [0, 0, 1, 1], [], []>, precision = #tpu.contract_precision<fp32>} : vector<8x16xf32>, vector<16x16xf32>, vector<8x16xf32> -> vector<8x16xf32>
      %50 = arith.addf %41, %49 : vector<8x16xf32>
      %c5_i32_36 = arith.constant 5 : i32
      %51 = arith.addi %c5_i32_36, %40 : i32
      %c1_i32_37 = arith.constant 1 : i32
      %52 = arith.addi %51, %c1_i32_37 : i32
      %c0_38 = arith.constant 0 : index
      %53 = arith.index_cast %52 : i32 to index
      %c0_39 = arith.constant 0 : index
      %54 = vector.load %arg6[%c0_38, %53, %c0_39] : memref<2x32x16xf32, #tpu.memory_space<vmem>>, vector<1x8x16xf32>
      %55 = vector.shape_cast %54 : vector<1x8x16xf32> to vector<8x16xf32>
      %c1 = arith.constant 1 : index
      %c0_40 = arith.constant 0 : index
      %c0_41 = arith.constant 0 : index
      %56 = vector.load %arg4[%c1, %c0_40, %c0_41] : memref<14x16x16xf32, #tpu.memory_space<vmem>>, vector<1x16x16xf32>
      %57 = vector.shape_cast %56 : vector<1x16x16xf32> to vector<16x16xf32>
      %cst_42 = arith.constant dense<0.000000e+00> : vector<8x16xf32>
      %58 = tpu.matmul %55, %57, %cst_42 {dimension_numbers = #tpu.dot_dimension_numbers<[1], [0], [0], [1], [0, 0, 1, 1], [], []>, precision = #tpu.contract_precision<fp32>} : vector<8x16xf32>, vector<16x16xf32>, vector<8x16xf32> -> vector<8x16xf32>
      %59 = arith.addf %50, %58 : vector<8x16xf32>
      %c5_i32_43 = arith.constant 5 : i32
      %60 = arith.addi %c5_i32_43, %40 : i32
      %c2_i32_44 = arith.constant 2 : i32
      %61 = arith.addi %60, %c2_i32_44 : i32
      %c0_45 = arith.constant 0 : index
      %62 = arith.index_cast %61 : i32 to index
      %c0_46 = arith.constant 0 : index
      %63 = vector.load %arg6[%c0_45, %62, %c0_46] : memref<2x32x16xf32, #tpu.memory_space<vmem>>, vector<1x8x16xf32>
      %64 = vector.shape_cast %63 : vector<1x8x16xf32> to vector<8x16xf32>
      %c2 = arith.constant 2 : index
      %c0_47 = arith.constant 0 : index
      %c0_48 = arith.constant 0 : index
      %65 = vector.load %arg4[%c2, %c0_47, %c0_48] : memref<14x16x16xf32, #tpu.memory_space<vmem>>, vector<1x16x16xf32>
      %66 = vector.shape_cast %65 : vector<1x16x16xf32> to vector<16x16xf32>
      %cst_49 = arith.constant dense<0.000000e+00> : vector<8x16xf32>
      %67 = tpu.matmul %64, %66, %cst_49 {dimension_numbers = #tpu.dot_dimension_numbers<[1], [0], [0], [1], [0, 0, 1, 1], [], []>, precision = #tpu.contract_precision<fp32>} : vector<8x16xf32>, vector<16x16xf32>, vector<8x16xf32> -> vector<8x16xf32>
      %68 = arith.addf %59, %67 : vector<8x16xf32>
      %c5_i32_50 = arith.constant 5 : i32
      %69 = arith.addi %c5_i32_50, %40 : i32
      %c3_i32 = arith.constant 3 : i32
      %70 = arith.addi %69, %c3_i32 : i32
      %c0_51 = arith.constant 0 : index
      %71 = arith.index_cast %70 : i32 to index
      %c0_52 = arith.constant 0 : index
      %72 = vector.load %arg6[%c0_51, %71, %c0_52] : memref<2x32x16xf32, #tpu.memory_space<vmem>>, vector<1x8x16xf32>
      %73 = vector.shape_cast %72 : vector<1x8x16xf32> to vector<8x16xf32>
      %c3 = arith.constant 3 : index
      %c0_53 = arith.constant 0 : index
      %c0_54 = arith.constant 0 : index
      %74 = vector.load %arg4[%c3, %c0_53, %c0_54] : memref<14x16x16xf32, #tpu.memory_space<vmem>>, vector<1x16x16xf32>
      %75 = vector.shape_cast %74 : vector<1x16x16xf32> to vector<16x16xf32>
      %cst_55 = arith.constant dense<0.000000e+00> : vector<8x16xf32>
      %76 = tpu.matmul %73, %75, %cst_55 {dimension_numbers = #tpu.dot_dimension_numbers<[1], [0], [0], [1], [0, 0, 1, 1], [], []>, precision = #tpu.contract_precision<fp32>} : vector<8x16xf32>, vector<16x16xf32>, vector<8x16xf32> -> vector<8x16xf32>
      %77 = arith.addf %68, %76 : vector<8x16xf32>
      %c5_i32_56 = arith.constant 5 : i32
      %78 = arith.addi %c5_i32_56, %40 : i32
      %c4_i32 = arith.constant 4 : i32
      %79 = arith.addi %78, %c4_i32 : i32
      %c0_57 = arith.constant 0 : index
      %80 = arith.index_cast %79 : i32 to index
      %c0_58 = arith.constant 0 : index
      %81 = vector.load %arg6[%c0_57, %80, %c0_58] : memref<2x32x16xf32, #tpu.memory_space<vmem>>, vector<1x8x16xf32>
      %82 = vector.shape_cast %81 : vector<1x8x16xf32> to vector<8x16xf32>
      %c4 = arith.constant 4 : index
      %c0_59 = arith.constant 0 : index
      %c0_60 = arith.constant 0 : index
      %83 = vector.load %arg4[%c4, %c0_59, %c0_60] : memref<14x16x16xf32, #tpu.memory_space<vmem>>, vector<1x16x16xf32>
      %84 = vector.shape_cast %83 : vector<1x16x16xf32> to vector<16x16xf32>
      %cst_61 = arith.constant dense<0.000000e+00> : vector<8x16xf32>
      %85 = tpu.matmul %82, %84, %cst_61 {dimension_numbers = #tpu.dot_dimension_numbers<[1], [0], [0], [1], [0, 0, 1, 1], [], []>, precision = #tpu.contract_precision<fp32>} : vector<8x16xf32>, vector<16x16xf32>, vector<8x16xf32> -> vector<8x16xf32>
      %86 = arith.addf %77, %85 : vector<8x16xf32>
      %c5_i32_62 = arith.constant 5 : i32
      %87 = arith.addi %c5_i32_62, %40 : i32
      %c5_i32_63 = arith.constant 5 : i32
      %88 = arith.addi %87, %c5_i32_63 : i32
      %c0_64 = arith.constant 0 : index
      %89 = arith.index_cast %88 : i32 to index
      %c0_65 = arith.constant 0 : index
      %90 = vector.load %arg6[%c0_64, %89, %c0_65] : memref<2x32x16xf32, #tpu.memory_space<vmem>>, vector<1x8x16xf32>
      %91 = vector.shape_cast %90 : vector<1x8x16xf32> to vector<8x16xf32>
      %c5_66 = arith.constant 5 : index
      %c0_67 = arith.constant 0 : index
      %c0_68 = arith.constant 0 : index
      %92 = vector.load %arg4[%c5_66, %c0_67, %c0_68] : memref<14x16x16xf32, #tpu.memory_space<vmem>>, vector<1x16x16xf32>
      %93 = vector.shape_cast %92 : vector<1x16x16xf32> to vector<16x16xf32>
      %cst_69 = arith.constant dense<0.000000e+00> : vector<8x16xf32>
      %94 = tpu.matmul %91, %93, %cst_69 {dimension_numbers = #tpu.dot_dimension_numbers<[1], [0], [0], [1], [0, 0, 1, 1], [], []>, precision = #tpu.contract_precision<fp32>} : vector<8x16xf32>, vector<16x16xf32>, vector<8x16xf32> -> vector<8x16xf32>
      %95 = arith.addf %86, %94 : vector<8x16xf32>
      %c5_i32_70 = arith.constant 5 : i32
      %96 = arith.addi %c5_i32_70, %40 : i32
      %c6_i32 = arith.constant 6 : i32
      %97 = arith.addi %96, %c6_i32 : i32
      %c0_71 = arith.constant 0 : index
      %98 = arith.index_cast %97 : i32 to index
      %c0_72 = arith.constant 0 : index
      %99 = vector.load %arg6[%c0_71, %98, %c0_72] : memref<2x32x16xf32, #tpu.memory_space<vmem>>, vector<1x8x16xf32>
      %100 = vector.shape_cast %99 : vector<1x8x16xf32> to vector<8x16xf32>
      %c6 = arith.constant 6 : index
      %c0_73 = arith.constant 0 : index
      %c0_74 = arith.constant 0 : index
      %101 = vector.load %arg4[%c6, %c0_73, %c0_74] : memref<14x16x16xf32, #tpu.memory_space<vmem>>, vector<1x16x16xf32>
      %102 = vector.shape_cast %101 : vector<1x16x16xf32> to vector<16x16xf32>
      %cst_75 = arith.constant dense<0.000000e+00> : vector<8x16xf32>
      %103 = tpu.matmul %100, %102, %cst_75 {dimension_numbers = #tpu.dot_dimension_numbers<[1], [0], [0], [1], [0, 0, 1, 1], [], []>, precision = #tpu.contract_precision<fp32>} : vector<8x16xf32>, vector<16x16xf32>, vector<8x16xf32> -> vector<8x16xf32>
      %104 = arith.addf %95, %103 : vector<8x16xf32>
      %c5_i32_76 = arith.constant 5 : i32
      %105 = arith.addi %c5_i32_76, %40 : i32
      %c0_i32_77 = arith.constant 0 : i32
      %106 = arith.addi %105, %c0_i32_77 : i32
      %c1_78 = arith.constant 1 : index
      %107 = arith.index_cast %106 : i32 to index
      %c0_79 = arith.constant 0 : index
      %108 = vector.load %arg6[%c1_78, %107, %c0_79] : memref<2x32x16xf32, #tpu.memory_space<vmem>>, vector<1x8x16xf32>
      %109 = vector.shape_cast %108 : vector<1x8x16xf32> to vector<8x16xf32>
      %c7 = arith.constant 7 : index
      %c0_80 = arith.constant 0 : index
      %c0_81 = arith.constant 0 : index
      %110 = vector.load %arg4[%c7, %c0_80, %c0_81] : memref<14x16x16xf32, #tpu.memory_space<vmem>>, vector<1x16x16xf32>
      %111 = vector.shape_cast %110 : vector<1x16x16xf32> to vector<16x16xf32>
      %cst_82 = arith.constant dense<0.000000e+00> : vector<8x16xf32>
      %112 = tpu.matmul %109, %111, %cst_82 {dimension_numbers = #tpu.dot_dimension_numbers<[1], [0], [0], [1], [0, 0, 1, 1], [], []>, precision = #tpu.contract_precision<fp32>} : vector<8x16xf32>, vector<16x16xf32>, vector<8x16xf32> -> vector<8x16xf32>
      %113 = arith.addf %104, %112 : vector<8x16xf32>
      %c5_i32_83 = arith.constant 5 : i32
      %114 = arith.addi %c5_i32_83, %40 : i32
      %c1_i32_84 = arith.constant 1 : i32
      %115 = arith.addi %114, %c1_i32_84 : i32
      %c1_85 = arith.constant 1 : index
      %116 = arith.index_cast %115 : i32 to index
      %c0_86 = arith.constant 0 : index
      %117 = vector.load %arg6[%c1_85, %116, %c0_86] : memref<2x32x16xf32, #tpu.memory_space<vmem>>, vector<1x8x16xf32>
      %118 = vector.shape_cast %117 : vector<1x8x16xf32> to vector<8x16xf32>
      %c8 = arith.constant 8 : index
      %c0_87 = arith.constant 0 : index
      %c0_88 = arith.constant 0 : index
      %119 = vector.load %arg4[%c8, %c0_87, %c0_88] : memref<14x16x16xf32, #tpu.memory_space<vmem>>, vector<1x16x16xf32>
      %120 = vector.shape_cast %119 : vector<1x16x16xf32> to vector<16x16xf32>
      %cst_89 = arith.constant dense<0.000000e+00> : vector<8x16xf32>
      %121 = tpu.matmul %118, %120, %cst_89 {dimension_numbers = #tpu.dot_dimension_numbers<[1], [0], [0], [1], [0, 0, 1, 1], [], []>, precision = #tpu.contract_precision<fp32>} : vector<8x16xf32>, vector<16x16xf32>, vector<8x16xf32> -> vector<8x16xf32>
      %122 = arith.addf %113, %121 : vector<8x16xf32>
      %c5_i32_90 = arith.constant 5 : i32
      %123 = arith.addi %c5_i32_90, %40 : i32
      %c2_i32_91 = arith.constant 2 : i32
      %124 = arith.addi %123, %c2_i32_91 : i32
      %c1_92 = arith.constant 1 : index
      %125 = arith.index_cast %124 : i32 to index
      %c0_93 = arith.constant 0 : index
      %126 = vector.load %arg6[%c1_92, %125, %c0_93] : memref<2x32x16xf32, #tpu.memory_space<vmem>>, vector<1x8x16xf32>
      %127 = vector.shape_cast %126 : vector<1x8x16xf32> to vector<8x16xf32>
      %c9 = arith.constant 9 : index
      %c0_94 = arith.constant 0 : index
      %c0_95 = arith.constant 0 : index
      %128 = vector.load %arg4[%c9, %c0_94, %c0_95] : memref<14x16x16xf32, #tpu.memory_space<vmem>>, vector<1x16x16xf32>
      %129 = vector.shape_cast %128 : vector<1x16x16xf32> to vector<16x16xf32>
      %cst_96 = arith.constant dense<0.000000e+00> : vector<8x16xf32>
      %130 = tpu.matmul %127, %129, %cst_96 {dimension_numbers = #tpu.dot_dimension_numbers<[1], [0], [0], [1], [0, 0, 1, 1], [], []>, precision = #tpu.contract_precision<fp32>} : vector<8x16xf32>, vector<16x16xf32>, vector<8x16xf32> -> vector<8x16xf32>
      %131 = arith.addf %122, %130 : vector<8x16xf32>
      %c5_i32_97 = arith.constant 5 : i32
      %132 = arith.addi %c5_i32_97, %40 : i32
      %c3_i32_98 = arith.constant 3 : i32
      %133 = arith.addi %132, %c3_i32_98 : i32
      %c1_99 = arith.constant 1 : index
      %134 = arith.index_cast %133 : i32 to index
      %c0_100 = arith.constant 0 : index
      %135 = vector.load %arg6[%c1_99, %134, %c0_100] : memref<2x32x16xf32, #tpu.memory_space<vmem>>, vector<1x8x16xf32>
      %136 = vector.shape_cast %135 : vector<1x8x16xf32> to vector<8x16xf32>
      %c10 = arith.constant 10 : index
      %c0_101 = arith.constant 0 : index
      %c0_102 = arith.constant 0 : index
      %137 = vector.load %arg4[%c10, %c0_101, %c0_102] : memref<14x16x16xf32, #tpu.memory_space<vmem>>, vector<1x16x16xf32>
      %138 = vector.shape_cast %137 : vector<1x16x16xf32> to vector<16x16xf32>
      %cst_103 = arith.constant dense<0.000000e+00> : vector<8x16xf32>
      %139 = tpu.matmul %136, %138, %cst_103 {dimension_numbers = #tpu.dot_dimension_numbers<[1], [0], [0], [1], [0, 0, 1, 1], [], []>, precision = #tpu.contract_precision<fp32>} : vector<8x16xf32>, vector<16x16xf32>, vector<8x16xf32> -> vector<8x16xf32>
      %140 = arith.addf %131, %139 : vector<8x16xf32>
      %c5_i32_104 = arith.constant 5 : i32
      %141 = arith.addi %c5_i32_104, %40 : i32
      %c4_i32_105 = arith.constant 4 : i32
      %142 = arith.addi %141, %c4_i32_105 : i32
      %c1_106 = arith.constant 1 : index
      %143 = arith.index_cast %142 : i32 to index
      %c0_107 = arith.constant 0 : index
      %144 = vector.load %arg6[%c1_106, %143, %c0_107] : memref<2x32x16xf32, #tpu.memory_space<vmem>>, vector<1x8x16xf32>
      %145 = vector.shape_cast %144 : vector<1x8x16xf32> to vector<8x16xf32>
      %c11 = arith.constant 11 : index
      %c0_108 = arith.constant 0 : index
      %c0_109 = arith.constant 0 : index
      %146 = vector.load %arg4[%c11, %c0_108, %c0_109] : memref<14x16x16xf32, #tpu.memory_space<vmem>>, vector<1x16x16xf32>
      %147 = vector.shape_cast %146 : vector<1x16x16xf32> to vector<16x16xf32>
      %cst_110 = arith.constant dense<0.000000e+00> : vector<8x16xf32>
      %148 = tpu.matmul %145, %147, %cst_110 {dimension_numbers = #tpu.dot_dimension_numbers<[1], [0], [0], [1], [0, 0, 1, 1], [], []>, precision = #tpu.contract_precision<fp32>} : vector<8x16xf32>, vector<16x16xf32>, vector<8x16xf32> -> vector<8x16xf32>
      %149 = arith.addf %140, %148 : vector<8x16xf32>
      %c5_i32_111 = arith.constant 5 : i32
      %150 = arith.addi %c5_i32_111, %40 : i32
      %c5_i32_112 = arith.constant 5 : i32
      %151 = arith.addi %150, %c5_i32_112 : i32
      %c1_113 = arith.constant 1 : index
      %152 = arith.index_cast %151 : i32 to index
      %c0_114 = arith.constant 0 : index
      %153 = vector.load %arg6[%c1_113, %152, %c0_114] : memref<2x32x16xf32, #tpu.memory_space<vmem>>, vector<1x8x16xf32>
      %154 = vector.shape_cast %153 : vector<1x8x16xf32> to vector<8x16xf32>
      %c12 = arith.constant 12 : index
      %c0_115 = arith.constant 0 : index
      %c0_116 = arith.constant 0 : index
      %155 = vector.load %arg4[%c12, %c0_115, %c0_116] : memref<14x16x16xf32, #tpu.memory_space<vmem>>, vector<1x16x16xf32>
      %156 = vector.shape_cast %155 : vector<1x16x16xf32> to vector<16x16xf32>
      %cst_117 = arith.constant dense<0.000000e+00> : vector<8x16xf32>
      %157 = tpu.matmul %154, %156, %cst_117 {dimension_numbers = #tpu.dot_dimension_numbers<[1], [0], [0], [1], [0, 0, 1, 1], [], []>, precision = #tpu.contract_precision<fp32>} : vector<8x16xf32>, vector<16x16xf32>, vector<8x16xf32> -> vector<8x16xf32>
      %158 = arith.addf %149, %157 : vector<8x16xf32>
      %c5_i32_118 = arith.constant 5 : i32
      %159 = arith.addi %c5_i32_118, %40 : i32
      %c6_i32_119 = arith.constant 6 : i32
      %160 = arith.addi %159, %c6_i32_119 : i32
      %c1_120 = arith.constant 1 : index
      %161 = arith.index_cast %160 : i32 to index
      %c0_121 = arith.constant 0 : index
      %162 = vector.load %arg6[%c1_120, %161, %c0_121] : memref<2x32x16xf32, #tpu.memory_space<vmem>>, vector<1x8x16xf32>
      %163 = vector.shape_cast %162 : vector<1x8x16xf32> to vector<8x16xf32>
      %c13 = arith.constant 13 : index
      %c0_122 = arith.constant 0 : index
      %c0_123 = arith.constant 0 : index
      %164 = vector.load %arg4[%c13, %c0_122, %c0_123] : memref<14x16x16xf32, #tpu.memory_space<vmem>>, vector<1x16x16xf32>
      %165 = vector.shape_cast %164 : vector<1x16x16xf32> to vector<16x16xf32>
      %cst_124 = arith.constant dense<0.000000e+00> : vector<8x16xf32>
      %166 = tpu.matmul %163, %165, %cst_124 {dimension_numbers = #tpu.dot_dimension_numbers<[1], [0], [0], [1], [0, 0, 1, 1], [], []>, precision = #tpu.contract_precision<fp32>} : vector<8x16xf32>, vector<16x16xf32>, vector<8x16xf32> -> vector<8x16xf32>
      %167 = arith.addf %158, %166 : vector<8x16xf32>
      %168 = arith.negf %167 : vector<8x16xf32>
      %169 = math.exp %168 : vector<8x16xf32>
      %cst_125 = arith.constant 1.000000e+00 : f32
      %170 = vector.broadcast %cst_125 : f32 to vector<8x16xf32>
      %171 = arith.addf %170, %169 : vector<8x16xf32>
      %172 = arith.divf %170, %171 : vector<8x16xf32>
      %c0_126 = arith.constant 0 : index
      %c0_127 = arith.constant 0 : index
      %173 = arith.index_cast %40 : i32 to index
      %c0_128 = arith.constant 0 : index
      %174 = vector.load %arg5[%c0_126, %c0_127, %173, %c0_128] : memref<1x16x16x16xf32, #tpu.memory_space<vmem>>, vector<1x16x8x16xf32>
      %175 = vector.shape_cast %174 : vector<1x16x8x16xf32> to vector<16x8x16xf32>
      %176 = vector.shape_cast %172 : vector<8x16xf32> to vector<1x8x16xf32>
      %177 = vector.broadcast %176 : vector<1x8x16xf32> to vector<16x8x16xf32>
      %178 = arith.mulf %175, %177 : vector<16x8x16xf32>
      %c0_129 = arith.constant 0 : index
      %c0_130 = arith.constant 0 : index
      %179 = arith.index_cast %40 : i32 to index
      %c0_131 = arith.constant 0 : index
      %180 = vector.load %arg5[%c0_129, %c0_130, %179, %c0_131] : memref<1x16x16x16xf32, #tpu.memory_space<vmem>>, vector<1x16x8x16xf32>
      %181 = vector.shape_cast %180 : vector<1x16x8x16xf32> to vector<16x8x16xf32>
      %182 = vector.shape_cast %178 : vector<16x8x16xf32> to vector<1x16x8x16xf32>
      tpu.vector_store %arg5[%c0_129, %c0_130, %179, %c0_131], %182 {strides = array<i32>} : memref<1x16x16x16xf32, #tpu.memory_space<vmem>>, vector<1x16x8x16xf32>,
    }
    %c2_i32_27 = arith.constant 2 : i32
    return
  }
  func.func @transform_0(%arg0: i32) -> (i32, i32, i32, i32) {
    %c0_i32 = arith.constant 0 : i32
    %c0_i32_0 = arith.constant 0 : i32
    %c0_i32_1 = arith.constant 0 : i32
    %c0_i32_2 = arith.constant 0 : i32
    return %arg0, %c0_i32, %c0_i32_0, %c0_i32_1 : i32, i32, i32, i32
  }
  func.func @transform_1(%arg0: i32) -> (i32, i32, i32) {
    %c0_i32 = arith.constant 0 : i32
    %c0_i32_0 = arith.constant 0 : i32
    %c0_i32_1 = arith.constant 0 : i32
    %c0_i32_2 = arith.constant 0 : i32
    return %c0_i32, %c0_i32_0, %c0_i32_1 : i32, i32, i32
  }
  func.func @transform_2(%arg0: i32) -> (i32, i32, i32) {
    %c0_i32 = arith.constant 0 : i32
    %c0_i32_0 = arith.constant 0 : i32
    %c0_i32_1 = arith.constant 0 : i32
    %c0_i32_2 = arith.constant 0 : i32
    return %c0_i32, %c0_i32_0, %c0_i32_1 : i32, i32, i32
  }
  func.func @transform_3(%arg0: i32) -> (i32, i32, i32) {
    %c0_i32 = arith.constant 0 : i32
    %c0_i32_0 = arith.constant 0 : i32
    %c0_i32_1 = arith.constant 0 : i32
    %c0_i32_2 = arith.constant 0 : i32
    return %c0_i32, %c0_i32_0, %c0_i32_1 : i32, i32, i32
  }
  func.func @transform_4(%arg0: i32) -> (i32, i32, i32, i32) {
    %c0_i32 = arith.constant 0 : i32
    %c0_i32_0 = arith.constant 0 : i32
    %c0_i32_1 = arith.constant 0 : i32
    %c0_i32_2 = arith.constant 0 : i32
    return %arg0, %c0_i32, %c0_i32_0, %c0_i32_1 : i32, i32, i32, i32
  }
}

</mosaic_0001>

<bundles_post_ra>
// kernel: tpu_custom_call.1
= control target key start
LH: loop header
LB: loop body
LE: loop exit
PB: predicated region body
PF: predicated region fallthrough
CT: control target
= control target key end

     0   :  { %9 = vsyncpa [#allocation4], 0  ;;  %s11907_s0 = inlined_call_operand.hbm [shape: f32[2,16,16,16], index: 0, kind: input, shape index: {}]   ;;  %s11908_s1 = inlined_call_operand.vmem [shape: f32[16,1,4], index: 1, kind: input, shape index: {}]   ;;  %s11909_s2 = inlined_call_operand.vmem [shape: f32[16,1,4], index: 2, kind: input, shape index: {}]   ;;  %s11910_s3 = inlined_call_operand.hbm [shape: f32[14,16,16], index: 3, kind: input, shape index: {}]   ;;  %s11911_s4 = inlined_call_operand.hbm [shape: f32[2,16,16,16], index: 4, kind: output, shape index: {}]  }
   0x1   :  { %11 = vsyncpa [#allocation4 + $0x1], 0 }
   0x2   :  { %12 = vsyncpa [#allocation7], 0 }
   0x3   :  { %13 = vsyncpa [#allocation5], 0 }
   0x4   :  { %15 = vsyncpa [#allocation5 + $0x1], 0  ;;  %s9840_s15 = smov 0   ;;  %s9842_s16 = smov 0  }
   0x5   :  { %s9844_s17 = smov 0   ;;  %s9846_s18 = smov 0  }
   0x6 LB: > { %s9861_s19 = sadd.s32 4294967295, %s9663_s18   ;;  %s8079_s20 = sadd.s32 4294967294, %s9663_s18   ;;  %s9663_s18 = sphi %s9846_s18, %s12020_s18   ;;  %s9659_s17 = sphi %s9844_s17, %s12019_s17   ;;  %s9655_s16 = sphi %s9842_s16, %s12018_s16   ;;  %s9651_s15 = sphi %s9840_s15, %s12017_s15  }
   0x7   : > { %p41_p0 = scmp.ne.s32.totalorder %s9655_s16, %s9651_s15  ;;  %p11912_p1 = scmp.eq.s32.totalorder %s9861_s19, 0 }
   0x8   : > { %p134_p3 = scmp.eq.s32.totalorder %s8079_s20, 1  ;;  %p8080_p5 = scmp.ge.s32.totalorder %s9663_s18, 1 }
   0x9   : > { %p9870_p4 = por %p11912_p1, %p41_p0  ;;  %p141_p7 = scmp.lt.s32.totalorder %s9663_s18, 3 }
   0xa   : > { %p9875_p6 = por %p134_p3, %p41_p0  ;;  %s9805_s24 = smov [#allocation6]  }
   0xb   : > { %s11921_s21 = scalar_select %p9870_p4, 1, 0 }
   0xc   : > { %s11922_s22 = scalar_select %p9875_p6, 1, 0 }
   0xd   : > { %p9880_p8 = pnand %p8080_p5, %p141_p7  ;;  %s159_s25 = sshll.u32 %s9805_s24, 4  ;;  %s160_s25 = int_to_ptr.vmem [resolvable:$true] %s159_s25 }
   0xe   : > { %s9894_s27 = sadd.s32 1, %s9663_s18   ;;  %s28_s28 = sadd.s32 1, %s9659_s17 }
   0xf   : > { %s11923_s23 = scalar_select %p9880_p8, 1, 0 }
  0x10   : > { %p8997_p9 = pneg %p9880_p8  ;;  %s25_s29 = ssub.s32 %s9663_s18, %s9894_s27 }
  0x11   : > { %s9412_s30 = scalar_lea.vmem %s160_s25, 3584  ;;  %p9420_p5 = scmp.lt.s32.totalorder %s160_s25, %s160_s25 }
  0x12   : > { %p9889_p11 = pnand %p8997_p9, %p11912_p1  ;;  %p9413_p13 = scmp.ne.s32.totalorder %s160_s25, %s9412_s30 }
  0x13   : > { %p9421_p7 = scmp.lt.s32.totalorder %s9412_s30, %s9412_s30 }
  0x14   : > { %p9403_p12 = pneg %p9889_p11 }
  0x15   : > { %p9422_p10 = por %p9421_p7, %p9420_p5 }
  0x16   : > { %p9415_p0 = pnand %p9413_p13, %p9403_p12 }
  0x18   : > { %p9416_p3 = pneg %p9415_p0 }
  0x1a   : > { %p9423_p2 = pnand %p9422_p10, %p9416_p3 }
  0x1c   : > { %9426 = shalt.err (!%p9423_p2)
}
  0x1d   : > { %s9806_s5 = smov 128   ;;  %s9807_s6 = smov 8  }
  0x1e   : > { %9000 = dma.hbm_to_vmem [thread:$0]  (!%p9889_p11), %s11910_s3, 3584, %s160_s25, [#allocation7], %s9806_s5, %s9806_s5, %s9807_s6  }
  0x1f   : > { %p26_p2 = scmp.eq.s32.totalorder %s25_s29, 0  ;;  %p35_p9 = scmp.ne.s32.totalorder %s9659_s17, %s9655_s16 }
  0x20   : > { %p36_p10 = scmp.eq.s32.totalorder %s9663_s18, 0  ;;  %p9010_p12 = scmp.lt.s32.totalorder %s9663_s18, 2 }
  0x21   : > { %s9914_s9 = scalar_select %p26_p2, %s9659_s17, %s28_s28  }
  0x22   : > { %p37_p13 = por %p36_p10, %p35_p9  ;;  %p11925_p0 = scmp.eq.s32.totalorder %s9861_s19, 1 }
  0x23   : > { %s173_s11 = sand.u32 1, %s9659_s17   ;;  %s8147_s12 = sshll.u32 %s9663_s18, 12 }
  0x24   : > { %p9918_p3 = por %p11925_p0, %p35_p9  ;;  %s8083_s13 = sshll.u32 %s173_s11, 8 }
  0x25   : > { %s9927_s24 = scalar_lea.hbm %s11907_s0, %s8147_s12  ;;  %s177_s25 = scalar_lea.vmem [#allocation3], %s8083_s13 }
  0x26   : > { %s11926_s10 = scalar_select %p9918_p3, 1, 0 }
  0x27   : > { %s184_s26 = sshll.u32 %s177_s25, 4  ;;  %p9929_p11 = pnand %p9010_p12, %p37_p13  ;;  %s9933_s26 = int_to_ptr.vmem [resolvable:$true] %s184_s26 }
  0x28   : > { %s9935_s29 = scalar_lea.sflag [#allocation4], %s173_s11  ;;  %s9427_s30 = scalar_lea.hbm %s9927_s24, 4096 }
  0x29   : > { %p9428_p5 = scmp.ne.s32.totalorder %s9927_s24, %s9427_s30  ;;  %p9429_p7 = pneg %p9929_p11 }
  0x2a   : > { %s9432_s12 = scalar_lea.hbm %s11907_s0, 8192  ;;  %p9433_p10 = scmp.lt.s32.totalorder %s9927_s24, %s11907_s0 }
  0x2b   : > { %p9430_p2 = pnand %p9429_p7, %p9428_p5  ;;  %p9434_p12 = scmp.lt.s32.totalorder %s9432_s12, %s9427_s30 }
  0x2d   : > { %p9431_p9 = pneg %p9430_p2  ;;  %p9435_p13 = por %p9434_p12, %p9433_p10 }
  0x2f   : > { %p9436_p0 = pnand %p9435_p13, %p9431_p9 }
  0x31   : > { %9439 = shalt.err (!%p9436_p0)
}
  0x32   : > { %s9440_s11 = scalar_lea.vmem %s9933_s26, 4096  ;;  %s9808_s20 = smov [#allocation3]  }
  0x33   : > { %p9441_p1 = scmp.ne.s32.totalorder %s9933_s26, %s9440_s11  ;;  %s9445_s25 = sshll.u32 %s9808_s20, 4  ;;  %s9446_s25 = int_to_ptr.vmem [resolvable:$false] %s9445_s25 }
  0x34   : > { %s9447_s7 = scalar_lea.vmem %s9446_s25, 8192  ;;  %p9448_p2 = scmp.lt.s32.totalorder %s9933_s26, %s9446_s25 }
  0x35   : > { %p9443_p6 = pnand %p9441_p1, %p9429_p7  ;;  %p9449_p3 = scmp.lt.s32.totalorder %s9447_s7, %s9440_s11 }
  0x37   : > { %p9444_p5 = pneg %p9443_p6  ;;  %p9450_p4 = por %p9449_p3, %p9448_p2 }
  0x39   : > { %p9451_p8 = pnand %p9450_p4, %p9444_p5 }
  0x3b   : > { %9454 = shalt.err (!%p9451_p8)
}
  0x3c   : > { %9004 = dma.hbm_to_vmem [thread:$0]  (!%p9929_p11), %s9927_s24, 4096, %s9933_s26, %s9935_s29, %s9806_s5, %s9806_s5, %s9807_s6  }
  0x3d   : > { %p11928_p1 = scmp.ne.s32.totalorder %s11923_s23, 0 }
  0x3f   : > { %196 = sbr.rel (%p11928_p1) target bundleno = 1134 (0x46e), region = 36 }
  0x44   : > { %s9962_s30 = sand.u32 1, %s9655_s16   ;;  %p11929_p4 = scmp.ne.s32.totalorder %s11921_s21, 0 }
  0x45   : > { %s8087_s8 = sshll.u32 %s9962_s30, 8  ;;  %s199_s12 = scalar_lea.sflag [#allocation4], %s9962_s30 }
  0x46   : > { %s9966_s13 = scalar_lea.vmem [#allocation3], %s8087_s8 }
  0x47   : > { %9638 = dma.done.wait (%p11929_p4), %s199_s12, 4096  }
  0x48   : > { %9640 = vsyncadd (%p11929_p4), %s199_s12, 4294963200  ;;  %p11930_p6 = scmp.eq.s32.totalorder %s9861_s19, 0 }
  0x4a   : > { %9642 = dma.done.wait (%p11930_p6), [#allocation7], 3584   ;;  %p11931_p8 = pmov %p11930_p6 }
  0x4b   : > { %s9976_s23 = scalar_lea.vmem [#allocation8], %s8087_s8  ;;  %v9978_v0 = vmov 0.0   ;;  %v9980_v1 = vmov 0.0   ;;  %v9982_v2 = vmov 0.0   ;;  %v9984_v3 = vmov 0.0   ;;  %s10042_s21 = smov 0  }
  0x4c   : > { %9644 = vsyncadd (%p11931_p8), [#allocation7], 4294963712  ;;  %v9986_v4 = vmov 0.0   ;;  %v9988_v5 = vmov 0.0   ;;  %v9990_v6 = vmov 0.0   ;;  %v9992_v7 = vmov 0.0  }
  0x4d   : > { %v9994_v8 = vmov 0.0   ;;  %v9996_v9 = vmov 0.0   ;;  %v9998_v10 = vmov 0.0   ;;  %v10000_v11 = vmov 0.0  }
  0x4e   : > { %v10002_v12 = vmov 0.0   ;;  %v10004_v13 = vmov 0.0   ;;  %v10006_v14 = vmov 0.0   ;;  %v10008_v15 = vmov 0.0  }
  0x4f   : > { %v10010_v16 = vmov -inf   ;;  %v10012_v17 = vmov -inf   ;;  %v10014_v18 = vmov -inf   ;;  %v10016_v19 = vmov -inf  }
  0x50   : > { %v10018_v20 = vmov -inf   ;;  %v10020_v21 = vmov -inf   ;;  %v10022_v22 = vmov -inf   ;;  %v10024_v23 = vmov -inf  }
  0x51   : > { %v10026_v24 = vmov -inf   ;;  %v10028_v25 = vmov -inf   ;;  %v10030_v26 = vmov -inf   ;;  %v10032_v27 = vmov -inf  }
  0x52   : > { %v10034_v28 = vmov -inf   ;;  %v10036_v29 = vmov -inf   ;;  %v10038_v30 = vmov -inf   ;;  %v10040_v31 = vmov -inf  }
  0x53 LB: >> { %s8090_s5 = sshll.u32 %s9795_s21, 3  ;;  %vm287_vm0 = vcmask 130048   ;;  %s236_s24 = sadd.s32 1, %s9795_s21   ;;  %s9795_s21 = sphi %s10042_s21, %s12006_s21   ;;  %v9791_v31 = vphi %v10040_v31, %v12005_v31   ;;  %v9787_v30 = vphi %v10038_v30, %v12004_v30   ;;  %v9783_v29 = vphi %v10036_v29, %v12003_v29   ;;  %v9779_v28 = vphi %v10034_v28, %v12002_v28   ;;  %v9775_v27 = vphi %v10032_v27, %v12001_v27   ;;  %v9771_v26 = vphi %v10030_v26, %v12000_v26   ;;  %v9767_v25 = vphi %v10028_v25, %v11999_v25   ;;  %v9763_v24 = vphi %v10026_v24, %v11998_v24   ;;  %v9759_v23 = vphi %v10024_v23, %v11997_v23   ;;  %v9755_v22 = vphi %v10022_v22, %v11996_v22   ;;  %v9751_v21 = vphi %v10020_v21, %v11995_v21   ;;  %v9747_v20 = vphi %v10018_v20, %v11994_v20   ;;  %v9743_v19 = vphi %v10016_v19, %v11993_v19   ;;  %v9739_v18 = vphi %v10014_v18, %v11992_v18   ;;  %v9735_v17 = vphi %v10012_v17, %v11991_v17   ;;  %v9731_v16 = vphi %v10010_v16, %v11990_v16   ;;  %v9727_v15 = vphi %v10008_v15, %v11989_v15   ;;  %v9723_v14 = vphi %v10006_v14, %v11988_v14   ;;  %v9719_v13 = vphi %v10004_v13, %v11987_v13   ;;  %v9715_v12 = vphi %v10002_v12, %v11986_v12   ;;  %v9711_v11 = vphi %v10000_v11, %v11985_v11   ;;  %v9707_v10 = vphi %v9998_v10, %v11984_v10   ;;  %v9703_v9 = vphi %v9996_v9, %v11983_v9   ;;  %v9699_v8 = vphi %v9994_v8, %v11982_v8   ;;  %v9695_v7 = vphi %v9992_v7, %v11981_v7   ;;  %v9691_v6 = vphi %v9990_v6, %v11980_v6   ;;  %v9687_v5 = vphi %v9988_v5, %v11979_v5   ;;  %v9683_v4 = vphi %v9986_v4, %v11978_v4   ;;  %v9679_v3 = vphi %v9984_v3, %v11977_v3   ;;  %v9675_v2 = vphi %v9982_v2, %v11975_v2   ;;  %v9671_v1 = vphi %v9980_v1, %v11973_v1   ;;  %v9667_v0 = vphi %v9978_v0, %v11971_v0  }
  0x54   : >> { %s10145_s6 = scalar_lea.vmem %s9966_s13, %s8090_s5 [#allocation3]  ;;  %p10294_p3 = scmp.ge.s32.totalorder %s236_s24, 2  }
  0x55   : >> { %v273_v32 = vld [vmem:[%s10145_s6 + $0x20] sm:$0xff]  ;;  %v274_v34 = vld [vmem:[%s10145_s6 + $0x30] sm:$0xff]  ;;  %s12006_s21 = smov %s236_s24  ;;  %vm672_vm1 = vcmask (%p10294_p3), 24576   ;;  %vm993_vm2 = vcmask (%p10294_p3), 124928   ;;  %s10738_s12 = smov (%p10294_p3), 0  }
  0x56   : >> { %v271_v33 = vld [vmem:[%s10145_s6] sm:$0xff]  ;;  %v294_v35 = vsel %vm287_vm0, %v273_v32, -inf  ;;  %v272_v37 = vld [vmem:[%s10145_s6 + $0x10] sm:$0xff]  ;;  %v297_v38 = vsel %vm287_vm0, %v274_v34, -inf }
  0x57   : >> { %v288_v36 = vsel %vm287_vm0, %v271_v33, -inf  ;;  %295 = vmax.xlane.f32.xlu1 %v294_v35  ;;  %v291_v39 = vsel %vm287_vm0, %v272_v37, -inf  ;;  %v276_v40 = vld [vmem:[%s10145_s6 + $0x50] sm:$0xff]  ;;  %v275_v41 = vld [vmem:[%s10145_s6 + $0x40] sm:$0xff]  ;;  %v435_v35 = vsel %vm287_vm0, %v272_v37, 0.0 }
  0x58   : >> { %289 = vmax.xlane.f32.xlu0 %v288_v36  ;;  %v303_v42 = vsel %vm287_vm0, %v276_v40, -inf  ;;  %v300_v43 = vsel %vm287_vm0, %v275_v41, -inf  ;;  %v278_v44 = vld [vmem:[%s10145_s6 + $0x70] sm:$0xff]  ;;  %v277_v45 = vld [vmem:[%s10145_s6 + $0x60] sm:$0xff]  ;;  %v432_v36 = vsel %vm287_vm0, %v271_v33, 0.0 }
  0x59   : >> { %v309_v46 = vsel %vm287_vm0, %v278_v44, -inf  ;;  %v306_v47 = vsel %vm287_vm0, %v277_v45, -inf  ;;  %v280_v48 = vld [vmem:[%s10145_s6 + $0x90] sm:$0xff]  ;;  %v279_v49 = vld [vmem:[%s10145_s6 + $0x80] sm:$0xff]  ;;  %v450_v37 = vsel %vm287_vm0, %v277_v45, 0.0 }
  0x5a   : >> { %v315_v50 = vsel %vm287_vm0, %v280_v48, -inf  ;;  %v312_v51 = vsel %vm287_vm0, %v279_v49, -inf  ;;  %v282_v52 = vld [vmem:[%s10145_s6 + $0xb0] sm:$0xff]  ;;  %v281_v53 = vld [vmem:[%s10145_s6 + $0xa0] sm:$0xff]  ;;  %v459_v33 = vsel %vm287_vm0, %v280_v48, 0.0 }
  0x5b   : >> { %298 = vmax.xlane.f32.xlu1 %v297_v38  ;;  %v321_v54 = vsel %vm287_vm0, %v282_v52, -inf  ;;  %v318_v55 = vsel %vm287_vm0, %v281_v53, -inf  ;;  %v284_v56 = vld [vmem:[%s10145_s6 + $0xd0] sm:$0xff]  ;;  %v283_v57 = vld [vmem:[%s10145_s6 + $0xc0] sm:$0xff]  ;;  %v441_v38 = vsel %vm287_vm0, %v274_v34, 0.0  ;;  %v456_v34 = vsel %vm287_vm0, %v279_v49, 0.0 }
  0x5c   : >> { %292 = vmax.xlane.f32.xlu0 %v291_v39  ;;  %v327_v58 = vsel %vm287_vm0, %v284_v56, -inf  ;;  %v324_v59 = vsel %vm287_vm0, %v283_v57, -inf  ;;  %v286_v60 = vld [vmem:[%s10145_s6 + $0xf0] sm:$0xff]  ;;  %v285_v61 = vld [vmem:[%s10145_s6 + $0xe0] sm:$0xff]  ;;  %v438_v39 = vsel %vm287_vm0, %v273_v32, 0.0  ;;  %v465_v32 = vsel %vm287_vm0, %v282_v52, 0.0 }
  0x5d   : >> { %v333_v62 = vsel %vm287_vm0, %v286_v60, -inf  ;;  %v330_v63 = vsel %vm287_vm0, %v285_v61, -inf  ;;  %v477_v45 = vsel %vm287_vm0, %v286_v60, 0.0 }
  0x5f   : >> { %304 = vmax.xlane.f32.xlu1 %v303_v42  ;;  %v447_v42 = vsel %vm287_vm0, %v276_v40, 0.0  ;;  %v462_v40 = vsel %vm287_vm0, %v281_v53, 0.0 }
  0x60   : >> { %301 = vmax.xlane.f32.xlu0 %v300_v43  ;;  %v444_v43 = vsel %vm287_vm0, %v275_v41, 0.0  ;;  %v471_v41 = vsel %vm287_vm0, %v284_v56, 0.0 }
  0x63   : >> { %310 = vmax.xlane.f32.xlu1 %v309_v46  ;;  %v453_v46 = vsel %vm287_vm0, %v278_v44, 0.0  ;;  %v468_v44 = vsel %vm287_vm0, %v283_v57, 0.0 }
  0x64   : >> { %307 = vmax.xlane.f32.xlu0 %v306_v47  ;;  %v474_v47 = vsel %vm287_vm0, %v285_v61, 0.0 }
  0x67   : >> { %316 = vmax.xlane.f32.xlu1 %v315_v50 }
  0x68   : >> { %313 = vmax.xlane.f32.xlu0 %v312_v51 }
  0x6b   : >> { %322 = vmax.xlane.f32.xlu1 %v321_v54 }
  0x6c   : >> { %319 = vmax.xlane.f32.xlu0 %v318_v55 }
  0x6f   : >> { %328 = vmax.xlane.f32.xlu1 %v327_v58 }
  0x70   : >> { %325 = vmax.xlane.f32.xlu0 %v324_v59 }
  0x73   : >> { %334 = vmax.xlane.f32.xlu1 %v333_v62 }
  0x74   : >> { %331 = vmax.xlane.f32.xlu0 %v330_v63 }
  0x77   : >> { %436 = vadd.xlane.f32.xlu1 %v435_v35 }
  0x78   : >> { %433 = vadd.xlane.f32.xlu0 %v432_v36 }
  0x7b   : >> { %442 = vadd.xlane.f32.xlu1 %v441_v38 }
  0x7c   : >> { %439 = vadd.xlane.f32.xlu0 %v438_v39 }
  0x7f   : >> { %448 = vadd.xlane.f32.xlu1 %v447_v42 }
  0x80   : >> { %445 = vadd.xlane.f32.xlu0 %v444_v43 }
  0x83   : >> { %454 = vadd.xlane.f32.xlu1 %v453_v46 }
  0x84   : >> { %451 = vadd.xlane.f32.xlu0 %v450_v37 }
  0x87   : >> { %460 = vadd.xlane.f32.xlu1 %v459_v33 }
  0x88   : >> { %457 = vadd.xlane.f32.xlu0 %v456_v34 }
  0x8b   : >> { %466 = vadd.xlane.f32.xlu1 %v465_v32 }
  0x8c   : >> { %463 = vadd.xlane.f32.xlu0 %v462_v40 }
  0x8f   : >> { %472 = vadd.xlane.f32.xlu1 %v471_v41 }
  0x90   : >> { %469 = vadd.xlane.f32.xlu0 %v468_v44 }
  0x93   : >> { %478 = vadd.xlane.f32.xlu1 %v477_v45 }
  0x94   : >> { %475 = vadd.xlane.f32.xlu0 %v474_v47 }
  0xe0   : >> { %v296_v48 = vpop.xlane.xlu1 %295 }
  0xe1   : >> { %v290_v49 = vpop.xlane.xlu0 %289  ;;  %v348_v50 = vrot.slane %v296_v48, 4 }
  0xe2   : >> { %v336_v51 = vrot.slane %v290_v49, 4 }
  0xe3   : >> { %v349_v52 = vmax.f32 %v296_v48, %v348_v50 }
  0xe4   : >> { %v337_v53 = vmax.f32 %v290_v49, %v336_v51  ;;  %v299_v54 = vpop.xlane.xlu1 %298 }
  0xe5   : >> { %v293_v55 = vpop.xlane.xlu0 %292  ;;  %v350_v58 = vrot.slane %v349_v52, 2  ;;  %v354_v59 = vrot.slane %v299_v54, 4 }
  0xe6   : >> { %v338_v56 = vrot.slane %v337_v53, 2  ;;  %v342_v57 = vrot.slane %v293_v55, 4 }
  0xe7   : >> { %v351_v62 = vmax.f32 %v349_v52, %v350_v58  ;;  %v355_v35 = vmax.f32 %v299_v54, %v354_v59 }
  0xe8   : >> { %v339_v63 = vmax.f32 %v337_v53, %v338_v56  ;;  %v343_v60 = vmax.f32 %v293_v55, %v342_v57  ;;  %v305_v36 = vpop.xlane.xlu1 %304 }
  0xe9   : >> { %v302_v61 = vpop.xlane.xlu0 %301  ;;  %v352_v38 = vrot.slane %v351_v62, 1  ;;  %v356_v42 = vrot.slane %v355_v35, 2  ;;  %v366_v46 = vrot.slane %v305_v36, 4 }
  0xea   : >> { %v340_v39 = vrot.slane %v339_v63, 1  ;;  %v344_v43 = vrot.slane %v343_v60, 2  ;;  %v360_v37 = vrot.slane %v302_v61, 4 }
  0xeb   : >> { %v353_v33 = vmax.f32 %v351_v62, %v352_v38  ;;  %v357_v32 = vmax.f32 %v355_v35, %v356_v42  ;;  %v367_v41 = vmax.f32 %v305_v36, %v366_v46 }
  0xec   : >> { %v341_v34 = vmax.f32 %v339_v63, %v340_v39  ;;  %v345_v40 = vmax.f32 %v343_v60, %v344_v43  ;;  %v361_v44 = vmax.f32 %v302_v61, %v360_v37  ;;  %v311_v45 = vpop.xlane.xlu1 %310 }
  0xed   : >> { %v308_v47 = vpop.xlane.xlu0 %307  ;;  %v10196_v29 = vmax.f32 %v9783_v29, %v353_v33   ;;  %v358_v50 = vrot.slane %v357_v32, 1  ;;  %v368_v52 = vrot.slane %v367_v41, 2  ;;  %v378_v54 = vrot.slane %v311_v45, 4 }
  0xee   : >> { %v10199_v31 = vmax.f32 %v9791_v31, %v341_v34   ;;  %v346_v51 = vrot.slane %v345_v40, 1  ;;  %v362_v53 = vrot.slane %v361_v44, 2  ;;  %v372_v55 = vrot.slane %v308_v47, 4 }
  0xef   : >> { %v11932_v48 = vmov %v10196_v29  ;;  %v359_v58 = vmax.f32 %v357_v32, %v358_v50  ;;  %v369_v59 = vmax.f32 %v367_v41, %v368_v52  ;;  %v379_v62 = vmax.f32 %v311_v45, %v378_v54 }
  0xf0   : >> { %11933 = vst [vmem:[#allocation12_spill] sm:$0xff] %v10199_v31  ;;  %v347_v56 = vmax.f32 %v345_v40, %v346_v51  ;;  %v363_v57 = vmax.f32 %v361_v44, %v362_v53  ;;  %v373_v63 = vmax.f32 %v308_v47, %v372_v55  ;;  %v317_v35 = vpop.xlane.xlu1 %316 }
  0xf1   : >> { %v314_v60 = vpop.xlane.xlu0 %313  ;;  %v10202_v28 = vmax.f32 %v9779_v28, %v359_v58   ;;  %v390_v29 = vrot.slane %v317_v35, 4  ;;  %v370_v38 = vrot.slane %v369_v59, 1  ;;  %v380_v42 = vrot.slane %v379_v62, 2 }
  0xf2   : >> { %v10205_v30 = vmax.f32 %v9787_v30, %v347_v56   ;;  %v384_v31 = vrot.slane %v314_v60, 4  ;;  %v364_v39 = vrot.slane %v363_v57, 1  ;;  %v374_v43 = vrot.slane %v373_v63, 2 }
  0xf3   : >> { %v11934_v36 = vmov %v10202_v28  ;;  %v391_v46 = vmax.f32 %v317_v35, %v390_v29  ;;  %v371_v33 = vmax.f32 %v369_v59, %v370_v38  ;;  %v381_v32 = vmax.f32 %v379_v62, %v380_v42 }
  0xf4   : >> { %11935 = vst [vmem:[#allocation13_spill] sm:$0xff] %v10205_v30  ;;  %v385_v37 = vmax.f32 %v314_v60, %v384_v31  ;;  %v365_v34 = vmax.f32 %v363_v57, %v364_v39  ;;  %v375_v40 = vmax.f32 %v373_v63, %v374_v43  ;;  %v323_v41 = vpop.xlane.xlu1 %322 }
  0xf5   : >> { %v320_v44 = vpop.xlane.xlu0 %319  ;;  %v392_v45 = vrot.slane %v391_v46, 2  ;;  %v402_v28 = vrot.slane %v323_v41, 4  ;;  %v10208_v26 = vmax.f32 %v9771_v26, %v371_v33   ;;  %v382_v30 = vrot.slane %v381_v32, 1 }
  0xf6   : >> { %v386_v47 = vrot.slane %v385_v37, 2  ;;  %v396_v50 = vrot.slane %v320_v44, 4  ;;  %v10211_v27 = vmax.f32 %v9775_v27, %v365_v34   ;;  %v376_v53 = vrot.slane %v375_v40, 1 }
  0xf7   : >> { %v11936_v51 = vmov %v10208_v26  ;;  %v393_v54 = vmax.f32 %v391_v46, %v392_v45  ;;  %v403_v58 = vmax.f32 %v323_v41, %v402_v28  ;;  %v383_v59 = vmax.f32 %v381_v32, %v382_v30 }
  0xf8   : >> { %v11937_v52 = vmov %v10211_v27  ;;  %v387_v55 = vmax.f32 %v385_v37, %v386_v47  ;;  %v397_v56 = vmax.f32 %v320_v44, %v396_v50  ;;  %v377_v57 = vmax.f32 %v375_v40, %v376_v53  ;;  %v329_v62 = vpop.xlane.xlu1 %328 }
  0xf9   : >> { %v326_v63 = vpop.xlane.xlu0 %325  ;;  %v394_v35 = vrot.slane %v393_v54, 1  ;;  %v404_v29 = vrot.slane %v403_v58, 2  ;;  %v10214_v24 = vmax.f32 %v9763_v24, %v383_v59   ;;  %v414_v26 = vrot.slane %v329_v62, 4 }
  0xfa   : >> { %v388_v60 = vrot.slane %v387_v55, 1  ;;  %v398_v31 = vrot.slane %v397_v56, 2  ;;  %v10217_v25 = vmax.f32 %v9767_v25, %v377_v57   ;;  %v408_v27 = vrot.slane %v326_v63, 4 }
  0xfb   : >> { %v11938_v38 = vmov %v10214_v24  ;;  %v395_v42 = vmax.f32 %v393_v54, %v394_v35  ;;  %v405_v46 = vmax.f32 %v403_v58, %v404_v29  ;;  %v415_v33 = vmax.f32 %v329_v62, %v414_v26 }
  0xfc   : >> { %v11939_v39 = vmov %v10217_v25  ;;  %v389_v43 = vmax.f32 %v387_v55, %v388_v60  ;;  %v399_v37 = vmax.f32 %v397_v56, %v398_v31  ;;  %v409_v34 = vmax.f32 %v326_v63, %v408_v27  ;;  %v335_v32 = vpop.xlane.xlu1 %334 }
  0xfd   : >> { %v332_v40 = vpop.xlane.xlu0 %331  ;;  %v10220_v22 = vmax.f32 %v9755_v22, %v395_v42   ;;  %v406_v24 = vrot.slane %v405_v46, 1  ;;  %v416_v47 = vrot.slane %v415_v33, 2  ;;  %v426_v28 = vrot.slane %v335_v32, 4 }
  0xfe   : >> { %v10223_v23 = vmax.f32 %v9759_v23, %v389_v43   ;;  %v400_v45 = vrot.slane %v399_v37, 1  ;;  %v410_v25 = vrot.slane %v409_v34, 2  ;;  %v420_v50 = vrot.slane %v332_v40, 4 }
  0xff   : >> { %v11940_v41 = vmov %v10220_v22  ;;  %v407_v30 = vmax.f32 %v405_v46, %v406_v24  ;;  %v417_v54 = vmax.f32 %v415_v33, %v416_v47  ;;  %v427_v58 = vmax.f32 %v335_v32, %v426_v28 }
 0x100   : >> { %v11941_v44 = vmov %v10223_v23  ;;  %v401_v53 = vmax.f32 %v399_v37, %v400_v45  ;;  %v411_v55 = vmax.f32 %v409_v34, %v410_v25  ;;  %v421_v56 = vmax.f32 %v332_v40, %v420_v50  ;;  %v437_v59 = vpop.xlane.xlu1 %436 }
 0x101   : >> { %v434_v57 = vpop.xlane.xlu0 %433  ;;  %v10226_v20 = vmax.f32 %v9747_v20, %v407_v30   ;;  %v486_v22 = vrot.slane %v437_v59, 4  ;;  %v418_v35 = vrot.slane %v417_v54, 1  ;;  %v428_v29 = vrot.slane %v427_v58, 2 }
 0x102   : >> { %v10229_v21 = vmax.f32 %v9751_v21, %v401_v53   ;;  %v480_v23 = vrot.slane %v434_v57, 4  ;;  %v412_v60 = vrot.slane %v411_v55, 1  ;;  %v422_v31 = vrot.slane %v421_v56, 2 }
 0x103   : >> { %v11942_v62 = vmov %v10226_v20  ;;  %v487_v26 = vadd.f32 %v486_v22, %v437_v59  ;;  %v419_v42 = vmax.f32 %v417_v54, %v418_v35  ;;  %v429_v46 = vmax.f32 %v427_v58, %v428_v29 }
 0x104   : >> { %v11943_v63 = vmov %v10229_v21  ;;  %v481_v27 = vadd.f32 %v480_v23, %v434_v57  ;;  %v413_v43 = vmax.f32 %v411_v55, %v412_v60  ;;  %v423_v37 = vmax.f32 %v421_v56, %v422_v31  ;;  %v443_v33 = vpop.xlane.xlu1 %442 }
 0x105   : >> { %v440_v34 = vpop.xlane.xlu0 %439  ;;  %v488_v32 = vrot.slane %v487_v26, 2  ;;  %v498_v20 = vrot.slane %v443_v33, 4  ;;  %v10232_v18 = vmax.f32 %v9739_v18, %v419_v42   ;;  %v430_v21 = vrot.slane %v429_v46, 1 }
 0x106   : >> { %v482_v40 = vrot.slane %v481_v27, 2  ;;  %v492_v24 = vrot.slane %v440_v34, 4  ;;  %v10235_v19 = vmax.f32 %v9743_v19, %v413_v43   ;;  %v424_v25 = vrot.slane %v423_v37, 1 }
 0x107   : >> { %v11944_v45 = vmov %v10232_v18  ;;  %v489_v28 = vadd.f32 %v488_v32, %v487_v26  ;;  %v499_v30 = vadd.f32 %v498_v20, %v443_v33  ;;  %v431_v54 = vmax.f32 %v429_v46, %v430_v21 }
 0x108   : >> { %v11945_v47 = vmov %v10235_v19  ;;  %v483_v50 = vadd.f32 %v482_v40, %v481_v27  ;;  %v493_v53 = vadd.f32 %v492_v24, %v440_v34  ;;  %v425_v55 = vmax.f32 %v423_v37, %v424_v25  ;;  %v449_v58 = vpop.xlane.xlu1 %448 }
 0x109   : >> { %v446_v56 = vpop.xlane.xlu0 %445  ;;  %v490_v59 = vrot.slane %v489_v28, 1  ;;  %v500_v22 = vrot.slane %v499_v30, 2  ;;  %v10238_v16 = vmax.f32 %v9731_v16, %v431_v54   ;;  %v510_v18 = vrot.slane %v449_v58, 4 }
 0x10a   : >> { %v484_v57 = vrot.slane %v483_v50, 1  ;;  %v494_v23 = vrot.slane %v493_v53, 2  ;;  %v10241_v17 = vmax.f32 %v9735_v17, %v425_v55   ;;  %v504_v19 = vrot.slane %v446_v56, 4 }
 0x10b   : >> { %v11946_v35 = vmov %v10238_v16  ;;  %v491_v29 = vadd.f32 %v490_v59, %v489_v28  ;;  %v501_v26 = vadd.f32 %v500_v22, %v499_v30  ;;  %v511_v42 = vadd.f32 %v510_v18, %v449_v58 }
 0x10c   : >> { %v11947_v60 = vmov %v10241_v17  ;;  %v485_v31 = vadd.f32 %v484_v57, %v483_v50  ;;  %v495_v27 = vadd.f32 %v494_v23, %v493_v53  ;;  %v505_v43 = vadd.f32 %v504_v19, %v446_v56  ;;  %v455_v46 = vpop.xlane.xlu1 %454 }
 0x10d   : >> { %v452_v37 = vpop.xlane.xlu0 %451  ;;  %v10244_v14 = vadd.f32 %v9723_v14, %v491_v29   ;;  %v502_v16 = vrot.slane %v501_v26, 1  ;;  %v512_v40 = vrot.slane %v511_v42, 2  ;;  %v522_v20 = vrot.slane %v455_v46, 4 }
 0x10e   : >> { %v10247_v15 = vadd.f32 %v9727_v15, %v485_v31   ;;  %v496_v32 = vrot.slane %v495_v27, 1  ;;  %v506_v17 = vrot.slane %v505_v43, 2  ;;  %v516_v24 = vrot.slane %v452_v37, 4 }
 0x10f   : >> { %v11948_v33 = vmov %v10244_v14  ;;  %v503_v21 = vadd.f32 %v502_v16, %v501_v26  ;;  %v513_v28 = vadd.f32 %v512_v40, %v511_v42  ;;  %v523_v30 = vadd.f32 %v522_v20, %v455_v46 }
 0x110   : >> { %v11949_v34 = vmov %v10247_v15  ;;  %v497_v25 = vadd.f32 %v496_v32, %v495_v27  ;;  %v507_v50 = vadd.f32 %v506_v17, %v505_v43  ;;  %v517_v53 = vadd.f32 %v516_v24, %v452_v37  ;;  %v461_v54 = vpop.xlane.xlu1 %460 }
 0x111   : >> { %v458_v55 = vpop.xlane.xlu0 %457  ;;  %v10250_v12 = vadd.f32 %v9715_v12, %v503_v21   ;;  %v534_v14 = vrot.slane %v461_v54, 4  ;;  %v514_v59 = vrot.slane %v513_v28, 1  ;;  %v524_v22 = vrot.slane %v523_v30, 2 }
 0x112   : >> { %v10253_v13 = vadd.f32 %v9719_v13, %v497_v25   ;;  %v528_v15 = vrot.slane %v458_v55, 4  ;;  %v508_v57 = vrot.slane %v507_v50, 1  ;;  %v518_v23 = vrot.slane %v517_v53, 2 }
 0x113   : >> { %v11950_v58 = vmov %v10250_v12  ;;  %v535_v18 = vadd.f32 %v534_v14, %v461_v54  ;;  %v515_v29 = vadd.f32 %v514_v59, %v513_v28  ;;  %v525_v26 = vadd.f32 %v524_v22, %v523_v30 }
 0x114   : >> { %v11951_v56 = vmov %v10253_v13  ;;  %v529_v19 = vadd.f32 %v528_v15, %v458_v55  ;;  %v509_v31 = vadd.f32 %v508_v57, %v507_v50  ;;  %v519_v27 = vadd.f32 %v518_v23, %v517_v53  ;;  %v467_v42 = vpop.xlane.xlu1 %466 }
 0x115   : >> { %v464_v43 = vpop.xlane.xlu0 %463  ;;  %v536_v46 = vrot.slane %v535_v18, 2  ;;  %v546_v12 = vrot.slane %v467_v42, 4  ;;  %v10256_v10 = vadd.f32 %v9707_v10, %v515_v29   ;;  %v526_v13 = vrot.slane %v525_v26, 1 }
 0x116   : >> { %v530_v37 = vrot.slane %v529_v19, 2  ;;  %v540_v16 = vrot.slane %v464_v43, 4  ;;  %v10259_v11 = vadd.f32 %v9711_v11, %v509_v31   ;;  %v520_v17 = vrot.slane %v519_v27, 1 }
 0x117   : >> { %v11952_v32 = vmov %v10256_v10  ;;  %v537_v20 = vadd.f32 %v536_v46, %v535_v18  ;;  %v547_v21 = vadd.f32 %v546_v12, %v467_v42  ;;  %v527_v28 = vadd.f32 %v526_v13, %v525_v26 }
 0x118   : >> { %v11953_v40 = vmov %v10259_v11  ;;  %v531_v24 = vadd.f32 %v530_v37, %v529_v19  ;;  %v541_v25 = vadd.f32 %v540_v16, %v464_v43  ;;  %v521_v50 = vadd.f32 %v520_v17, %v519_v27  ;;  %v473_v30 = vpop.xlane.xlu1 %472 }
 0x119   : >> { %v470_v53 = vpop.xlane.xlu0 %469  ;;  %v538_v54 = vrot.slane %v537_v20, 1  ;;  %v548_v14 = vrot.slane %v547_v21, 2  ;;  %v10262_v8 = vadd.f32 %v9699_v8, %v527_v28   ;;  %v558_v10 = vrot.slane %v473_v30, 4 }
 0x11a   : >> { %v532_v55 = vrot.slane %v531_v24, 1  ;;  %v542_v15 = vrot.slane %v541_v25, 2  ;;  %v10265_v9 = vadd.f32 %v9703_v9, %v521_v50   ;;  %v552_v11 = vrot.slane %v470_v53, 4 }
 0x11b   : >> { %v11954_v59 = vmov %v10262_v8  ;;  %v539_v22 = vadd.f32 %v538_v54, %v537_v20  ;;  %v549_v18 = vadd.f32 %v548_v14, %v547_v21  ;;  %v559_v29 = vadd.f32 %v558_v10, %v473_v30 }
 0x11c   : >> { %v11955_v57 = vmov %v10265_v9  ;;  %v533_v23 = vadd.f32 %v532_v55, %v531_v24  ;;  %v543_v19 = vadd.f32 %v542_v15, %v541_v25  ;;  %v553_v31 = vadd.f32 %v552_v11, %v470_v53  ;;  %v479_v26 = vpop.xlane.xlu1 %478 }
 0x11d   : >> { %v476_v27 = vpop.xlane.xlu0 %475  ;;  %v10268_v6 = vadd.f32 %v9691_v6, %v539_v22   ;;  %v550_v8 = vrot.slane %v549_v18, 1  ;;  %v560_v37 = vrot.slane %v559_v29, 2  ;;  %v570_v12 = vrot.slane %v479_v26, 4 }
 0x11e   : >> { %v10271_v7 = vadd.f32 %v9695_v7, %v533_v23   ;;  %v544_v46 = vrot.slane %v543_v19, 1  ;;  %v554_v9 = vrot.slane %v553_v31, 2  ;;  %v564_v16 = vrot.slane %v476_v27, 4 }
 0x11f   : >> { %v11956_v42 = vmov %v10268_v6  ;;  %v551_v13 = vadd.f32 %v550_v8, %v549_v18  ;;  %v561_v20 = vadd.f32 %v560_v37, %v559_v29  ;;  %v571_v21 = vadd.f32 %v570_v12, %v479_v26 }
 0x120   : >> { %v11957_v43 = vmov %v10271_v7  ;;  %v545_v17 = vadd.f32 %v544_v46, %v543_v19  ;;  %v555_v24 = vadd.f32 %v554_v9, %v553_v31  ;;  %v565_v25 = vadd.f32 %v564_v16, %v476_v27  ;;  %v12005_v31 = vld [vmem:[#allocation12_spill] sm:$0xff] }
 0x121   : >> { %v10274_v4 = vadd.f32 %v9683_v4, %v551_v13   ;;  %v562_v6 = vrot.slane %v561_v20, 1  ;;  %v572_v28 = vrot.slane %v571_v21, 2  ;;  %v11982_v8 = vmov %v11954_v59  ;;  %v627_v31 = vld [vmem:[%s11908_s1 + $0x3] sm:$0x1] (%p10294_p3) }
 0x122   : >> { %v10277_v5 = vadd.f32 %v9687_v5, %v545_v17   ;;  %v556_v7 = vrot.slane %v555_v24, 1  ;;  %v566_v30 = vrot.slane %v565_v25, 2  ;;  %v11983_v9 = vmov %v11955_v57 }
 0x123   : >> { %11958 = vst [vmem:[#allocation14_spill] sm:$0xff] %v10274_v4  ;;  %v11959_v50 = vmov %v10274_v4  ;;  %v563_v54 = vadd.f32 %v562_v6, %v561_v20  ;;  %v573_v14 = vadd.f32 %v572_v28, %v571_v21  ;;  %v11980_v6 = vmov %v11956_v42  ;;  %v10441_v9 = vld [vmem:[%s11908_s1 + $0x8] sm:$0x1] (%p10294_p3) }
 0x124   : >> { %v11960_v53 = vmov %v10277_v5  ;;  %v557_v55 = vadd.f32 %v556_v7, %v555_v24  ;;  %v567_v15 = vadd.f32 %v566_v30, %v565_v25  ;;  %v11981_v7 = vmov %v11957_v43  ;;  %v12004_v30 = vld [vmem:[#allocation13_spill] sm:$0xff] }
 0x125   : >> { %v10280_v2 = vadd.f32 %v9675_v2, %v563_v54   ;;  %v574_v10 = vrot.slane %v573_v14, 1  ;;  %v11979_v5 = vmov %v11960_v53  ;;  %v11986_v12 = vmov %v11950_v58  ;;  %v624_v54 = vld [vmem:[%s11908_s1] sm:$0x1] (%p10294_p3) }
 0x126   : >> { %v10283_v3 = vadd.f32 %v9679_v3, %v557_v55   ;;  %v568_v11 = vrot.slane %v567_v15, 1  ;;  %v11987_v13 = vmov %v11951_v56  ;;  %v11990_v16 = vmov %v11946_v35  ;;  %v625_v55 = vld [vmem:[%s11908_s1 + $0x1] sm:$0x1] (%p10294_p3) }
 0x127   : >> { %11961 = vst [vmem:[#allocation15_spill] sm:$0xff] %v10280_v2  ;;  %v575_v4 = vadd.f32 %v574_v10, %v573_v14  ;;  %v11974_v46 = vmov %v10280_v2  ;;  %v11984_v10 = vmov %v11952_v32  ;;  %v11988_v14 = vmov %v11948_v33  ;;  %v10449_v13 = vld [vmem:[%s11908_s1 + $0x9] sm:$0x1] (%p10294_p3) }
 0x128   : >> { %11963 = vst [vmem:[#allocation16_spill] sm:$0xff] %v10283_v3  ;;  %v569_v22 = vadd.f32 %v568_v11, %v567_v15  ;;  %v11975_v2 = vmov %v11974_v46  ;;  %v11976_v37 = vmov %v10283_v3  ;;  %v11985_v11 = vmov %v11953_v40 }
 0x129   : >> { %v10286_v0 = vadd.f32 %v9667_v0, %v575_v4   ;;  %v11977_v3 = vmov %v11976_v37  ;;  %v11978_v4 = vmov %v11959_v50  ;;  %v11989_v15 = vmov %v11949_v34  ;;  %v12008_v37 = vld [vmem:[#allocation13_spill] sm:$0xff] (%p10294_p3) }
 0x12a   : >> { %v10289_v1 = vadd.f32 %v9671_v1, %v569_v22   ;;  %v11991_v17 = vmov %v11947_v60  ;;  %v11992_v18 = vmov %v11944_v45  ;;  %v11993_v19 = vmov %v11945_v47  ;;  %235 = sbr.rel (!%p10294_p3) target bundleno = 83 (0x53), region = 139  ;;  %v629_v3 = vld [vmem:[%s11908_s1 + $0x5] sm:$0x1] (%p10294_p3)  ;;  %v10487_v4 = vld [vmem:[%s11908_s1 + $0xd] sm:$0x1] (%p10294_p3) }
 0x12b   : >> { %11965 = vst [vmem:[#allocation17_spill] sm:$0xff] %v10286_v0  ;;  %v11970_v49 = vmov %v10286_v0  ;;  %v11994_v20 = vmov %v11942_v62  ;;  %v11995_v21 = vmov %v11943_v63  ;;  %v11996_v22 = vmov %v11940_v41 }
 0x12c   : >> { %11967 = vst [vmem:[#allocation18_spill] sm:$0xff] %v10289_v1  ;;  %v11971_v0 = vmov %v11970_v49  ;;  %v11972_v61 = vmov %v10289_v1  ;;  %v11997_v23 = vmov %v11941_v44  ;;  %v11998_v24 = vmov %v11938_v38  ;;  %v626_v49 = vld [vmem:[%s11908_s1 + $0x2] sm:$0x1] (%p10294_p3) }
 0x12d   : >> { %v11973_v1 = vmov %v11972_v61  ;;  %v11999_v25 = vmov %v11939_v39  ;;  %v12000_v26 = vmov %v11936_v51  ;;  %v12001_v27 = vmov %v11937_v52  ;;  %v12007_v61 = vld [vmem:[#allocation12_spill] sm:$0xff] (%p10294_p3) }
 0x12e   : >> { %v12002_v28 = vmov %v11934_v36  ;;  %v12003_v29 = vmov %v11932_v48  ;;  %v656_v46 = vmul.f32 (%p10294_p3), %v624_v54, %v12007_v61  ;;  %v657_v50 = vmul.f32 (%p10294_p3), %v625_v55, %v12008_v37  ;;  %v628_v1 = vld [vmem:[%s11908_s1 + $0x4] sm:$0x1] (%p10294_p3)  ;;  %v10434_v26 = vld [vmem:[%s11908_s1 + $0x7] sm:$0x1] (%p10294_p3) }
 0x12f   : > { %v658_v0 = vmul.f32 %v626_v49, %v11932_v48  ;;  %v659_v2 = vmul.f32 %v627_v31, %v11934_v36  ;;  %v660_v5 = vmul.f32 %v628_v1, %v11937_v52  ;;  %v630_v48 = vld [vmem:[%s11908_s1 + $0x6] sm:$0x1]  ;;  %v661_v36 = vmul.f32 %v629_v3, %v11936_v51 }
 0x130   : > { %v673_v23 = vsel %vm672_vm1, %v656_v46, 0.0  ;;  %v674_v61 = vsel %vm672_vm1, %v657_v50, 0.0  ;;  %v662_v27 = vmul.f32 %v630_v48, %v11939_v39  ;;  %v663_v51 = vmul.f32 %v10434_v26, %v11938_v38  ;;  %v10454_v39 = vld [vmem:[%s11908_s1 + $0xa] sm:$0x1] }
 0x131   : > { %v676_v18 = vsel %vm672_vm1, %v658_v0, 0.0  ;;  %v675_v19 = vadd.f32 %v674_v61, %v673_v23  ;;  %v678_v29 = vsel %vm672_vm1, %v659_v2, 0.0  ;;  %v680_v8 = vsel %vm672_vm1, %v660_v5, 0.0 }
 0x132   : > { %v682_v16 = vsel %vm672_vm1, %v661_v36, 0.0  ;;  %v664_v20 = vmul.f32 %v10441_v9, %v11941_v44  ;;  %v684_v24 = vsel %vm672_vm1, %v662_v27, 0.0  ;;  %v608_v38 = vmul.f32 0.00390625, %v11949_v34  ;;  %v10469_v44 = vld [vmem:[%s11908_s1 + $0xb] sm:$0x1] }
 0x133   : > { %v677_v52 = vadd.f32 %v676_v18, %v675_v19  ;;  %v609_v21 = vmul.f32 0.00390625, %v11948_v33  ;;  %v610_v50 = vmul.f32 0.00390625, %v11951_v56  ;;  %v665_v6 = vmul.f32 %v10449_v13, %v11940_v41  ;;  %v10476_v33 = vld [vmem:[%s11908_s1 + $0xc] sm:$0x1]  ;;  %v10508_v18 = vld [vmem:[%s11908_s1 + $0xf] sm:$0x1] }
 0x134   : > { %v686_v7 = vsel %vm672_vm1, %v663_v51, 0.0  ;;  %v611_v28 = vmul.f32 0.00390625, %v11950_v58  ;;  %v666_v34 = vmul.f32 %v10454_v39, %v11943_v63  ;;  %v688_v41 = vsel %vm672_vm1, %v664_v20, 0.0 }
 0x135   : > { %v679_v12 = vadd.f32 %v678_v29, %v677_v52  ;;  %v612_v56 = vmul.f32 0.00390625, %v11953_v40  ;;  %v705_v14 = vmul.f32 %v624_v54, %v608_v38  ;;  %v706_v58 = vmul.f32 %v625_v55, %v609_v21 }
 0x136   : > { %v707_v46 = vmul.f32 %v626_v49, %v610_v50  ;;  %v667_v37 = vmul.f32 %v10469_v44, %v11942_v62  ;;  %v690_v10 = vsel %vm672_vm1, %v665_v6, 0.0  ;;  %v613_v63 = vmul.f32 0.00390625, %v11952_v32  ;;  %v10497_v32 = vld [vmem:[%s11908_s1 + $0xe] sm:$0x1] }
 0x137   : > { %v681_v17 = vadd.f32 %v680_v8, %v679_v12  ;;  %v708_v11 = vmul.f32 %v627_v31, %v611_v28  ;;  %v668_v40 = vmul.f32 %v10476_v33, %v11945_v47  ;;  %v692_v54 = vsel %vm672_vm1, %v666_v34, 0.0  ;;  %v10539_v34 = vld [vmem:[%s11909_s2 + $0x3] sm:$0x1] }
 0x138   : > { %v709_v49 = vmul.f32 %v628_v1, %v612_v56  ;;  %v721_v55 = vsel %vm672_vm1, %v705_v14, 0.0  ;;  %v722_v62 = vsel %vm672_vm1, %v706_v58, 0.0  ;;  %v614_v0 = vmul.f32 0.00390625, %v11955_v57 }
 0x139   : > { %v683_v25 = vadd.f32 %v682_v16, %v681_v17  ;;  %v723_v2 = vadd.f32 %v722_v62, %v721_v55  ;;  %v724_v5 = vsel %vm672_vm1, %v707_v46, 0.0  ;;  %v669_v47 = vmul.f32 %v10487_v4, %v11944_v45 }
 0x13a   : > { %v694_v1 = vsel %vm672_vm1, %v667_v37, 0.0  ;;  %v710_v23 = vmul.f32 %v629_v3, %v613_v63  ;;  %v726_v61 = vsel %vm672_vm1, %v708_v11, 0.0  ;;  %v670_v57 = vmul.f32 %v10497_v32, %v11947_v60  ;;  %v12009_v63 = vld [vmem:[#allocation14_spill] sm:$0xff] }
 0x13b   : > { %v685_v30 = vadd.f32 %v684_v24, %v683_v25  ;;  %v725_v36 = vadd.f32 %v724_v5, %v723_v2  ;;  %v696_v29 = vsel %vm672_vm1, %v668_v40, 0.0  ;;  %v728_v52 = vsel %vm672_vm1, %v709_v49, 0.0  ;;  %v12010_v49 = vld [vmem:[#allocation16_spill] sm:$0xff] }
 0x13c   : > { %v615_v27 = vmul.f32 0.00390625, %v11954_v59  ;;  %v711_v3 = vmul.f32 %v630_v48, %v614_v0  ;;  %v671_v12 = vmul.f32 %v10508_v18, %v11946_v35  ;;  %v698_v51 = vsel %vm672_vm1, %v669_v47, 0.0  ;;  %v10584_v47 = vld [vmem:[%s11909_s2 + $0x7] sm:$0x1] }
 0x13d   : > { %v687_v15 = vadd.f32 %v686_v7, %v685_v30  ;;  %v727_v8 = vadd.f32 %v726_v61, %v725_v36  ;;  %v730_v16 = vsel %vm672_vm1, %v710_v23, 0.0  ;;  %v700_v60 = vsel %vm672_vm1, %v670_v57, 0.0  ;;  %v10528_v7 = vld [vmem:[%s11909_s2 + $0x2] sm:$0x1]  ;;  %v12012_v57 = vld [vmem:[#allocation18_spill] sm:$0xff] }
 0x13e   : > { %v616_v24 = vmul.f32 0.00390625, %v11957_v43  ;;  %v712_v21 = vmul.f32 %v10434_v26, %v615_v27  ;;  %v732_v59 = vsel %vm672_vm1, %v711_v3, 0.0  ;;  %v702_v48 = vsel %vm672_vm1, %v671_v12, 0.0  ;;  %v10533_v43 = vld [vmem:[%s11909_s2] sm:$0x1] }
 0x13f   : > { %v689_v22 = vadd.f32 %v688_v41, %v687_v15  ;;  %v729_v20 = vadd.f32 %v728_v52, %v727_v8  ;;  %v617_v30 = vmul.f32 0.00390625, %v11956_v42  ;;  %v618_v56 = vmul.f32 0.00390625, %v11960_v53  ;;  %v10562_v42 = vld [vmem:[%s11909_s2 + $0x5] sm:$0x1]  ;;  %v10567_v53 = vld [vmem:[%s11909_s2 + $0x4] sm:$0x1] }
 0x140   : > { %v713_v35 = vmul.f32 %v10441_v9, %v616_v24  ;;  %v734_v26 = vsel %vm672_vm1, %v712_v21, 0.0  ;;  %v10544_v9 = vld [vmem:[%s11909_s2 + $0x1] sm:$0x1]  ;;  %v619_v11 = vmul.f32 0.00390625, %v12009_v63  ;;  %v620_v55 = vmul.f32 0.00390625, %v12010_v49 }
 0x141   : > { %v691_v31 = vadd.f32 %v690_v10, %v689_v22  ;;  %v731_v25 = vadd.f32 %v730_v16, %v729_v20  ;;  %v714_v40 = vmul.f32 %v10449_v13, %v617_v30  ;;  %v715_v62 = vmul.f32 %v10454_v39, %v618_v56  ;;  %v10589_v39 = vld [vmem:[%s11909_s2 + $0x6] sm:$0x1]  ;;  %v10606_v12 = vld [vmem:[%s11909_s2 + $0x9] sm:$0x1] }
 0x142   : > { %v736_v58 = vsel %vm672_vm1, %v713_v35, 0.0  ;;  %v716_v61 = vmul.f32 %v10469_v44, %v619_v11  ;;  %v717_v52 = vmul.f32 %v10476_v33, %v620_v55  ;;  %v12013_v33 = vld [vmem:[#allocation17_spill] sm:$0xff] }
 0x143   : > { %v693_v19 = vadd.f32 %v692_v54, %v691_v31  ;;  %v733_v6 = vadd.f32 %v732_v59, %v731_v25  ;;  %v623_v16 = vmul.f32 0.00390625, %v12013_v33  ;;  %v654_v55 = vld [vmem:[%s11909_s2 + $0xe] sm:$0x1] }
 0x144   : > { %v742_v20 = vsel %vm672_vm1, %v716_v61, 0.0  ;;  %v744_v21 = vsel %vm672_vm1, %v717_v52, 0.0 }
 0x145   : > { %v695_v45 = vadd.f32 %v694_v1, %v693_v19  ;;  %v735_v14 = vadd.f32 %v734_v26, %v733_v6  ;;  %v12011_v1 = vld [vmem:[#allocation15_spill] sm:$0xff]  ;;  %v738_v19 = vsel %vm672_vm1, %v714_v40, 0.0  ;;  %v720_v35 = vmul.f32 %v10508_v18, %v623_v16  ;;  %v653_v18 = vld [vmem:[%s11909_s2 + $0xd] sm:$0x1] }
 0x146   : > { %v621_v23 = vmul.f32 0.00390625, %v12011_v1 }
 0x147   : > { %v697_v17 = vadd.f32 %v696_v29, %v695_v45  ;;  %v737_v31 = vadd.f32 %v736_v58, %v735_v14  ;;  %v622_v29 = vmul.f32 0.00390625, %v12012_v57  ;;  %v740_v45 = vsel %vm672_vm1, %v715_v62, 0.0 }
 0x149   : > { %v699_v38 = vadd.f32 %v698_v51, %v697_v17  ;;  %v739_v8 = vadd.f32 %v738_v19, %v737_v31  ;;  %v10611_v51 = vld [vmem:[%s11909_s2 + $0x8] sm:$0x1]  ;;  %v718_v17 = vmul.f32 %v10487_v4, %v621_v23  ;;  %v10627_v4 = vld [vmem:[%s11909_s2 + $0xb] sm:$0x1] }
 0x14b   : > { %v701_v50 = vadd.f32 %v700_v60, %v699_v38  ;;  %v741_v60 = vadd.f32 %v740_v45, %v739_v8  ;;  %v719_v38 = vmul.f32 %v10497_v32, %v622_v29  ;;  %v10632_v32 = vld [vmem:[%s11909_s2 + $0xa] sm:$0x1]  ;;  %v746_v6 = vsel %vm672_vm1, %v718_v17, 0.0 }
 0x14d   : > { %v703_v28 = vadd.f32 %v702_v48, %v701_v50  ;;  %v743_v50 = vadd.f32 %v742_v20, %v741_v60  ;;  %v748_v30 = vsel %vm672_vm1, %v719_v38, 0.0 }
 0x14f   : > { %v10547_v41 = vmax.f32 %v703_v28, 0.0  ;;  %v745_v28 = vadd.f32 %v744_v21, %v743_v50 }
 0x151   : > { %v755_v15 = vmul.f32 %v10547_v41, %v10528_v7  ;;  %v753_v46 = vmul.f32 %v10547_v41, %v10533_v43  ;;  %v756_v37 = vmul.f32 %v10547_v41, %v10539_v34  ;;  %v754_v10 = vmul.f32 %v10547_v41, %v10544_v9 }
 0x152   : > { %v758_v5 = vmul.f32 %v10547_v41, %v10562_v42  ;;  %v757_v13 = vmul.f32 %v10547_v41, %v10567_v53  ;;  %v760_v36 = vmul.f32 %v10547_v41, %v10584_v47  ;;  %v759_v44 = vmul.f32 %v10547_v41, %v10589_v39 }
 0x153   : > { %v775_v22 = vsel %vm672_vm1, %v755_v15, 0.0  ;;  %v769_v54 = vsel %vm672_vm1, %v753_v46, 0.0  ;;  %v778_v0 = vsel %vm672_vm1, %v756_v37, 0.0  ;;  %v772_v2 = vsel %vm672_vm1, %v754_v10, 0.0  ;;  %v652_v46 = vld [vmem:[%s11909_s2 + $0xc] sm:$0x1] }
 0x154   : > { %776 = vadd.xlane.f32.xlu1 %v775_v22  ;;  %770 = vadd.xlane.f32.xlu0 %v769_v54  ;;  %v784_v27 = vsel %vm672_vm1, %v758_v5, 0.0  ;;  %v781_v3 = vsel %vm672_vm1, %v757_v13, 0.0  ;;  %v790_v24 = vsel %vm672_vm1, %v760_v36, 0.0  ;;  %v787_v25 = vsel %vm672_vm1, %v759_v44, 0.0  ;;  %v655_v54 = vld [vmem:[%s11909_s2 + $0xf] sm:$0x1] }
 0x155   : > { %v762_v59 = vmul.f32 %v10547_v41, %v10606_v12  ;;  %v761_v48 = vmul.f32 %v10547_v41, %v10611_v51  ;;  %v764_v26 = vmul.f32 %v10547_v41, %v10627_v4  ;;  %v763_v58 = vmul.f32 %v10547_v41, %v10632_v32 }
 0x156   : > { %v747_v15 = vadd.f32 %v746_v6, %v745_v28  ;;  %v750_v37 = vsel %vm672_vm1, %v720_v35, 0.0  ;;  %v766_v63 = vmul.f32 %v10547_v41, %v653_v18  ;;  %v765_v22 = vmul.f32 %v10547_v41, %v652_v46 }
 0x157   : > { %v796_v56 = vsel %vm672_vm1, %v762_v59, 0.0  ;;  %v793_v14 = vsel %vm672_vm1, %v761_v48, 0.0  ;;  %v802_v11 = vsel %vm672_vm1, %v764_v26, 0.0  ;;  %v799_v40 = vsel %vm672_vm1, %v763_v58, 0.0 }
 0x158   : > { %779 = vadd.xlane.f32.xlu1 %v778_v0  ;;  %773 = vadd.xlane.f32.xlu0 %v772_v2  ;;  %v749_v10 = vadd.f32 %v748_v30, %v747_v15  ;;  %v768_v62 = vmul.f32 %v10547_v41, %v655_v54  ;;  %v808_v31 = vsel %vm672_vm1, %v766_v63, 0.0  ;;  %v805_v0 = vsel %vm672_vm1, %v765_v22, 0.0 }
 0x159   : > { %v767_v2 = vmul.f32 %v10547_v41, %v654_v55  ;;  %v9809_v59 = vmov 0.0  }
 0x15a   : > { %v751_v49 = vadd.f32 %v750_v37, %v749_v10  ;;  %v814_v13 = vsel %vm672_vm1, %v768_v62, 0.0  ;;  %994 = vst.msk [vmem:[#allocation2 + $0x5] sm:$0x7] %vm993_vm2, %v9809_v59  ;;  %995 = vst.msk [vmem:[#allocation2 + $0x25] sm:$0x7] %vm993_vm2, %v9809_v59 }
 0x15b   : > { %v811_v1 = vsel %vm672_vm1, %v767_v2, 0.0  ;;  %996 = vst.msk [vmem:[#allocation2 + $0x18] sm:$0x7] %vm993_vm2, %v9809_v59  ;;  %997 = vst.msk [vmem:[#allocation2 + $0x38] sm:$0x7] %vm993_vm2, %v9809_v59 }
 0x15c   : > { %785 = vadd.xlane.f32.xlu1 %v784_v27  ;;  %782 = vadd.xlane.f32.xlu0 %v781_v3  ;;  %v752_v5 = vmax.f32 %v751_v49, 0.0 }
 0x15e   : > { %v818_v23 = vmul.f32 %v752_v5, %v10544_v9  ;;  %v817_v61 = vmul.f32 %v752_v5, %v10533_v43  ;;  %v820_v57 = vmul.f32 %v752_v5, %v10539_v34  ;;  %v819_v41 = vmul.f32 %v752_v5, %v10528_v7 }
 0x15f   : > { %v822_v9 = vmul.f32 %v752_v5, %v10562_v42  ;;  %v821_v43 = vmul.f32 %v752_v5, %v10567_v53  ;;  %v824_v34 = vmul.f32 %v752_v5, %v10584_v47  ;;  %v823_v7 = vmul.f32 %v752_v5, %v10589_v39 }
 0x160   : > { %791 = vadd.xlane.f32.xlu1 %v790_v24  ;;  %788 = vadd.xlane.f32.xlu0 %v787_v25  ;;  %v836_v19 = vsel %vm672_vm1, %v818_v23, 0.0  ;;  %v833_v36 = vsel %vm672_vm1, %v817_v61, 0.0  ;;  %v842_v29 = vsel %vm672_vm1, %v820_v57, 0.0  ;;  %v839_v52 = vsel %vm672_vm1, %v819_v41, 0.0 }
 0x161   : > { %v848_v45 = vsel %vm672_vm1, %v822_v9, 0.0  ;;  %v845_v27 = vsel %vm672_vm1, %v821_v43, 0.0  ;;  %v854_v3 = vsel %vm672_vm1, %v824_v34, 0.0  ;;  %v851_v44 = vsel %vm672_vm1, %v823_v7, 0.0 }
 0x162   : > { %v826_v42 = vmul.f32 %v752_v5, %v10606_v12  ;;  %v825_v53 = vmul.f32 %v752_v5, %v10611_v51  ;;  %v828_v47 = vmul.f32 %v752_v5, %v10627_v4  ;;  %v827_v39 = vmul.f32 %v752_v5, %v10632_v32 }
 0x163   : > { %v830_v20 = vmul.f32 %v752_v5, %v653_v18  ;;  %v829_v12 = vmul.f32 %v752_v5, %v652_v46  ;;  %v832_v24 = vmul.f32 %v752_v5, %v655_v54  ;;  %v831_v38 = vmul.f32 %v752_v5, %v654_v55 }
 0x164   : > { %797 = vadd.xlane.f32.xlu1 %v796_v56  ;;  %794 = vadd.xlane.f32.xlu0 %v793_v14  ;;  %v860_v8 = vsel %vm672_vm1, %v826_v42, 0.0  ;;  %v857_v33 = vsel %vm672_vm1, %v825_v53, 0.0  ;;  %v866_v16 = vsel %vm672_vm1, %v828_v47, 0.0  ;;  %v863_v17 = vsel %vm672_vm1, %v827_v39, 0.0 }
 0x165   : > { %v872_v51 = vsel %vm672_vm1, %v830_v20, 0.0  ;;  %v869_v60 = vsel %vm672_vm1, %v829_v12, 0.0  ;;  %v878_v21 = vsel %vm672_vm1, %v832_v24, 0.0  ;;  %v875_v25 = vsel %vm672_vm1, %v831_v38, 0.0 }
 0x168   : > { %803 = vadd.xlane.f32.xlu1 %v802_v11  ;;  %800 = vadd.xlane.f32.xlu0 %v799_v40 }
 0x16c   : > { %809 = vadd.xlane.f32.xlu1 %v808_v31  ;;  %806 = vadd.xlane.f32.xlu0 %v805_v0 }
 0x170   : > { %815 = vadd.xlane.f32.xlu1 %v814_v13  ;;  %812 = vadd.xlane.f32.xlu0 %v811_v1 }
 0x174   : > { %837 = vadd.xlane.f32.xlu1 %v836_v19  ;;  %834 = vadd.xlane.f32.xlu0 %v833_v36 }
 0x178   : > { %843 = vadd.xlane.f32.xlu1 %v842_v29  ;;  %840 = vadd.xlane.f32.xlu0 %v839_v52 }
 0x17c   : > { %849 = vadd.xlane.f32.xlu1 %v848_v45  ;;  %846 = vadd.xlane.f32.xlu0 %v845_v27 }
 0x180   : > { %855 = vadd.xlane.f32.xlu1 %v854_v3  ;;  %852 = vadd.xlane.f32.xlu0 %v851_v44 }
 0x184   : > { %861 = vadd.xlane.f32.xlu1 %v860_v8  ;;  %858 = vadd.xlane.f32.xlu0 %v857_v33 }
 0x188   : > { %867 = vadd.xlane.f32.xlu1 %v866_v16  ;;  %864 = vadd.xlane.f32.xlu0 %v863_v17 }
 0x18c   : > { %873 = vadd.xlane.f32.xlu1 %v872_v51  ;;  %870 = vadd.xlane.f32.xlu0 %v869_v60 }
 0x190   : > { %879 = vadd.xlane.f32.xlu1 %v878_v21  ;;  %876 = vadd.xlane.f32.xlu0 %v875_v25 }
 0x1dd   : > { %v777_v48 = vpop.xlane.xlu1 %776  ;;  %v771_v4 = vpop.xlane.xlu0 %770 }
 0x1e1   : > { %v780_v50 = vpop.xlane.xlu1 %779  ;;  %v774_v32 = vpop.xlane.xlu0 %773 }
 0x1e5   : > { %v786_v35 = vpop.xlane.xlu1 %785  ;;  %v783_v6 = vpop.xlane.xlu0 %782 }
 0x1e9   : > { %v792_v28 = vpop.xlane.xlu1 %791  ;;  %v789_v26 = vpop.xlane.xlu0 %788 }
 0x1ed   : > { %v798_v30 = vpop.xlane.xlu1 %797  ;;  %v795_v56 = vpop.xlane.xlu0 %794 }
 0x1f1   : > { %v804_v14 = vpop.xlane.xlu1 %803  ;;  %v801_v58 = vpop.xlane.xlu0 %800 }
 0x1f5   : > { %v10694_v18 = vpop.xlane.xlu1 %809  ;;  %v10696_v15 = vpop.xlane.xlu0 %806 }
 0x1f9   : > { %v10698_v46 = vpop.xlane.xlu1 %815  ;;  %v10700_v37 = vpop.xlane.xlu0 %812 }
 0x1fd   : > { %v838_v10 = vpop.xlane.xlu1 %837  ;;  %v835_v63 = vpop.xlane.xlu0 %834 }
 0x1fe   : > { %v882_v11 = vadd.f32 %v838_v10, %v774_v32  ;;  %v881_v40 = vadd.f32 %v835_v63, %v771_v4 }
 0x200   : > { %v8092_v22 = vmul.f32 -1.442695, %v882_v11  ;;  %v8091_v54 = vmul.f32 -1.442695, %v881_v40 }
 0x201   : > { %v844_v49 = vpop.xlane.xlu1 %843  ;;  %v841_v55 = vpop.xlane.xlu0 %840 }
 0x202   : > { %9333 = vpow2.f32 %v8092_v22  ;;  %v884_v62 = vadd.f32 %v844_v49, %v780_v50  ;;  %v883_v31 = vadd.f32 %v841_v55, %v777_v48 }
 0x203   : > { %9335 = vpow2.f32 %v8091_v54 }
 0x204   : > { %v8094_v0 = vmul.f32 -1.442695, %v884_v62  ;;  %v8093_v2 = vmul.f32 -1.442695, %v883_v31 }
 0x205   : > { %v850_v5 = vpop.xlane.xlu1 %849  ;;  %v847_v13 = vpop.xlane.xlu0 %846 }
 0x206   : > { %9337 = vpow2.f32 %v8094_v0  ;;  %v886_v1 = vadd.f32 %v850_v5, %v786_v35  ;;  %v885_v23 = vadd.f32 %v847_v13, %v783_v6 }
 0x207   : > { %9339 = vpow2.f32 %v8093_v2 }
 0x208   : > { %v8096_v61 = vmul.f32 -1.442695, %v886_v1  ;;  %v8095_v19 = vmul.f32 -1.442695, %v885_v23 }
 0x209   : > { %v856_v36 = vpop.xlane.xlu1 %855  ;;  %v853_v57 = vpop.xlane.xlu0 %852 }
 0x20a   : > { %9341 = vpow2.f32 %v8096_v61  ;;  %v888_v41 = vadd.f32 %v856_v36, %v792_v28  ;;  %v887_v29 = vadd.f32 %v853_v57, %v789_v26 }
 0x20b   : > { %9343 = vpow2.f32 %v8095_v19 }
 0x20c   : > { %v8098_v52 = vmul.f32 -1.442695, %v888_v41  ;;  %v8097_v9 = vmul.f32 -1.442695, %v887_v29 }
 0x20d   : > { %v862_v43 = vpop.xlane.xlu1 %861  ;;  %v859_v45 = vpop.xlane.xlu0 %858 }
 0x20e   : > { %9345 = vpow2.f32 %v8098_v52  ;;  %v890_v27 = vadd.f32 %v862_v43, %v798_v30  ;;  %v889_v34 = vadd.f32 %v859_v45, %v795_v56 }
 0x20f   : > { %v9334_v7 = vpop.eup %9333  ;;  %9347 = vpow2.f32 %v8097_v9 }
 0x210   : > { %v9336_v3 = vpop.eup %9335  ;;  %v946_v44 = vadd.f32 1.0, %v9334_v7  ;;  %v8100_v42 = vmul.f32 -1.442695, %v890_v27  ;;  %v8099_v8 = vmul.f32 -1.442695, %v889_v34 }
 0x211   : > { %v945_v53 = vadd.f32 1.0, %v9336_v3  ;;  %v868_v33 = vpop.xlane.xlu1 %867  ;;  %v865_v47 = vpop.xlane.xlu0 %864 }
 0x212   : > { %9349 = vrcp.f32 %v946_v44  ;;  %v892_v39 = vadd.f32 %v868_v33, %v804_v14  ;;  %v891_v16 = vadd.f32 %v865_v47, %v801_v58 }
 0x213   : > { %v9338_v17 = vpop.eup %9337  ;;  %9351 = vrcp.f32 %v945_v53 }
 0x214   : > { %v9340_v20 = vpop.eup %9339  ;;  %v948_v12 = vadd.f32 1.0, %v9338_v17  ;;  %9353 = vpow2.f32 %v8100_v42  ;;  %v8102_v51 = vmul.f32 -1.442695, %v892_v39  ;;  %v8101_v24 = vmul.f32 -1.442695, %v891_v16 }
 0x215   : > { %v947_v60 = vadd.f32 1.0, %v9340_v20  ;;  %9355 = vpow2.f32 %v8099_v8  ;;  %v874_v38 = vpop.xlane.xlu1 %873  ;;  %v871_v21 = vpop.xlane.xlu0 %870 }
 0x216   : > { %9357 = vrcp.f32 %v948_v12  ;;  %v894_v25 = vadd.f32 %v874_v38, %v10694_v18  ;;  %v893_v59 = vadd.f32 %v871_v21, %v10696_v15 }
 0x217   : > { %v9342_v48 = vpop.eup %9341  ;;  %9359 = vrcp.f32 %v947_v60 }
 0x218   : > { %v9344_v4 = vpop.eup %9343  ;;  %v950_v50 = vadd.f32 1.0, %v9342_v48  ;;  %9361 = vpow2.f32 %v8102_v51  ;;  %v8104_v32 = vmul.f32 -1.442695, %v894_v25  ;;  %v8103_v6 = vmul.f32 -1.442695, %v893_v59 }
 0x219   : > { %v949_v35 = vadd.f32 1.0, %v9344_v4  ;;  %9363 = vpow2.f32 %v8101_v24  ;;  %v880_v28 = vpop.xlane.xlu1 %879  ;;  %v877_v26 = vpop.xlane.xlu0 %876 }
 0x21a   : > { %9365 = vrcp.f32 %v950_v50  ;;  %v896_v30 = vadd.f32 %v880_v28, %v10698_v46  ;;  %v895_v56 = vadd.f32 %v877_v26, %v10700_v37 }
 0x21b   : > { %v9346_v14 = vpop.eup %9345  ;;  %9367 = vrcp.f32 %v949_v35 }
 0x21c   : > { %v9348_v58 = vpop.eup %9347  ;;  %v952_v18 = vadd.f32 1.0, %v9346_v14  ;;  %9369 = vpow2.f32 %v8104_v32  ;;  %v8106_v15 = vmul.f32 -1.442695, %v896_v30  ;;  %v8105_v63 = vmul.f32 -1.442695, %v895_v56 }
 0x21d   : > { %v951_v10 = vadd.f32 1.0, %v9348_v58  ;;  %9371 = vpow2.f32 %v8103_v6 }
 0x21e   : > { %9373 = vrcp.f32 %v952_v18 }
 0x21f   : > { %v10706_v11 = vpop.eup %9349  ;;  %9375 = vrcp.f32 %v951_v10 }
 0x220   : > { %v10708_v40 = vpop.eup %9351  ;;  %9377 = vpow2.f32 %v8106_v15 }
 0x221   : > { %v9354_v22 = vpop.eup %9353  ;;  %9379 = vpow2.f32 %v8105_v63 }
 0x222   : > { %v9356_v46 = vpop.eup %9355  ;;  %v954_v37 = vadd.f32 1.0, %v9354_v22 }
 0x223   : > { %v10710_v54 = vpop.eup %9357  ;;  %v953_v49 = vadd.f32 1.0, %v9356_v46 }
 0x224   : > { %v10712_v55 = vpop.eup %9359  ;;  %9381 = vrcp.f32 %v954_v37 }
 0x225   : > { %v9362_v62 = vpop.eup %9361  ;;  %9383 = vrcp.f32 %v953_v49 }
 0x226   : > { %v9364_v31 = vpop.eup %9363  ;;  %v956_v0 = vadd.f32 1.0, %v9362_v62 }
 0x227   : > { %v10714_v2 = vpop.eup %9365  ;;  %v955_v5 = vadd.f32 1.0, %v9364_v31 }
 0x228   : > { %v10716_v13 = vpop.eup %9367  ;;  %9385 = vrcp.f32 %v956_v0 }
 0x229   : > { %v9370_v1 = vpop.eup %9369  ;;  %9387 = vrcp.f32 %v955_v5 }
 0x22a   : > { %v9372_v23 = vpop.eup %9371  ;;  %v958_v61 = vadd.f32 1.0, %v9370_v1 }
 0x22b   : > { %v10718_v19 = vpop.eup %9373  ;;  %v957_v36 = vadd.f32 1.0, %v9372_v23 }
 0x22c   : > { %v10720_v57 = vpop.eup %9375  ;;  %9389 = vrcp.f32 %v958_v61 }
 0x22d   : > { %v9378_v41 = vpop.eup %9377  ;;  %9391 = vrcp.f32 %v957_v36 }
 0x22e   : > { %v9380_v29 = vpop.eup %9379  ;;  %v960_v52 = vadd.f32 1.0, %v9378_v41 }
 0x22f   : > { %v959_v9 = vadd.f32 1.0, %v9380_v29 }
 0x230   : > { %9393 = vrcp.f32 %v960_v52 }
 0x231   : > { %v10722_v43 = vpop.eup %9381  ;;  %9395 = vrcp.f32 %v959_v9 }
 0x232   : > { %v10724_v45 = vpop.eup %9383 }
 0x235   : > { %v10726_v27 = vpop.eup %9385 }
 0x236   : > { %v10728_v34 = vpop.eup %9387 }
 0x239   : > { %v10730_v7 = vpop.eup %9389 }
 0x23a   : > { %v10732_v3 = vpop.eup %9391 }
 0x23d   : > { %v10734_v44 = vpop.eup %9393 }
 0x23e   : > { %v10736_v42 = vpop.eup %9395 }
 0x23f LB: >> { %v1022_v53 = vlaneseq  ;;  %s10744_s21 = sshll.u32 %s9799_s12, 3  ;;  %s1003_s12 = sadd.s32 1, %s9799_s12   ;;  %s9799_s12 = sphi %s10738_s12, %s1003_s12  }
 0x240   : >> { %s10748_s5 = scalar_lea.vmem %s9966_s13, %s10744_s21 [#allocation3]  ;;  %s10770_s6 = scalar_lea.vmem %s9976_s23, %s10744_s21 [#allocation8] }
 0x241   : >> { %v1023_v8 = vshrl.u32 %v1022_v53, 7  ;;  %v1006_v33 = vld [vmem:[%s10748_s5] sm:$0xff]  ;;  %v1007_v39 = vld [vmem:[%s10748_s5 + $0x10] sm:$0xff]  ;;  %s7878_s24 = scalar_lea.vmem [#allocation2], %s10744_s21  ;;  %p1000_p11 = scmp.ge.s32.totalorder %s1003_s12, 2  }
 0x242   : >> { %v1008_v16 = vld [vmem:[%s10748_s5 + $0x20] sm:$0xff]  ;;  %v1009_v17 = vld [vmem:[%s10748_s5 + $0x30] sm:$0xff]  ;;  %s10880_s26 = smov (%p1000_p11), 0  }
 0x243   : >> { %v10751_v47 = vsub.s32 0, %v1023_v8  ;;  %v1010_v20 = vld [vmem:[%s10748_s5 + $0x40] sm:$0xff]  ;;  %v1011_v38 = vld [vmem:[%s10748_s5 + $0x50] sm:$0xff] }
 0x244   : >> { %v1012_v21 = vld [vmem:[%s10748_s5 + $0x60] sm:$0xff]  ;;  %v1013_v25 = vld [vmem:[%s10748_s5 + $0x70] sm:$0xff] }
 0x245   : >> { %v1025_v12 = vrot.slane %v10708_v40, %v10751_v47  ;;  %v1029_v51 = vrot.slane %v10706_v11, %v10751_v47  ;;  %v1033_v60 = vrot.slane %v10712_v55, %v10751_v47  ;;  %v1037_v24 = vrot.slane %v10710_v54, %v10751_v47  ;;  %v1014_v1 = vld [vmem:[%s10748_s5 + $0x80] sm:$0xff]  ;;  %v1015_v23 = vld [vmem:[%s10748_s5 + $0x90] sm:$0xff] }
 0x246   : >> { %v1041_v59 = vrot.slane %v10716_v13, %v10751_v47  ;;  %v1045_v48 = vrot.slane %v10714_v2, %v10751_v47  ;;  %v1049_v4 = vrot.slane %v10720_v57, %v10751_v47  ;;  %v1053_v50 = vrot.slane %v10718_v19, %v10751_v47  ;;  %v1016_v52 = vld [vmem:[%s10748_s5 + $0xa0] sm:$0xff]  ;;  %v1017_v9 = vld [vmem:[%s10748_s5 + $0xb0] sm:$0xff] }
 0x247   : >> { %v1086_v32 = vmul.f32 %v1025_v12, %v1006_v33  ;;  %v1087_v35 = vmul.f32 %v1029_v51, %v1007_v39  ;;  %v1088_v6 = vmul.f32 %v1033_v60, %v1008_v16  ;;  %v1089_v28 = vmul.f32 %v1037_v24, %v1009_v17  ;;  %v1018_v53 = vld [vmem:[%s10748_s5 + $0xc0] sm:$0xff]  ;;  %v1019_v17 = vld [vmem:[%s10748_s5 + $0xd0] sm:$0xff] }
 0x248   : >> { %v1090_v26 = vmul.f32 %v1041_v59, %v1010_v20  ;;  %v1091_v30 = vmul.f32 %v1045_v48, %v1011_v38  ;;  %v1092_v56 = vmul.f32 %v1049_v4, %v1012_v21  ;;  %v1093_v14 = vmul.f32 %v1053_v50, %v1013_v25  ;;  %v1020_v20 = vld [vmem:[%s10748_s5 + $0xe0] sm:$0xff] }
 0x249   : >> { %1104 = vst.msk [vmem:[%s10770_s6] sm:$0xff] %vm287_vm0, %v1086_v32  ;;  %v1154_v58 = vsel %vm287_vm0, %v1086_v32, 0.0  ;;  %1105 = vst.msk [vmem:[%s10770_s6 + $0x10] sm:$0xff] %vm287_vm0, %v1087_v35  ;;  %v1155_v18 = vsel %vm287_vm0, %v1087_v35, 0.0  ;;  %v10791_v15 = vsel %vm287_vm0, %v1086_v32, -inf  ;;  %v1157_v63 = vsel %vm287_vm0, %v1088_v6, 0.0 }
 0x24a   : >> { %1106 = vst.msk [vmem:[%s10770_s6 + $0x20] sm:$0xff] %vm287_vm0, %v1088_v6  ;;  %1107 = vst.msk [vmem:[%s10770_s6 + $0x30] sm:$0xff] %vm287_vm0, %v1089_v28  ;;  %v1156_v10 = vadd.f32 %v1155_v18, %v1154_v58  ;;  %v1121_v22 = vsel %vm287_vm0, %v1087_v35, -inf  ;;  %v1122_v46 = vsel %vm287_vm0, %v1088_v6, -inf  ;;  %v10805_v37 = vsel %vm287_vm0, %v1089_v28, -inf }
 0x24b   : >> { %1108 = vst.msk [vmem:[%s10770_s6 + $0x40] sm:$0xff] %vm287_vm0, %v1090_v26  ;;  %1109 = vst.msk [vmem:[%s10770_s6 + $0x50] sm:$0xff] %vm287_vm0, %v1091_v30  ;;  %v1159_v49 = vsel %vm287_vm0, %v1089_v28, 0.0  ;;  %v1124_v31 = vsel %vm287_vm0, %v1090_v26, -inf  ;;  %v1161_v0 = vsel %vm287_vm0, %v1090_v26, 0.0  ;;  %v1126_v5 = vsel %vm287_vm0, %v1091_v30, -inf }
 0x24c   : >> { %1110 = vst.msk [vmem:[%s10770_s6 + $0x60] sm:$0xff] %vm287_vm0, %v1092_v56  ;;  %1111 = vst.msk [vmem:[%s10770_s6 + $0x70] sm:$0xff] %vm287_vm0, %v1093_v14  ;;  %v1158_v62 = vadd.f32 %v1157_v63, %v1156_v10  ;;  %v1163_v61 = vsel %vm287_vm0, %v1091_v30, 0.0  ;;  %v1128_v36 = vsel %vm287_vm0, %v1092_v56, -inf  ;;  %v1057_v41 = vrot.slane %v10724_v45, %v10751_v47  ;;  %v1021_v30 = vld [vmem:[%s10748_s5 + $0xf0] sm:$0xff] }
 0x24d   : >> { %v1061_v29 = vrot.slane %v10722_v43, %v10751_v47  ;;  %v1065_v33 = vrot.slane %v10728_v34, %v10751_v47  ;;  %v1069_v39 = vrot.slane %v10726_v27, %v10751_v47  ;;  %v1073_v16 = vrot.slane %v10732_v3, %v10751_v47 }
 0x24e   : >> { %v1160_v8 = vadd.f32 %v1159_v49, %v1158_v62  ;;  %v1094_v12 = vmul.f32 %v1057_v41, %v1014_v1  ;;  %v1077_v60 = vrot.slane %v10730_v7, %v10751_v47  ;;  %v1081_v24 = vrot.slane %v10736_v42, %v10751_v47 }
 0x24f   : >> { %v1095_v51 = vmul.f32 %v1061_v29, %v1015_v23  ;;  %v1096_v21 = vmul.f32 %v1065_v33, %v1016_v52  ;;  %v1097_v25 = vmul.f32 %v1069_v39, %v1017_v9  ;;  %v1098_v59 = vmul.f32 %v1073_v16, %v1018_v53 }
 0x250   : >> { %v1162_v38 = vadd.f32 %v1161_v0, %v1160_v8  ;;  %v1165_v48 = vsel %vm287_vm0, %v1092_v56, 0.0  ;;  %v1130_v4 = vsel %vm287_vm0, %v1093_v14, -inf  ;;  %1112 = vst.msk [vmem:[%s10770_s6 + $0x80] sm:$0xff] %vm287_vm0, %v1094_v12  ;;  %v1099_v50 = vmul.f32 %v1077_v60, %v1019_v17 }
 0x251   : >> { %1113 = vst.msk [vmem:[%s10770_s6 + $0x90] sm:$0xff] %vm287_vm0, %v1095_v51  ;;  %v1100_v32 = vmul.f32 %v1081_v24, %v1020_v20  ;;  %v1167_v6 = vsel %vm287_vm0, %v1093_v14, 0.0  ;;  %v1169_v28 = vsel %vm287_vm0, %v1094_v12, 0.0  ;;  %v1171_v26 = vsel %vm287_vm0, %v1095_v51, 0.0  ;;  %1114 = vst.msk [vmem:[%s10770_s6 + $0xa0] sm:$0xff] %vm287_vm0, %v1096_v21 }
 0x252   : >> { %v1164_v35 = vadd.f32 %v1163_v61, %v1162_v38  ;;  %1115 = vst.msk [vmem:[%s10770_s6 + $0xb0] sm:$0xff] %vm287_vm0, %v1097_v25  ;;  %1116 = vst.msk [vmem:[%s10770_s6 + $0xc0] sm:$0xff] %vm287_vm0, %v1098_v59  ;;  %v1085_v56 = vrot.slane %v10734_v44, %v10751_v47  ;;  %v1125_v14 = vmax.f32 %v10791_v15, %v1124_v31  ;;  %v1132_v49 = vsel %vm287_vm0, %v1094_v12, -inf }
 0x253   : >> { %1117 = vst.msk [vmem:[%s10770_s6 + $0xd0] sm:$0xff] %vm287_vm0, %v1099_v50  ;;  %1118 = vst.msk [vmem:[%s10770_s6 + $0xe0] sm:$0xff] %vm287_vm0, %v1100_v32  ;;  %v1127_v58 = vmax.f32 %v1121_v22, %v1126_v5  ;;  %v1129_v18 = vmax.f32 %v1122_v46, %v1128_v36  ;;  %v1131_v63 = vmax.f32 %v10805_v37, %v1130_v4  ;;  %v1134_v62 = vsel %vm287_vm0, %v1095_v51, -inf }
 0x254   : >> { %v1166_v10 = vadd.f32 %v1165_v48, %v1164_v35  ;;  %v1101_v0 = vmul.f32 %v1085_v56, %v1021_v30  ;;  %v1133_v1 = vmax.f32 %v1125_v14, %v1132_v49  ;;  %v1136_v61 = vsel %vm287_vm0, %v1096_v21, -inf }
 0x255   : >> { %v1135_v23 = vmax.f32 %v1127_v58, %v1134_v62  ;;  %v1137_v29 = vmax.f32 %v1129_v18, %v1136_v61  ;;  %v1138_v47 = vsel %vm287_vm0, %v1097_v25, -inf  ;;  %v1140_v15 = vsel %vm287_vm0, %v1098_v59, -inf }
 0x256   : >> { %v1168_v41 = vadd.f32 %v1167_v6, %v1166_v10  ;;  %1119 = vst.msk [vmem:[%s10770_s6 + $0xf0] sm:$0xff] %vm287_vm0, %v1101_v0  ;;  %v1139_v22 = vmax.f32 %v1131_v63, %v1138_v47  ;;  %v1141_v46 = vmax.f32 %v1133_v1, %v1140_v15  ;;  %v1142_v37 = vsel %vm287_vm0, %v1099_v50, -inf }
 0x257   : >> { %v1144_v31 = vsel %vm287_vm0, %v1100_v32, -inf  ;;  %v1143_v36 = vmax.f32 %v1135_v23, %v1142_v37  ;;  %v1146_v9 = vsel %vm287_vm0, %v1101_v0, -inf  ;;  %v1173_v53 = vsel %vm287_vm0, %v1096_v21, 0.0 }
 0x258   : >> { %v1170_v5 = vadd.f32 %v1169_v28, %v1168_v41  ;;  %v1145_v52 = vmax.f32 %v1137_v29, %v1144_v31  ;;  %v1147_v8 = vmax.f32 %v1139_v22, %v1146_v9  ;;  %v1175_v16 = vsel %vm287_vm0, %v1097_v25, 0.0 }
 0x259   : >> { %v1148_v39 = vmax.f32 %v1141_v46, %v1143_v36  ;;  %v1177_v12 = vsel %vm287_vm0, %v1098_v59, 0.0  ;;  %v1179_v24 = vsel %vm287_vm0, %v1099_v50, 0.0  ;;  %v1181_v48 = vsel %vm287_vm0, %v1100_v32, 0.0 }
 0x25a   : >> { %v1172_v33 = vadd.f32 %v1171_v26, %v1170_v5  ;;  %v1149_v17 = vmax.f32 %v1145_v52, %v1147_v8  ;;  %v1183_v4 = vsel %vm287_vm0, %v1101_v0, 0.0 }
 0x25c   : >> { %v1174_v20 = vadd.f32 %v1173_v53, %v1172_v33  ;;  %v1150_v51 = vmax.f32 %v1148_v39, %v1149_v17 }
 0x25e   : >> { %v1176_v60 = vadd.f32 %v1175_v16, %v1174_v20  ;;  %8109 = vst.msk [vmem:[%s7878_s24 + $0x8] sm:$0xff] %vm287_vm0, %v1150_v51 }
 0x260   : >> { %v1178_v38 = vadd.f32 %v1177_v12, %v1176_v60 }
 0x262   : >> { %v1180_v21 = vadd.f32 %v1179_v24, %v1178_v38 }
 0x264   : >> { %v1182_v35 = vadd.f32 %v1181_v48, %v1180_v21 }
 0x266   : >> { %v1184_v6 = vadd.f32 %v1183_v4, %v1182_v35  ;;  %1002 = sbr.rel (!%p1000_p11) target bundleno = 575 (0x23f), region = 150 }
 0x268   : >> { %v1185_v25 = vmul.f32 0.0625, %v1184_v6 }
 0x26a   : >> { %8111 = vst.msk [vmem:[%s7878_s24 + $0x28] sm:$0xff] %vm287_vm0, %v1185_v25 }
 0x26b LB: >> { %v1206_v59 = vld [vmem:[#allocation6 + $0x18] sm:$0xff]  ;;  %v1205_v50 = vld [vmem:[#allocation6 + $0x10] sm:$0xff]  ;;  %v9810_v32 = vmov 0.0   ;;  %vm9811_vm3 = vmmov 0   ;;  %s8112_s13 = sshll.u32 %s9803_s26, 3  ;;  %v1200_v19 = vld [vmem:[#allocation6 + $0x8] sm:$0xff]  ;;  %s9803_s26 = sphi %s10880_s26, %s1194_s26  }
 0x26c   : >> { %8401 = vmatprep.subr.mxu0 %v9810_v32  ;;  %v1240_v28 = vand.u32 4294901760, %v1206_v59  ;;  %8408 = vmatprep.subr.mxu1 %v9810_v32  ;;  %v10887_v26 = vand.u32 4294901760, %v1205_v50  ;;  %s10898_s28 = scalar_lea.vmem [#allocation2], %s8112_s13  ;;  %v1199_v27 = vld [vmem:[#allocation6] sm:$0xff]  ;;  %v10904_v7 = vand.u32 4294901760, %v1200_v19  ;;  %v2137_v29 = vld [vmem:[#allocation6 + $0x28] sm:$0xff]  ;;  %s11804_s29 = scalar_lea.vmem %s9976_s23, %s8112_s13 [#allocation8] }
 0x26d   : >> { %8405 = vmatprep.mubr.msk.f32.mxu0 %vm9811_vm3, %v9810_v32  ;;  %8412 = vmatprep.mubr.msk.f32.mxu1 %vm9811_vm3, %v9810_v32  ;;  %v10907_v56 = vand.u32 4294901760, %v1199_v27  ;;  %v2136_v46 = vld [vmem:[#allocation6 + $0x20] sm:$0xff]  ;;  %v10951_v31 = vand.u32 4294901760, %v2137_v29  ;;  %v2606_v51 = vld [vmem:[#allocation6 + $0x38] sm:$0xff]  ;;  %v2605_v48 = vld [vmem:[#allocation6 + $0x30] sm:$0xff]  ;;  %s1194_s26 = sadd.s32 1, %s9803_s26  }
 0x26e   : >> { %8402 = vmatpush3.msra.mxu0 %v1240_v28  ;;  %v1318_v11 = vsub.f32 %v1206_v59, %v1240_v28  ;;  %v1325_v40 = vsub.f32 %v1205_v50, %v10887_v26  ;;  %v10912_v18 = vsub.f32 %v1200_v19, %v10904_v7  ;;  %v10957_v52 = vand.u32 4294901760, %v2136_v46  ;;  %p1191_p7 = scmp.ge.s32.totalorder %s1194_s26, 2  }
 0x26f   : >> { %8403 = vmatprep.subr.mxu0 %v9810_v32  ;;  %v10918_v49 = vsub.f32 %v1199_v27, %v10907_v56  ;;  %v10964_v9 = vsub.f32 %v2137_v29, %v10951_v31  ;;  %v11018_v4 = vand.u32 4294901760, %v2606_v51  ;;  %v11024_v25 = vand.u32 4294901760, %v2605_v48  ;;  %s8148_s14 = sshll.u32 (%p1191_p7), %s9861_s19, 12  ;;  %s7829_s7 = sshll.u32 (%p1191_p7), %s9976_s23, 4  ;;  %s11864_s7 = int_to_ptr.vmem [resolvable:$true] %s7829_s7 }
 0x270   : >> { %v1319_v55 = vand.u32 4294901760, %v1318_v11  ;;  %8404 = vmatpush3.msra.mxu0 %v10887_v26  ;;  %v1326_v2 = vand.u32 4294901760, %v1325_v40  ;;  %v1781_v62 = vand.u32 4294901760, %v10912_v18  ;;  %v10973_v8 = vsub.f32 %v2136_v46, %v10957_v52  ;;  %s11861_s25 = scalar_lea.hbm (%p1191_p7), %s11911_s4, %s8148_s14  ;;  %s7816_s8 = scalar_lea.sflag (%p1191_p7), [#allocation5], %s9962_s30 }
 0x271   : >> { %v8116_v54 = vld [vmem:[%s10898_s28 + $0x6] sm:$0xff]  ;;  %8415 = vmatprep.subr.mxu0 %v9810_v32  ;;  %v1788_v1 = vand.u32 4294901760, %v10918_v49  ;;  %v2249_v33 = vand.u32 4294901760, %v10964_v9  ;;  %v11031_v59 = vsub.f32 %v2606_v51, %v11018_v4  ;;  %s9455_s12 = scalar_lea.vmem (%p1191_p7), %s11864_s7, 4096  ;;  %p12014_p10 = scmp.ne.s32.totalorder (%p1191_p7), %s11926_s10, 0 }
 0x272   : >> { %v1209_v13 = vsel %vm287_vm0, %v8116_v54, 0  ;;  %v1320_v43 = vsub.f32 %v1318_v11, %v1319_v55  ;;  %v1327_v45 = vsub.f32 %v1325_v40, %v1326_v2  ;;  %v8114_v42 = vld [vmem:[%s10898_s28 + $0x5] sm:$0xff]  ;;  %v1782_v23 = vsub.f32 %v10912_v18, %v1781_v62  ;;  %p9456_p9 = scmp.ne.s32.totalorder (%p1191_p7), %s11864_s7, %s9455_s12  ;;  %s9812_s21 = smov (%p1191_p7), [#allocation8]  }
 0x273   : >> { %v1278_v57 = vand.u32 4294901760, %v1209_v13  ;;  %v1671_v14 = vsel %vm287_vm0, %v8114_v42, 0  ;;  %v1789_v41 = vsub.f32 %v10918_v49, %v1788_v1  ;;  %v8118_v22 = vld [vmem:[%s10898_s28 + $0x7] sm:$0xff]  ;;  %v2256_v16 = vand.u32 4294901760, %v10973_v8  ;;  %s9459_s5 = sshll.u32 (%p1191_p7), %s9812_s21, 4  ;;  %s9460_s5 = int_to_ptr.vmem [resolvable:$false] %s9459_s5 }
 0x274   : >> { %v1321_v3 = vand.u32 4294901760, %v1320_v43  ;;  %v1328_v44 = vand.u32 4294901760, %v1327_v45  ;;  %v10914_v10 = vand.u32 4294901760, %v1671_v14  ;;  %v1783_v47 = vand.u32 4294901760, %v1782_v23  ;;  %v8120_v38 = vld [vmem:[%s10898_s28 + $0x8] sm:$0xff]  ;;  %v3074_v45 = vld [vmem:[#allocation6 + $0x40] sm:$0xff]  ;;  %p9457_p12 = pnand (%p1191_p7), %p9456_p9, %p12014_p10  ;;  %p9462_p0 = scmp.lt.s32.totalorder (%p1191_p7), %s11864_s7, %s9460_s5 }
 0x275   : >> { %v1279_v34 = vsub.f32 %v1209_v13, %v1278_v57  ;;  %v1790_v37 = vand.u32 4294901760, %v1789_v41  ;;  %v2139_v5 = vsel %vm287_vm0, %v8118_v22, 0  ;;  %v2250_v17 = vsub.f32 %v10964_v9, %v2249_v33  ;;  %v3075_v13 = vld [vmem:[#allocation6 + $0x48] sm:$0xff]  ;;  %s9461_s19 = scalar_lea.vmem (%p1191_p7), %s9460_s5, 8192 }
 0x276   : >> { %8409 = vmatpush3.msra.mxu1 %v1321_v3  ;;  %v10925_v0 = vsub.f32 %v1671_v14, %v10914_v10  ;;  %v10966_v53 = vand.u32 4294901760, %v2139_v5  ;;  %v2257_v12 = vsub.f32 %v10973_v8, %v2256_v16  ;;  %v2608_v35 = vsel %vm287_vm0, %v8120_v38, 0  ;;  %v8122_v43 = vld [vmem:[%s10898_s28 + $0x9] sm:$0xff]  ;;  %p9458_p13 = pneg (%p1191_p7), %p9457_p12  ;;  %p9463_p5 = scmp.lt.s32.totalorder (%p1191_p7), %s9461_s19, %s9455_s12 }
 0x277   : >> { %v1280_v30 = vand.u32 4294901760, %v1279_v34  ;;  %8410 = vmatprep.subr.mxu1 %v9810_v32  ;;  %v2251_v60 = vand.u32 4294901760, %v2250_v17  ;;  %v11033_v50 = vand.u32 4294901760, %v2608_v35  ;;  %v8124_v23 = vld [vmem:[%s10898_s28 + $0xa] sm:$0xff] }
 0x278   : >> { %8411 = vmatpush3.msra.mxu1 %v1328_v44  ;;  %v1742_v61 = vand.u32 4294901760, %v10925_v0  ;;  %v10981_v39 = vsub.f32 %v2139_v5, %v10966_v53  ;;  %v2258_v21 = vand.u32 4294901760, %v2257_v12  ;;  %v11091_v44 = vand.u32 4294901760, %v3074_v45  ;;  %v8126_v17 = vld [vmem:[%s10898_s28 + $0xb] sm:$0xff]  ;;  %p9464_p2 = por (%p1191_p7), %p9463_p5, %p9462_p0 }
 0x279   : >> { %v1281_v58 = vsub.f32 %v1279_v34, %v1280_v30  ;;  %8413 = vmatmul.mubr.f32.vlgmr.msra.gmra.mxu1 %v1278_v57  ;;  %8422 = vmatprep.subr.mxu1 %v9810_v32 }
 0x27a   : >> { %8423 = vmatpush3.msra.mxu1 %v1240_v28  ;;  %8426 = vmatprep.mubr.msk.f32.mxu1 %vm9811_vm3, %v9810_v32  ;;  %v1743_v15 = vsub.f32 %v10925_v0, %v1742_v61  ;;  %v2210_v20 = vand.u32 4294901760, %v10981_v39  ;;  %p9465_p1 = pnand (%p1191_p7), %p9464_p2, %p9458_p13 }
 0x27b   : >> { %v1282_v63 = vand.u32 4294901760, %v1281_v58  ;;  %8424 = vmatprep.subr.mxu1 %v9810_v32 }
 0x27c   : >> { %8425 = vmatpush3.msra.mxu1 %v10887_v26  ;;  %v1744_v36 = vand.u32 4294901760, %v1743_v15  ;;  %v2211_v24 = vsub.f32 %v10981_v39, %v2210_v20 }
 0x27d   : >> { %8406 = vmatmul.mubr.f32.vlgmr.msra.gmra.mxu0 %v1282_v63  ;;  %8427 = vmatmul.mubr.f32.vlgmr.msra.gmra.mxu1 %v1280_v30 }
 0x27e   : >> { %8416 = vmatpush3.msra.mxu0 %v1318_v11  ;;  %8419 = vmatprep.mubr.msk.f32.mxu0 %vm9811_vm3, %v9810_v32  ;;  %v2212_v6 = vand.u32 4294901760, %v2211_v24  ;;  %v11048_v11 = vsub.f32 %v2608_v35, %v11033_v50 }
 0x27f   : >> { %8417 = vmatprep.subr.mxu0 %v9810_v32  ;;  %8436 = vmatprep.subr.mxu1 %v9810_v32 }
 0x280   : >> { %8418 = vmatpush3.msra.mxu0 %v1325_v40  ;;  %8437 = vmatpush3.msra.mxu1 %v1240_v28  ;;  %v11040_v28 = vsub.f32 %v2605_v48, %v11024_v25 }
 0x281   : >> { %8429 = vmatprep.subr.mxu0 %v9810_v32  ;;  %8420 = vmatmul.mubr.f32.vlgmr.msra.gmra.mxu0 %v1279_v34  ;;  %v11085_v34 = vand.u32 4294901760, %v3075_v13 }
 0x282   : >> { %8430 = vmatpush3.msra.mxu0 %v1319_v55  ;;  %8438 = vmatprep.subr.mxu1 %v9810_v32  ;;  %v2725_v40 = vand.u32 4294901760, %v11040_v28  ;;  %v2679_v55 = vand.u32 4294901760, %v11048_v11 }
 0x283   : >> { %8431 = vmatprep.subr.mxu0 %v9810_v32  ;;  %8433 = vmatprep.mubr.msk.f32.mxu0 %vm9811_vm3, %v9810_v32  ;;  %v11098_v42 = vsub.f32 %v3075_v13, %v11085_v34 }
 0x284   : >> { %8432 = vmatpush3.msra.mxu0 %v1326_v2  ;;  %8439 = vmatpush3.msra.mxu1 %v10887_v26  ;;  %v2718_v26 = vand.u32 4294901760, %v11031_v59  ;;  %v2726_v2 = vsub.f32 %v11040_v28, %v2725_v40 }
 0x285   : >> { %8440 = vmatprep.mubr.msk.f32.mxu1 %vm9811_vm3, %v9810_v32  ;;  %8443 = vmatprep.subr.mxu0 %v9810_v32  ;;  %v3187_v14 = vand.u32 4294901760, %v11098_v42 }
 0x286   : >> { %8434 = vmatmul.mubr.f32.vlgmr.msra.gmra.mxu0 %v1278_v57  ;;  %8441 = vmatmul.mubr.f32.vlgmr.msra.gmra.mxu1 %v1278_v57  ;;  %v2719_v54 = vsub.f32 %v11031_v59, %v2718_v26  ;;  %v2680_v57 = vsub.f32 %v11048_v11, %v2679_v55  ;;  %v2727_v27 = vand.u32 4294901760, %v2726_v2 }
 0x287   : >> { %8444 = vmatpush3.msra.mxu0 %v10904_v7  ;;  %8450 = vmatprep.subr.mxu1 %v9810_v32 }
 0x288   : >> { %8445 = vmatprep.subr.mxu0 %v9810_v32  ;;  %8451 = vmatpush3.msra.mxu1 %v1783_v47  ;;  %v2720_v19 = vand.u32 4294901760, %v2719_v54  ;;  %v2681_v3 = vand.u32 4294901760, %v2680_v57  ;;  %v3546_v47 = vsel %vm287_vm0, %v8124_v23, 0  ;;  %v8128_v54 = vld [vmem:[%s10898_s28 + $0x25] sm:$0xff] }
 0x289   : >> { %8446 = vmatpush3.msra.mxu0 %v10907_v56  ;;  %8452 = vmatprep.subr.mxu1 %v9810_v32 }
 0x28a   : >> { %8447 = vmatprep.mubr.msk.f32.mxu0 %vm9811_vm3, %v9810_v32  ;;  %8453 = vmatpush3.msra.mxu1 %v1790_v37  ;;  %v11167_v37 = vand.u32 4294901760, %v3546_v47 }
 0x28b   : >> { %8454 = vmatprep.mubr.msk.f32.mxu1 %vm9811_vm3, %v9810_v32  ;;  %8457 = vmatprep.subr.mxu0 %v9810_v32 }
 0x28c   : >> { %8448 = vmatmul.mubr.f32.vlgmr.msra.gmra.mxu0 %v1744_v36  ;;  %8455 = vmatmul.mubr.f32.vlgmr.msra.gmra.mxu1 %v10914_v10  ;;  %v11182_v36 = vsub.f32 %v3546_v47, %v11167_v37 }
 0x28d   : >> { %8458 = vmatpush3.msra.mxu0 %v10912_v18  ;;  %8464 = vmatprep.subr.mxu1 %v9810_v32 }
 0x28e   : >> { %8459 = vmatprep.subr.mxu0 %v9810_v32  ;;  %8465 = vmatpush3.msra.mxu1 %v10904_v7 }
 0x28f   : >> { %8460 = vmatpush3.msra.mxu0 %v10918_v49  ;;  %8466 = vmatprep.subr.mxu1 %v9810_v32 }
 0x290   : >> { %8461 = vmatprep.mubr.msk.f32.mxu0 %vm9811_vm3, %v9810_v32  ;;  %8467 = vmatpush3.msra.mxu1 %v10907_v56 }
 0x291   : >> { %8468 = vmatprep.mubr.msk.f32.mxu1 %vm9811_vm3, %v9810_v32  ;;  %8471 = vmatprep.subr.mxu0 %v9810_v32 }
 0x292   : >> { %8462 = vmatmul.mubr.f32.vlgmr.msra.gmra.mxu0 %v10925_v0  ;;  %8469 = vmatmul.mubr.f32.vlgmr.msra.gmra.mxu1 %v1742_v61  ;;  %v3543_v61 = vld [vmem:[#allocation6 + $0x50] sm:$0xff] }
 0x293   : >> { %8472 = vmatpush3.msra.mxu0 %v1781_v62  ;;  %8478 = vmatprep.subr.mxu1 %v9810_v32  ;;  %v3544_v62 = vld [vmem:[#allocation6 + $0x58] sm:$0xff]  ;;  %v11158_v22 = vand.u32 4294901760, %v3543_v61 }
 0x294   : >> { %8473 = vmatprep.subr.mxu0 %v9810_v32  ;;  %8479 = vmatpush3.msra.mxu1 %v10904_v7  ;;  %v3077_v7 = vsel %vm287_vm0, %v8122_v43, 0  ;;  %v11152_v29 = vand.u32 4294901760, %v3544_v62 }
 0x295   : >> { %8474 = vmatpush3.msra.mxu0 %v1788_v1  ;;  %8480 = vmatprep.subr.mxu1 %v9810_v32  ;;  %v11100_v30 = vand.u32 4294901760, %v3077_v7 }
 0x296   : >> { %8475 = vmatprep.mubr.msk.f32.mxu0 %vm9811_vm3, %v9810_v32  ;;  %8481 = vmatpush3.msra.mxu1 %v10907_v56  ;;  %v11107_v56 = vsub.f32 %v3074_v45, %v11091_v44  ;;  %v11165_v46 = vsub.f32 %v3544_v62, %v11152_v29 }
 0x297   : >> { %8482 = vmatprep.mubr.msk.f32.mxu1 %vm9811_vm3, %v9810_v32  ;;  %8485 = vmatprep.subr.mxu0 %v9810_v32  ;;  %v11115_v58 = vsub.f32 %v3077_v7, %v11100_v30 }
 0x298   : >> { %8476 = vmatmul.mubr.f32.vlgmr.msra.gmra.mxu0 %v10914_v10  ;;  %8483 = vmatmul.mubr.f32.vlgmr.msra.gmra.mxu1 %v10914_v10  ;;  %v3194_v18 = vand.u32 4294901760, %v11107_v56  ;;  %v3188_v10 = vsub.f32 %v11098_v42, %v3187_v14  ;;  %v3656_v5 = vand.u32 4294901760, %v11165_v46 }
 0x299   : >> { %8486 = vmatpush3.msra.mxu0 %v10951_v31  ;;  %8492 = vmatprep.subr.mxu1 %v9810_v32  ;;  %v3148_v63 = vand.u32 4294901760, %v11115_v58 }
 0x29a   : >> { %8487 = vmatprep.subr.mxu0 %v9810_v32  ;;  %8493 = vmatpush3.msra.mxu1 %v2251_v60  ;;  %v3195_v49 = vsub.f32 %v11107_v56, %v3194_v18  ;;  %v3189_v0 = vand.u32 4294901760, %v3188_v10  ;;  %v4015_v60 = vsel %vm287_vm0, %v8126_v17, 0  ;;  %v8130_v10 = vld [vmem:[%s10898_s28 + $0x26] sm:$0xff] }
 0x29b   : >> { %8488 = vmatpush3.msra.mxu0 %v10957_v52  ;;  %8494 = vmatprep.subr.mxu1 %v9810_v32  ;;  %v3149_v1 = vsub.f32 %v11115_v58, %v3148_v63 }
 0x29c   : >> { %8489 = vmatprep.mubr.msk.f32.mxu0 %vm9811_vm3, %v9810_v32  ;;  %8495 = vmatpush3.msra.mxu1 %v2258_v21  ;;  %v3196_v41 = vand.u32 4294901760, %v3195_v49  ;;  %v11234_v21 = vand.u32 4294901760, %v4015_v60 }
 0x29d   : >> { %8496 = vmatprep.mubr.msk.f32.mxu1 %vm9811_vm3, %v9810_v32  ;;  %8499 = vmatprep.subr.mxu0 %v9810_v32  ;;  %v3150_v15 = vand.u32 4294901760, %v3149_v1 }
 0x29e   : >> { %8490 = vmatmul.mubr.f32.vlgmr.msra.gmra.mxu0 %v2212_v6  ;;  %8497 = vmatmul.mubr.f32.vlgmr.msra.gmra.mxu1 %v10966_v53  ;;  %v11249_v6 = vsub.f32 %v4015_v60, %v11234_v21 }
 0x29f   : >> { %8500 = vmatpush3.msra.mxu0 %v10964_v9  ;;  %8506 = vmatprep.subr.mxu1 %v9810_v32  ;;  %v3657_v9 = vsub.f32 %v11165_v46, %v3656_v5 }
 0x2a0   : >> { %8501 = vmatprep.subr.mxu0 %v9810_v32  ;;  %8507 = vmatpush3.msra.mxu1 %v10951_v31 }
 0x2a1   : >> { %8502 = vmatpush3.msra.mxu0 %v10973_v8  ;;  %8508 = vmatprep.subr.mxu1 %v9810_v32 }
 0x2a2   : >> { %8503 = vmatprep.mubr.msk.f32.mxu0 %vm9811_vm3, %v9810_v32  ;;  %8509 = vmatpush3.msra.mxu1 %v10957_v52 }
 0x2a3   : >> { %8510 = vmatprep.mubr.msk.f32.mxu1 %vm9811_vm3, %v9810_v32  ;;  %8513 = vmatprep.subr.mxu0 %v9810_v32 }
 0x2a4   : >> { %8504 = vmatmul.mubr.f32.vlgmr.msra.gmra.mxu0 %v10981_v39  ;;  %8511 = vmatmul.mubr.f32.vlgmr.msra.gmra.mxu1 %v2210_v20  ;;  %v3658_v39 = vand.u32 4294901760, %v3657_v9  ;;  %v4012_v20 = vld [vmem:[#allocation6 + $0x60] sm:$0xff] }
 0x2a5   : >> { %8514 = vmatpush3.msra.mxu0 %v2249_v33  ;;  %8520 = vmatprep.subr.mxu1 %v9810_v32  ;;  %v4013_v33 = vld [vmem:[#allocation6 + $0x68] sm:$0xff]  ;;  %v11225_v38 = vand.u32 4294901760, %v4012_v20 }
 0x2a6   : >> { %8515 = vmatprep.subr.mxu0 %v9810_v32  ;;  %8521 = vmatpush3.msra.mxu1 %v10951_v31  ;;  %v11174_v31 = vsub.f32 %v3543_v61, %v11158_v22  ;;  %v11219_v51 = vand.u32 4294901760, %v4013_v33  ;;  %v8132_v9 = vld [vmem:[%s10898_s28 + $0x27] sm:$0xff] }
 0x2a7   : >> { %8516 = vmatpush3.msra.mxu0 %v2256_v16  ;;  %8522 = vmatprep.subr.mxu1 %v9810_v32 }
 0x2a8   : >> { %8517 = vmatprep.mubr.msk.f32.mxu0 %vm9811_vm3, %v9810_v32  ;;  %8523 = vmatpush3.msra.mxu1 %v10957_v52  ;;  %v3663_v52 = vand.u32 4294901760, %v11174_v31  ;;  %v11232_v48 = vsub.f32 %v4013_v33, %v11219_v51 }
 0x2a9   : >> { %8524 = vmatprep.mubr.msk.f32.mxu1 %vm9811_vm3, %v9810_v32  ;;  %8527 = vmatprep.subr.mxu0 %v9810_v32 }
 0x2aa   : >> { %8518 = vmatmul.mubr.f32.vlgmr.msra.gmra.mxu0 %v10966_v53  ;;  %8525 = vmatmul.mubr.f32.vlgmr.msra.gmra.mxu1 %v10966_v53  ;;  %v3617_v53 = vand.u32 4294901760, %v11182_v36  ;;  %v3664_v8 = vsub.f32 %v11174_v31, %v3663_v52  ;;  %v4125_v35 = vand.u32 4294901760, %v11232_v48 }
 0x2ab   : >> { %8528 = vmatpush3.msra.mxu0 %v11018_v4  ;;  %8534 = vmatprep.subr.mxu1 %v9810_v32 }
 0x2ac   : >> { %8529 = vmatprep.subr.mxu0 %v9810_v32  ;;  %8535 = vmatpush3.msra.mxu1 %v2720_v19  ;;  %v3618_v16 = vsub.f32 %v11182_v36, %v3617_v53  ;;  %v3665_v12 = vand.u32 4294901760, %v3664_v8  ;;  %v4484_v19 = vsel %vm287_vm0, %v8128_v54, 0 }
 0x2ad   : >> { %8530 = vmatpush3.msra.mxu0 %v11024_v25  ;;  %8536 = vmatprep.subr.mxu1 %v9810_v32 }
 0x2ae   : >> { %8531 = vmatprep.mubr.msk.f32.mxu0 %vm9811_vm3, %v9810_v32  ;;  %8537 = vmatpush3.msra.mxu1 %v2727_v27  ;;  %v3619_v24 = vand.u32 4294901760, %v3618_v16  ;;  %v11301_v27 = vand.u32 4294901760, %v4484_v19 }
 0x2af   : >> { %8538 = vmatprep.mubr.msk.f32.mxu1 %vm9811_vm3, %v9810_v32  ;;  %8541 = vmatprep.subr.mxu0 %v9810_v32 }
 0x2b0   : >> { %8532 = vmatmul.mubr.f32.vlgmr.msra.gmra.mxu0 %v2681_v3  ;;  %8539 = vmatmul.mubr.f32.vlgmr.msra.gmra.mxu1 %v11033_v50  ;;  %v11316_v3 = vsub.f32 %v4484_v19, %v11301_v27 }
 0x2b1   : >> { %8542 = vmatpush3.msra.mxu0 %v11031_v59  ;;  %8548 = vmatprep.subr.mxu1 %v9810_v32  ;;  %v4126_v59 = vsub.f32 %v11232_v48, %v4125_v35 }
 0x2b2   : >> { %8543 = vmatprep.subr.mxu0 %v9810_v32  ;;  %8549 = vmatpush3.msra.mxu1 %v11018_v4 }
 0x2b3   : >> { %8544 = vmatpush3.msra.mxu0 %v11040_v28  ;;  %8550 = vmatprep.subr.mxu1 %v9810_v32 }
 0x2b4   : >> { %8545 = vmatprep.mubr.msk.f32.mxu0 %vm9811_vm3, %v9810_v32  ;;  %8551 = vmatpush3.msra.mxu1 %v11024_v25 }
 0x2b5   : >> { %8552 = vmatprep.mubr.msk.f32.mxu1 %vm9811_vm3, %v9810_v32  ;;  %8555 = vmatprep.subr.mxu0 %v9810_v32 }
 0x2b6   : >> { %8546 = vmatmul.mubr.f32.vlgmr.msra.gmra.mxu0 %v11048_v11  ;;  %8553 = vmatmul.mubr.f32.vlgmr.msra.gmra.mxu1 %v2679_v55  ;;  %v4127_v11 = vand.u32 4294901760, %v4126_v59  ;;  %v4481_v55 = vld [vmem:[#allocation6 + $0x70] sm:$0xff]  ;;  %v8134_v59 = vld [vmem:[%s10898_s28 + $0x28] sm:$0xff] }
 0x2b7   : >> { %8556 = vmatpush3.msra.mxu0 %v2718_v26  ;;  %8562 = vmatprep.subr.mxu1 %v9810_v32  ;;  %v4482_v26 = vld [vmem:[#allocation6 + $0x78] sm:$0xff]  ;;  %v11292_v43 = vand.u32 4294901760, %v4481_v55 }
 0x2b8   : >> { %8557 = vmatprep.subr.mxu0 %v9810_v32  ;;  %8563 = vmatpush3.msra.mxu1 %v11018_v4  ;;  %v11241_v4 = vsub.f32 %v4012_v20, %v11225_v38  ;;  %v11286_v13 = vand.u32 4294901760, %v4482_v26 }
 0x2b9   : >> { %8558 = vmatpush3.msra.mxu0 %v2725_v40  ;;  %8564 = vmatprep.subr.mxu1 %v9810_v32 }
 0x2ba   : >> { %8559 = vmatprep.mubr.msk.f32.mxu0 %vm9811_vm3, %v9810_v32  ;;  %8565 = vmatpush3.msra.mxu1 %v11024_v25  ;;  %v4132_v25 = vand.u32 4294901760, %v11241_v4  ;;  %v11299_v45 = vsub.f32 %v4482_v26, %v11286_v13 }
 0x2bb   : >> { %8566 = vmatprep.mubr.msk.f32.mxu1 %vm9811_vm3, %v9810_v32  ;;  %8569 = vmatprep.subr.mxu0 %v9810_v32 }
 0x2bc   : >> { %8560 = vmatmul.mubr.f32.vlgmr.msra.gmra.mxu0 %v11033_v50  ;;  %8567 = vmatmul.mubr.f32.vlgmr.msra.gmra.mxu1 %v11033_v50  ;;  %v4086_v50 = vand.u32 4294901760, %v11249_v6  ;;  %v4133_v28 = vsub.f32 %v11241_v4, %v4132_v25  ;;  %v4594_v7 = vand.u32 4294901760, %v11299_v45 }
 0x2bd   : >> { %8570 = vmatpush3.msra.mxu0 %v11085_v34  ;;  %8576 = vmatprep.subr.mxu1 %v9810_v32 }
 0x2be   : >> { %8571 = vmatprep.subr.mxu0 %v9810_v32  ;;  %8577 = vmatpush3.msra.mxu1 %v3189_v0  ;;  %v4087_v40 = vsub.f32 %v11249_v6, %v4086_v50  ;;  %v4134_v2 = vand.u32 4294901760, %v4133_v28  ;;  %v4953_v0 = vsel %vm287_vm0, %v8130_v10, 0 }
 0x2bf   : >> { %8572 = vmatpush3.msra.mxu0 %v11091_v44  ;;  %8578 = vmatprep.subr.mxu1 %v9810_v32 }
 0x2c0   : >> { %8573 = vmatprep.mubr.msk.f32.mxu0 %vm9811_vm3, %v9810_v32  ;;  %8579 = vmatpush3.msra.mxu1 %v3196_v41  ;;  %v4088_v57 = vand.u32 4294901760, %v4087_v40  ;;  %v11368_v41 = vand.u32 4294901760, %v4953_v0 }
 0x2c1   : >> { %8580 = vmatprep.mubr.msk.f32.mxu1 %vm9811_vm3, %v9810_v32  ;;  %8583 = vmatprep.subr.mxu0 %v9810_v32 }
 0x2c2   : >> { %8574 = vmatmul.mubr.f32.vlgmr.msra.gmra.mxu0 %v3150_v15  ;;  %8581 = vmatmul.mubr.f32.vlgmr.msra.gmra.mxu1 %v11100_v30  ;;  %v11383_v15 = vsub.f32 %v4953_v0, %v11368_v41 }
 0x2c3   : >> { %8584 = vmatpush3.msra.mxu0 %v11098_v42  ;;  %8590 = vmatprep.subr.mxu1 %v9810_v32  ;;  %v4595_v42 = vsub.f32 %v11299_v45, %v4594_v7 }
 0x2c4   : >> { %8585 = vmatprep.subr.mxu0 %v9810_v32  ;;  %8591 = vmatpush3.msra.mxu1 %v11085_v34 }
 0x2c5   : >> { %8586 = vmatpush3.msra.mxu0 %v11107_v56  ;;  %8592 = vmatprep.subr.mxu1 %v9810_v32 }
 0x2c6   : >> { %8587 = vmatprep.mubr.msk.f32.mxu0 %vm9811_vm3, %v9810_v32  ;;  %8593 = vmatpush3.msra.mxu1 %v11091_v44 }
 0x2c7   : >> { %8594 = vmatprep.mubr.msk.f32.mxu1 %vm9811_vm3, %v9810_v32  ;;  %8597 = vmatprep.subr.mxu0 %v9810_v32 }
 0x2c8   : >> { %8588 = vmatmul.mubr.f32.vlgmr.msra.gmra.mxu0 %v11115_v58  ;;  %8595 = vmatmul.mubr.f32.vlgmr.msra.gmra.mxu1 %v3148_v63  ;;  %v4596_v58 = vand.u32 4294901760, %v4595_v42  ;;  %v4950_v63 = vld [vmem:[#allocation6 + $0x80] sm:$0xff]  ;;  %v8136_v42 = vld [vmem:[%s10898_s28 + $0x29] sm:$0xff] }
 0x2c9   : >> { %8598 = vmatpush3.msra.mxu0 %v3187_v14  ;;  %8604 = vmatprep.subr.mxu1 %v9810_v32  ;;  %v4951_v14 = vld [vmem:[#allocation6 + $0x88] sm:$0xff]  ;;  %v11359_v23 = vand.u32 4294901760, %v4950_v63 }
 0x2ca   : >> { %8599 = vmatprep.subr.mxu0 %v9810_v32  ;;  %8605 = vmatpush3.msra.mxu1 %v11085_v34  ;;  %v11308_v34 = vsub.f32 %v4481_v55, %v11292_v43  ;;  %v11353_v62 = vand.u32 4294901760, %v4951_v14 }
 0x2cb   : >> { %8600 = vmatpush3.msra.mxu0 %v3194_v18  ;;  %8606 = vmatprep.subr.mxu1 %v9810_v32 }
 0x2cc   : >> { %8601 = vmatprep.mubr.msk.f32.mxu0 %vm9811_vm3, %v9810_v32  ;;  %8607 = vmatpush3.msra.mxu1 %v11091_v44  ;;  %v4601_v44 = vand.u32 4294901760, %v11308_v34  ;;  %v11366_v61 = vsub.f32 %v4951_v14, %v11353_v62 }
 0x2cd   : >> { %8608 = vmatprep.mubr.msk.f32.mxu1 %vm9811_vm3, %v9810_v32  ;;  %8611 = vmatprep.subr.mxu0 %v9810_v32 }
 0x2ce   : >> { %8602 = vmatmul.mubr.f32.vlgmr.msra.gmra.mxu0 %v11100_v30  ;;  %8609 = vmatmul.mubr.f32.vlgmr.msra.gmra.mxu1 %v11100_v30  ;;  %v4555_v30 = vand.u32 4294901760, %v11316_v3  ;;  %v4602_v56 = vsub.f32 %v11308_v34, %v4601_v44  ;;  %v5063_v47 = vand.u32 4294901760, %v11366_v61 }
 0x2cf   : >> { %8612 = vmatpush3.msra.mxu0 %v11152_v29  ;;  %8618 = vmatprep.subr.mxu1 %v9810_v32 }
 0x2d0   : >> { %8613 = vmatprep.subr.mxu0 %v9810_v32  ;;  %8619 = vmatpush3.msra.mxu1 %v3658_v39  ;;  %v4556_v18 = vsub.f32 %v11316_v3, %v4555_v30  ;;  %v4603_v49 = vand.u32 4294901760, %v4602_v56  ;;  %v5422_v39 = vsel %vm287_vm0, %v8132_v9, 0 }
 0x2d1   : >> { %8614 = vmatpush3.msra.mxu0 %v11158_v22  ;;  %8620 = vmatprep.subr.mxu1 %v9810_v32 }
 0x2d2   : >> { %8615 = vmatprep.mubr.msk.f32.mxu0 %vm9811_vm3, %v9810_v32  ;;  %8621 = vmatpush3.msra.mxu1 %v3665_v12  ;;  %v4557_v1 = vand.u32 4294901760, %v4556_v18  ;;  %v11435_v12 = vand.u32 4294901760, %v5422_v39 }
 0x2d3   : >> { %8622 = vmatprep.mubr.msk.f32.mxu1 %vm9811_vm3, %v9810_v32  ;;  %8625 = vmatprep.subr.mxu0 %v9810_v32 }
 0x2d4   : >> { %8616 = vmatmul.mubr.f32.vlgmr.msra.gmra.mxu0 %v3619_v24  ;;  %8623 = vmatmul.mubr.f32.vlgmr.msra.gmra.mxu1 %v11167_v37  ;;  %v11450_v24 = vsub.f32 %v5422_v39, %v11435_v12 }
 0x2d5   : >> { %8626 = vmatpush3.msra.mxu0 %v11165_v46  ;;  %8632 = vmatprep.subr.mxu1 %v9810_v32  ;;  %v5064_v46 = vsub.f32 %v11366_v61, %v5063_v47 }
 0x2d6   : >> { %8627 = vmatprep.subr.mxu0 %v9810_v32  ;;  %8633 = vmatpush3.msra.mxu1 %v11152_v29 }
 0x2d7   : >> { %8628 = vmatpush3.msra.mxu0 %v11174_v31  ;;  %8634 = vmatprep.subr.mxu1 %v9810_v32 }
 0x2d8   : >> { %8629 = vmatprep.mubr.msk.f32.mxu0 %vm9811_vm3, %v9810_v32  ;;  %8635 = vmatpush3.msra.mxu1 %v11158_v22 }
 0x2d9   : >> { %8636 = vmatprep.mubr.msk.f32.mxu1 %vm9811_vm3, %v9810_v32  ;;  %8639 = vmatprep.subr.mxu0 %v9810_v32 }
 0x2da   : >> { %8630 = vmatmul.mubr.f32.vlgmr.msra.gmra.mxu0 %v11182_v36  ;;  %8637 = vmatmul.mubr.f32.vlgmr.msra.gmra.mxu1 %v3617_v53  ;;  %v5065_v36 = vand.u32 4294901760, %v5064_v46  ;;  %v5419_v53 = vld [vmem:[#allocation6 + $0x90] sm:$0xff] }
 0x2db   : >> { %8640 = vmatpush3.msra.mxu0 %v3656_v5  ;;  %8646 = vmatprep.subr.mxu1 %v9810_v32  ;;  %v5420_v5 = vld [vmem:[#allocation6 + $0x98] sm:$0xff]  ;;  %v11426_v17 = vand.u32 4294901760, %v5419_v53  ;;  %v8138_v46 = vld [vmem:[%s10898_s28 + $0x2a] sm:$0xff] }
 0x2dc   : >> { %8641 = vmatprep.subr.mxu0 %v9810_v32  ;;  %8647 = vmatpush3.msra.mxu1 %v11152_v29  ;;  %v11375_v29 = vsub.f32 %v4950_v63, %v11359_v23  ;;  %v11420_v33 = vand.u32 4294901760, %v5420_v5 }
 0x2dd   : >> { %8642 = vmatpush3.msra.mxu0 %v3663_v52  ;;  %8648 = vmatprep.subr.mxu1 %v9810_v32 }
 0x2de   : >> { %8643 = vmatprep.mubr.msk.f32.mxu0 %vm9811_vm3, %v9810_v32  ;;  %8649 = vmatpush3.msra.mxu1 %v11158_v22  ;;  %v5070_v22 = vand.u32 4294901760, %v11375_v29  ;;  %v11433_v20 = vsub.f32 %v5420_v5, %v11420_v33 }
 0x2df   : >> { %8650 = vmatprep.mubr.msk.f32.mxu1 %vm9811_vm3, %v9810_v32  ;;  %8653 = vmatprep.subr.mxu0 %v9810_v32 }
 0x2e0   : >> { %8644 = vmatmul.mubr.f32.vlgmr.msra.gmra.mxu0 %v11167_v37  ;;  %8651 = vmatmul.mubr.f32.vlgmr.msra.gmra.mxu1 %v11167_v37  ;;  %v5024_v37 = vand.u32 4294901760, %v11383_v15  ;;  %v5071_v31 = vsub.f32 %v11375_v29, %v5070_v22  ;;  %v5532_v60 = vand.u32 4294901760, %v11433_v20 }
 0x2e1   : >> { %8654 = vmatpush3.msra.mxu0 %v11219_v51  ;;  %8660 = vmatprep.subr.mxu1 %v9810_v32 }
 0x2e2   : >> { %8655 = vmatprep.subr.mxu0 %v9810_v32  ;;  %8661 = vmatpush3.msra.mxu1 %v4127_v11  ;;  %v5025_v52 = vsub.f32 %v11383_v15, %v5024_v37  ;;  %v5072_v8 = vand.u32 4294901760, %v5071_v31  ;;  %v5891_v11 = vsel %vm287_vm0, %v8134_v59, 0 }
 0x2e3   : >> { %8656 = vmatpush3.msra.mxu0 %v11225_v38  ;;  %8662 = vmatprep.subr.mxu1 %v9810_v32 }
 0x2e4   : >> { %8657 = vmatprep.mubr.msk.f32.mxu0 %vm9811_vm3, %v9810_v32  ;;  %8663 = vmatpush3.msra.mxu1 %v4134_v2  ;;  %v5026_v16 = vand.u32 4294901760, %v5025_v52  ;;  %v11502_v2 = vand.u32 4294901760, %v5891_v11  ;;  %v6829_v52 = vsel %vm287_vm0, %v8138_v46, 0 }
 0x2e5   : >> { %8664 = vmatprep.mubr.msk.f32.mxu1 %vm9811_vm3, %v9810_v32  ;;  %8667 = vmatprep.subr.mxu0 %v9810_v32 }
 0x2e6   : >> { %8658 = vmatmul.mubr.f32.vlgmr.msra.gmra.mxu0 %v4088_v57  ;;  %8665 = vmatmul.mubr.f32.vlgmr.msra.gmra.mxu1 %v11234_v21  ;;  %v11517_v57 = vsub.f32 %v5891_v11, %v11502_v2 }
 0x2e7   : >> { %8668 = vmatpush3.msra.mxu0 %v11232_v48  ;;  %8674 = vmatprep.subr.mxu1 %v9810_v32  ;;  %v5533_v48 = vsub.f32 %v11433_v20, %v5532_v60 }
 0x2e8   : >> { %8669 = vmatprep.subr.mxu0 %v9810_v32  ;;  %8675 = vmatpush3.msra.mxu1 %v11219_v51 }
 0x2e9   : >> { %8670 = vmatpush3.msra.mxu0 %v11241_v4  ;;  %8676 = vmatprep.subr.mxu1 %v9810_v32 }
 0x2ea   : >> { %8671 = vmatprep.mubr.msk.f32.mxu0 %vm9811_vm3, %v9810_v32  ;;  %8677 = vmatpush3.msra.mxu1 %v11225_v38 }
 0x2eb   : >> { %8678 = vmatprep.mubr.msk.f32.mxu1 %vm9811_vm3, %v9810_v32  ;;  %8681 = vmatprep.subr.mxu0 %v9810_v32 }
 0x2ec   : >> { %8672 = vmatmul.mubr.f32.vlgmr.msra.gmra.mxu0 %v11249_v6  ;;  %8679 = vmatmul.mubr.f32.vlgmr.msra.gmra.mxu1 %v4086_v50  ;;  %v5534_v6 = vand.u32 4294901760, %v5533_v48  ;;  %v5888_v50 = vld [vmem:[#allocation6 + $0xa0] sm:$0xff] }
 0x2ed   : >> { %8682 = vmatpush3.msra.mxu0 %v4125_v35  ;;  %8688 = vmatprep.subr.mxu1 %v9810_v32  ;;  %v5889_v35 = vld [vmem:[#allocation6 + $0xa8] sm:$0xff]  ;;  %v11493_v54 = vand.u32 4294901760, %v5888_v50 }
 0x2ee   : >> { %8683 = vmatprep.subr.mxu0 %v9810_v32  ;;  %8689 = vmatpush3.msra.mxu1 %v11219_v51  ;;  %v11442_v51 = vsub.f32 %v5419_v53, %v11426_v17  ;;  %v11487_v26 = vand.u32 4294901760, %v5889_v35 }
 0x2ef   : >> { %8684 = vmatpush3.msra.mxu0 %v4132_v25  ;;  %8690 = vmatprep.subr.mxu1 %v9810_v32 }
 0x2f0   : >> { %8685 = vmatprep.mubr.msk.f32.mxu0 %vm9811_vm3, %v9810_v32  ;;  %8691 = vmatpush3.msra.mxu1 %v11225_v38  ;;  %v5539_v38 = vand.u32 4294901760, %v11442_v51  ;;  %v11500_v55 = vsub.f32 %v5889_v35, %v11487_v26 }
 0x2f1   : >> { %8692 = vmatprep.mubr.msk.f32.mxu1 %vm9811_vm3, %v9810_v32  ;;  %8695 = vmatprep.subr.mxu0 %v9810_v32 }
 0x2f2   : >> { %8686 = vmatmul.mubr.f32.vlgmr.msra.gmra.mxu0 %v11234_v21  ;;  %8693 = vmatmul.mubr.f32.vlgmr.msra.gmra.mxu1 %v11234_v21  ;;  %v5493_v21 = vand.u32 4294901760, %v11450_v24  ;;  %v5540_v4 = vsub.f32 %v11442_v51, %v5539_v38  ;;  %v6001_v19 = vand.u32 4294901760, %v11500_v55 }
 0x2f3   : >> { %8696 = vmatpush3.msra.mxu0 %v11286_v13  ;;  %8702 = vmatprep.subr.mxu1 %v9810_v32 }
 0x2f4   : >> { %8697 = vmatprep.subr.mxu0 %v9810_v32  ;;  %8703 = vmatpush3.msra.mxu1 %v4596_v58  ;;  %v5494_v25 = vsub.f32 %v11450_v24, %v5493_v21  ;;  %v5541_v28 = vand.u32 4294901760, %v5540_v4  ;;  %v6360_v58 = vsel %vm287_vm0, %v8136_v42, 0 }
 0x2f5   : >> { %8698 = vmatpush3.msra.mxu0 %v11292_v43  ;;  %8704 = vmatprep.subr.mxu1 %v9810_v32 }
 0x2f6   : >> { %8699 = vmatprep.mubr.msk.f32.mxu0 %vm9811_vm3, %v9810_v32  ;;  %8705 = vmatpush3.msra.mxu1 %v4603_v49  ;;  %v5495_v40 = vand.u32 4294901760, %v5494_v25  ;;  %v11569_v49 = vand.u32 4294901760, %v6360_v58 }
 0x2f7   : >> { %8706 = vmatprep.mubr.msk.f32.mxu1 %vm9811_vm3, %v9810_v32  ;;  %8709 = vmatprep.subr.mxu0 %v9810_v32 }
 0x2f8   : >> { %8700 = vmatmul.mubr.f32.vlgmr.msra.gmra.mxu0 %v4557_v1  ;;  %8707 = vmatmul.mubr.f32.vlgmr.msra.gmra.mxu1 %v11301_v27  ;;  %v11584_v1 = vsub.f32 %v6360_v58, %v11569_v49 }
 0x2f9   : >> { %8710 = vmatpush3.msra.mxu0 %v11299_v45  ;;  %8716 = vmatprep.subr.mxu1 %v9810_v32  ;;  %v6002_v45 = vsub.f32 %v11500_v55, %v6001_v19 }
 0x2fa   : >> { %8711 = vmatprep.subr.mxu0 %v9810_v32  ;;  %8717 = vmatpush3.msra.mxu1 %v11286_v13 }
 0x2fb   : >> { %8712 = vmatpush3.msra.mxu0 %v11308_v34  ;;  %8718 = vmatprep.subr.mxu1 %v9810_v32 }
 0x2fc   : >> { %8713 = vmatprep.mubr.msk.f32.mxu0 %vm9811_vm3, %v9810_v32  ;;  %8719 = vmatpush3.msra.mxu1 %v11292_v43 }
 0x2fd   : >> { %8720 = vmatprep.mubr.msk.f32.mxu1 %vm9811_vm3, %v9810_v32  ;;  %8723 = vmatprep.subr.mxu0 %v9810_v32 }
 0x2fe   : >> { %8714 = vmatmul.mubr.f32.vlgmr.msra.gmra.mxu0 %v11316_v3  ;;  %8721 = vmatmul.mubr.f32.vlgmr.msra.gmra.mxu1 %v4555_v30  ;;  %v6003_v3 = vand.u32 4294901760, %v6002_v45  ;;  %v6357_v30 = vld [vmem:[#allocation6 + $0xb0] sm:$0xff] }
 0x2ff   : >> { %8724 = vmatpush3.msra.mxu0 %v4594_v7  ;;  %8730 = vmatprep.subr.mxu1 %v9810_v32  ;;  %v6358_v7 = vld [vmem:[#allocation6 + $0xb8] sm:$0xff]  ;;  %v11560_v10 = vand.u32 4294901760, %v6357_v30 }
 0x300   : >> { %8725 = vmatprep.subr.mxu0 %v9810_v32  ;;  %8731 = vmatpush3.msra.mxu1 %v11286_v13  ;;  %v11509_v13 = vsub.f32 %v5888_v50, %v11493_v54  ;;  %v11554_v14 = vand.u32 4294901760, %v6358_v7 }
 0x301   : >> { %8726 = vmatpush3.msra.mxu0 %v4601_v44  ;;  %8732 = vmatprep.subr.mxu1 %v9810_v32 }
 0x302   : >> { %8727 = vmatprep.mubr.msk.f32.mxu0 %vm9811_vm3, %v9810_v32  ;;  %8733 = vmatpush3.msra.mxu1 %v11292_v43  ;;  %v6008_v43 = vand.u32 4294901760, %v11509_v13  ;;  %v11567_v63 = vsub.f32 %v6358_v7, %v11554_v14 }
 0x303   : >> { %8734 = vmatprep.mubr.msk.f32.mxu1 %vm9811_vm3, %v9810_v32  ;;  %8737 = vmatprep.subr.mxu0 %v9810_v32 }
 0x304   : >> { %8728 = vmatmul.mubr.f32.vlgmr.msra.gmra.mxu0 %v11301_v27  ;;  %8735 = vmatmul.mubr.f32.vlgmr.msra.gmra.mxu1 %v11301_v27  ;;  %v5962_v27 = vand.u32 4294901760, %v11517_v57  ;;  %v6009_v34 = vsub.f32 %v11509_v13, %v6008_v43  ;;  %v6470_v0 = vand.u32 4294901760, %v11567_v63 }
 0x305   : >> { %8738 = vmatpush3.msra.mxu0 %v11353_v62  ;;  %8744 = vmatprep.subr.mxu1 %v9810_v32 }
 0x306   : >> { %8739 = vmatprep.subr.mxu0 %v9810_v32  ;;  %8745 = vmatpush3.msra.mxu1 %v5065_v36  ;;  %v5963_v44 = vsub.f32 %v11517_v57, %v5962_v27  ;;  %v6010_v56 = vand.u32 4294901760, %v6009_v34 }
 0x307   : >> { %8740 = vmatpush3.msra.mxu0 %v11359_v23  ;;  %8746 = vmatprep.subr.mxu1 %v9810_v32 }
 0x308   : >> { %8741 = vmatprep.mubr.msk.f32.mxu0 %vm9811_vm3, %v9810_v32  ;;  %8747 = vmatpush3.msra.mxu1 %v5072_v8  ;;  %v5964_v18 = vand.u32 4294901760, %v5963_v44 }
 0x309   : >> { %8748 = vmatprep.mubr.msk.f32.mxu1 %vm9811_vm3, %v9810_v32  ;;  %8751 = vmatprep.subr.mxu0 %v9810_v32 }
 0x30a   : >> { %8742 = vmatmul.mubr.f32.vlgmr.msra.gmra.mxu0 %v5026_v16  ;;  %8749 = vmatmul.mubr.f32.vlgmr.msra.gmra.mxu1 %v11368_v41 }
 0x30b   : >> { %8752 = vmatpush3.msra.mxu0 %v11366_v61  ;;  %8758 = vmatprep.subr.mxu1 %v9810_v32  ;;  %v6471_v61 = vsub.f32 %v11567_v63, %v6470_v0 }
 0x30c   : >> { %8753 = vmatprep.subr.mxu0 %v9810_v32  ;;  %8759 = vmatpush3.msra.mxu1 %v11353_v62 }
 0x30d   : >> { %8754 = vmatpush3.msra.mxu0 %v11375_v29  ;;  %8760 = vmatprep.subr.mxu1 %v9810_v32 }
 0x30e   : >> { %8755 = vmatprep.mubr.msk.f32.mxu0 %vm9811_vm3, %v9810_v32  ;;  %8761 = vmatpush3.msra.mxu1 %v11359_v23 }
 0x30f   : >> { %8762 = vmatprep.mubr.msk.f32.mxu1 %vm9811_vm3, %v9810_v32  ;;  %8765 = vmatprep.subr.mxu0 %v9810_v32 }
 0x310   : >> { %8756 = vmatmul.mubr.f32.vlgmr.msra.gmra.mxu0 %v11383_v15  ;;  %8763 = vmatmul.mubr.f32.vlgmr.msra.gmra.mxu1 %v5024_v37  ;;  %v6472_v15 = vand.u32 4294901760, %v6471_v61  ;;  %v6826_v37 = vld [vmem:[#allocation6 + $0xc0] sm:$0xff] }
 0x311   : >> { %8766 = vmatpush3.msra.mxu0 %v5063_v47  ;;  %8772 = vmatprep.subr.mxu1 %v9810_v32  ;;  %v6827_v47 = vld [vmem:[#allocation6 + $0xc8] sm:$0xff]  ;;  %v11629_v53 = vand.u32 4294901760, %v6826_v37 }
 0x312   : >> { %8767 = vmatprep.subr.mxu0 %v9810_v32  ;;  %8773 = vmatpush3.msra.mxu1 %v11353_v62  ;;  %v11576_v62 = vsub.f32 %v6357_v30, %v11560_v10  ;;  %v11623_v5 = vand.u32 4294901760, %v6827_v47 }
 0x313   : >> { %8768 = vmatpush3.msra.mxu0 %v5070_v22  ;;  %8774 = vmatprep.subr.mxu1 %v9810_v32 }
 0x314   : >> { %8769 = vmatprep.mubr.msk.f32.mxu0 %vm9811_vm3, %v9810_v32  ;;  %8775 = vmatpush3.msra.mxu1 %v11359_v23  ;;  %v6477_v23 = vand.u32 4294901760, %v11576_v62  ;;  %v11636_v16 = vsub.f32 %v6827_v47, %v11623_v5 }
 0x315   : >> { %8776 = vmatprep.mubr.msk.f32.mxu1 %vm9811_vm3, %v9810_v32  ;;  %8779 = vmatprep.subr.mxu0 %v9810_v32 }
 0x316   : >> { %8770 = vmatmul.mubr.f32.vlgmr.msra.gmra.mxu0 %v11368_v41  ;;  %8777 = vmatmul.mubr.f32.vlgmr.msra.gmra.mxu1 %v11368_v41  ;;  %v6431_v41 = vand.u32 4294901760, %v11584_v1  ;;  %v6478_v29 = vsub.f32 %v11576_v62, %v6477_v23  ;;  %v6939_v48 = vand.u32 4294901760, %v11636_v16 }
 0x317   : >> { %8780 = vmatpush3.msra.mxu0 %v11420_v33  ;;  %8786 = vmatprep.subr.mxu1 %v9810_v32 }
 0x318   : >> { %8781 = vmatprep.subr.mxu0 %v9810_v32  ;;  %8787 = vmatpush3.msra.mxu1 %v5534_v6  ;;  %v6432_v22 = vsub.f32 %v11584_v1, %v6431_v41  ;;  %v6479_v31 = vand.u32 4294901760, %v6478_v29  ;;  %v6940_v25 = vsub.f32 %v11636_v16, %v6939_v48 }
 0x319   : >> { %8782 = vmatpush3.msra.mxu0 %v11426_v17  ;;  %8788 = vmatprep.subr.mxu1 %v9810_v32 }
 0x31a   : >> { %8783 = vmatprep.mubr.msk.f32.mxu0 %vm9811_vm3, %v9810_v32  ;;  %8789 = vmatpush3.msra.mxu1 %v5541_v28  ;;  %v6433_v9 = vand.u32 4294901760, %v6432_v22 }
 0x31b   : >> { %8790 = vmatprep.mubr.msk.f32.mxu1 %vm9811_vm3, %v9810_v32  ;;  %8793 = vmatprep.subr.mxu0 %v9810_v32 }
 0x31c   : >> { %8784 = vmatmul.mubr.f32.vlgmr.msra.gmra.mxu0 %v5495_v40  ;;  %8791 = vmatmul.mubr.f32.vlgmr.msra.gmra.mxu1 %v11435_v12 }
 0x31d   : >> { %8794 = vmatpush3.msra.mxu0 %v11433_v20  ;;  %8800 = vmatprep.subr.mxu1 %v9810_v32 }
 0x31e   : >> { %8795 = vmatprep.subr.mxu0 %v9810_v32  ;;  %8801 = vmatpush3.msra.mxu1 %v11420_v33 }
 0x31f   : >> { %8796 = vmatpush3.msra.mxu0 %v11442_v51  ;;  %8802 = vmatprep.subr.mxu1 %v9810_v32  ;;  %v11645_v51 = vsub.f32 %v6826_v37, %v11629_v53 }
 0x320   : >> { %8797 = vmatprep.mubr.msk.f32.mxu0 %vm9811_vm3, %v9810_v32  ;;  %8803 = vmatpush3.msra.mxu1 %v11426_v17 }
 0x321   : >> { %8804 = vmatprep.mubr.msk.f32.mxu1 %vm9811_vm3, %v9810_v32  ;;  %8807 = vmatprep.subr.mxu0 %v9810_v32  ;;  %v6946_v6 = vand.u32 4294901760, %v11645_v51 }
 0x322   : >> { %8798 = vmatmul.mubr.f32.vlgmr.msra.gmra.mxu0 %v11450_v24  ;;  %8805 = vmatmul.mubr.f32.vlgmr.msra.gmra.mxu1 %v5493_v21 }
 0x323   : >> { %8808 = vmatpush3.msra.mxu0 %v5532_v60  ;;  %8814 = vmatprep.subr.mxu1 %v9810_v32  ;;  %v6947_v11 = vsub.f32 %v11645_v51, %v6946_v6 }
 0x324   : >> { %8809 = vmatprep.subr.mxu0 %v9810_v32  ;;  %8815 = vmatpush3.msra.mxu1 %v11420_v33 }
 0x325   : >> { %8810 = vmatpush3.msra.mxu0 %v5539_v38  ;;  %8816 = vmatprep.subr.mxu1 %v9810_v32  ;;  %v6948_v45 = vand.u32 4294901760, %v6947_v11 }
 0x326   : >> { %8811 = vmatprep.mubr.msk.f32.mxu0 %vm9811_vm3, %v9810_v32  ;;  %8817 = vmatpush3.msra.mxu1 %v11426_v17  ;;  %v11638_v17 = vand.u32 4294901760, %v6829_v52 }
 0x327   : >> { %8818 = vmatprep.mubr.msk.f32.mxu1 %vm9811_vm3, %v9810_v32  ;;  %8821 = vmatprep.subr.mxu0 %v9810_v32 }
 0x328   : >> { %8812 = vmatmul.mubr.f32.vlgmr.msra.gmra.mxu0 %v11435_v12  ;;  %8819 = vmatmul.mubr.f32.vlgmr.msra.gmra.mxu1 %v11435_v12  ;;  %v11653_v21 = vsub.f32 %v6829_v52, %v11638_v17 }
 0x329   : >> { %8822 = vmatpush3.msra.mxu0 %v11487_v26  ;;  %8828 = vmatprep.subr.mxu1 %v9810_v32 }
 0x32a   : >> { %8823 = vmatprep.subr.mxu0 %v9810_v32  ;;  %8829 = vmatpush3.msra.mxu1 %v6003_v3  ;;  %v6900_v59 = vand.u32 4294901760, %v11653_v21 }
 0x32b   : >> { %8824 = vmatpush3.msra.mxu0 %v11493_v54  ;;  %8830 = vmatprep.subr.mxu1 %v9810_v32 }
 0x32c   : >> { %8825 = vmatprep.mubr.msk.f32.mxu0 %vm9811_vm3, %v9810_v32  ;;  %8831 = vmatpush3.msra.mxu1 %v6010_v56 }
 0x32d   : >> { %8832 = vmatprep.mubr.msk.f32.mxu1 %vm9811_vm3, %v9810_v32  ;;  %8835 = vmatprep.subr.mxu0 %v9810_v32 }
 0x32e   : >> { %8826 = vmatmul.mubr.f32.vlgmr.msra.gmra.mxu0 %v5964_v18  ;;  %8833 = vmatmul.mubr.f32.vlgmr.msra.gmra.mxu1 %v11502_v2 }
 0x32f   : >> { %8836 = vmatpush3.msra.mxu0 %v11500_v55  ;;  %8842 = vmatprep.subr.mxu1 %v9810_v32  ;;  %v7296_v55 = vld [vmem:[#allocation6 + $0xd8] sm:$0xff] }
 0x330   : >> { %8837 = vmatprep.subr.mxu0 %v9810_v32  ;;  %8843 = vmatpush3.msra.mxu1 %v11487_v26 }
 0x331   : >> { %8838 = vmatpush3.msra.mxu0 %v11509_v13  ;;  %8844 = vmatprep.subr.mxu1 %v9810_v32  ;;  %v6941_v13 = vand.u32 4294901760, %v6940_v25 }
 0x332   : >> { %8839 = vmatprep.mubr.msk.f32.mxu0 %vm9811_vm3, %v9810_v32  ;;  %8845 = vmatpush3.msra.mxu1 %v11493_v54 }
 0x333   : >> { %8846 = vmatprep.mubr.msk.f32.mxu1 %vm9811_vm3, %v9810_v32  ;;  %8849 = vmatprep.subr.mxu0 %v9810_v32 }
 0x334   : >> { %8840 = vmatmul.mubr.f32.vlgmr.msra.gmra.mxu0 %v11517_v57  ;;  %8847 = vmatmul.mubr.f32.vlgmr.msra.gmra.mxu1 %v5962_v27  ;;  %v8140_v57 = vld [vmem:[%s10898_s28 + $0x2b] sm:$0xff]  ;;  %v11694_v27 = vand.u32 4294901760, %v7296_v55 }
 0x335   : >> { %8850 = vmatpush3.msra.mxu0 %v6001_v19  ;;  %8856 = vmatprep.subr.mxu1 %v9810_v32  ;;  %v6901_v19 = vsub.f32 %v11653_v21, %v6900_v59  ;;  %v7298_v3 = vsel %vm287_vm0, %v8140_v57, 0 }
 0x336   : >> { %8851 = vmatprep.subr.mxu0 %v9810_v32  ;;  %8857 = vmatpush3.msra.mxu1 %v11487_v26  ;;  %v11707_v18 = vsub.f32 %v7296_v55, %v11694_v27 }
 0x337   : >> { %8852 = vmatpush3.msra.mxu0 %v6008_v43  ;;  %8858 = vmatprep.subr.mxu1 %v9810_v32  ;;  %v7295_v43 = vld [vmem:[#allocation6 + $0xd0] sm:$0xff]  ;;  %v6902_v42 = vand.u32 4294901760, %v6901_v19 }
 0x338   : >> { %8853 = vmatprep.mubr.msk.f32.mxu0 %vm9811_vm3, %v9810_v32  ;;  %8859 = vmatpush3.msra.mxu1 %v11493_v54  ;;  %v11700_v30 = vand.u32 4294901760, %v7295_v43 }
 0x339   : >> { %8860 = vmatprep.mubr.msk.f32.mxu1 %vm9811_vm3, %v9810_v32  ;;  %8863 = vmatprep.subr.mxu0 %v9810_v32  ;;  %v1365_v36 = vpop.f32.mrf.mxu1 }
 0x33a   : >> { %8854 = vmatmul.mubr.f32.vlgmr.msra.gmra.mxu0 %v11502_v2  ;;  %8861 = vmatmul.mubr.f32.vlgmr.msra.gmra.mxu1 %v11502_v2 }
 0x33b   : >> { %8864 = vmatpush3.msra.mxu0 %v11554_v14  ;;  %8870 = vmatprep.subr.mxu1 %v9810_v32  ;;  %v8414_v33 = vpop.f32.mrf.mxu1 }
 0x33c   : >> { %8865 = vmatprep.subr.mxu0 %v9810_v32  ;;  %8871 = vmatpush3.msra.mxu1 %v6472_v15 }
 0x33d   : >> { %v1284_v8 = vpop.f32.mrf.mxu0  ;;  %8866 = vmatpush3.msra.mxu0 %v11560_v10  ;;  %8872 = vmatprep.subr.mxu1 %v9810_v32  ;;  %v1516_v12 = vpop.f32.mrf.mxu1 }
 0x33e   : >> { %v1366_v39 = vadd.f32 %v1365_v36, %v1284_v8  ;;  %8867 = vmatprep.mubr.msk.f32.mxu0 %vm9811_vm3, %v9810_v32  ;;  %8873 = vmatpush3.msra.mxu1 %v6479_v31 }
 0x33f   : >> { %v8407_v20 = vpop.f32.mrf.mxu0  ;;  %8874 = vmatprep.mubr.msk.f32.mxu1 %vm9811_vm3, %v9810_v32  ;;  %8877 = vmatprep.subr.mxu0 %v9810_v32  ;;  %v8428_v38 = vpop.f32.mrf.mxu1 }
 0x340   : >> { %8868 = vmatmul.mubr.f32.vlgmr.msra.gmra.mxu0 %v6433_v9  ;;  %8875 = vmatmul.mubr.f32.vlgmr.msra.gmra.mxu1 %v11569_v49 }
 0x341   : >> { %v1441_v60 = vpop.f32.mrf.mxu0  ;;  %8878 = vmatpush3.msra.mxu0 %v11567_v63  ;;  %8884 = vmatprep.subr.mxu1 %v9810_v32  ;;  %v11716_v63 = vsub.f32 %v7295_v43, %v11700_v30 }
 0x342   : >> { %v1442_v24 = vadd.f32 %v1441_v60, %v1366_v39  ;;  %8879 = vmatprep.subr.mxu0 %v9810_v32  ;;  %8885 = vmatpush3.msra.mxu1 %v11554_v14 }
 0x343   : >> { %v8421_v4 = vpop.f32.mrf.mxu0  ;;  %8880 = vmatpush3.msra.mxu0 %v11576_v62  ;;  %8886 = vmatprep.subr.mxu1 %v9810_v32  ;;  %v7415_v47 = vand.u32 4294901760, %v11716_v63 }
 0x344   : >> { %v1517_v35 = vadd.f32 %v1516_v12, %v1442_v24  ;;  %8881 = vmatprep.mubr.msk.f32.mxu0 %vm9811_vm3, %v9810_v32  ;;  %8887 = vmatpush3.msra.mxu1 %v11560_v10 }
 0x345   : >> { %8888 = vmatprep.mubr.msk.f32.mxu1 %vm9811_vm3, %v9810_v32  ;;  %8891 = vmatprep.subr.mxu0 %v9810_v32  ;;  %v7416_v36 = vsub.f32 %v11716_v63, %v7415_v47 }
 0x346   : >> { %8882 = vmatmul.mubr.f32.vlgmr.msra.gmra.mxu0 %v11584_v1  ;;  %8889 = vmatmul.mubr.f32.vlgmr.msra.gmra.mxu1 %v6431_v41  ;;  %v1593_v50 = vpop.f32.mrf.mxu0  ;;  %v1666_v28 = vpop.f32.mrf.mxu1  ;;  %v7408_v1 = vand.u32 4294901760, %v11707_v18 }
 0x347   : >> { %8892 = vmatpush3.msra.mxu0 %v6470_v0  ;;  %8898 = vmatprep.subr.mxu1 %v9810_v32  ;;  %v1594_v26 = vadd.f32 %v1593_v50, %v1517_v35  ;;  %v7417_v39 = vand.u32 4294901760, %v7416_v36 }
 0x348   : >> { %8893 = vmatprep.subr.mxu0 %v9810_v32  ;;  %8899 = vmatpush3.msra.mxu1 %v11554_v14  ;;  %v8435_v40 = vpop.f32.mrf.mxu0  ;;  %v8442_v54 = vpop.f32.mrf.mxu1  ;;  %v7409_v15 = vsub.f32 %v11707_v18, %v7408_v1 }
 0x349   : >> { %8894 = vmatpush3.msra.mxu0 %v6477_v23  ;;  %8900 = vmatprep.subr.mxu1 %v9810_v32  ;;  %v1667_v2 = vadd.f32 %v1666_v28, %v1594_v26 }
 0x34a   : >> { %8895 = vmatprep.mubr.msk.f32.mxu0 %vm9811_vm3, %v9810_v32  ;;  %8901 = vmatpush3.msra.mxu1 %v11560_v10  ;;  %v11709_v10 = vand.u32 4294901760, %v7298_v3  ;;  %v7410_v33 = vand.u32 4294901760, %v7409_v15 }
 0x34b   : >> { %8902 = vmatprep.mubr.msk.f32.mxu1 %vm9811_vm3, %v9810_v32  ;;  %8905 = vmatprep.subr.mxu0 %v9810_v32 }
 0x34c   : >> { %8896 = vmatmul.mubr.f32.vlgmr.msra.gmra.mxu0 %v11569_v49  ;;  %8903 = vmatmul.mubr.f32.vlgmr.msra.gmra.mxu1 %v11569_v49  ;;  %v1746_v34 = vpop.f32.mrf.mxu0  ;;  %v1827_v7 = vpop.f32.mrf.mxu1  ;;  %v11724_v23 = vsub.f32 %v7298_v3, %v11709_v10 }
 0x34d   : >> { %8906 = vmatpush3.msra.mxu0 %v11623_v5  ;;  %8912 = vmatprep.subr.mxu1 %v9810_v32  ;;  %v1747_v44 = vadd.f32 %v1746_v34, %v1667_v2 }
 0x34e   : >> { %8907 = vmatprep.subr.mxu0 %v9810_v32  ;;  %8913 = vmatpush3.msra.mxu1 %v6941_v13  ;;  %v8449_v56 = vpop.f32.mrf.mxu0  ;;  %v8456_v14 = vpop.f32.mrf.mxu1  ;;  %v7369_v22 = vand.u32 4294901760, %v11724_v23 }
 0x34f   : >> { %8908 = vmatpush3.msra.mxu0 %v11629_v53  ;;  %8914 = vmatprep.subr.mxu1 %v9810_v32  ;;  %v1828_v58 = vadd.f32 %v1827_v7, %v1747_v44 }
 0x350   : >> { %8909 = vmatprep.mubr.msk.f32.mxu0 %vm9811_vm3, %v9810_v32  ;;  %8915 = vmatpush3.msra.mxu1 %v6948_v45 }
 0x351   : >> { %8916 = vmatprep.mubr.msk.f32.mxu1 %vm9811_vm3, %v9810_v32  ;;  %8919 = vmatprep.subr.mxu0 %v9810_v32 }
 0x352   : >> { %8910 = vmatmul.mubr.f32.vlgmr.msra.gmra.mxu0 %v6902_v42  ;;  %8917 = vmatmul.mubr.f32.vlgmr.msra.gmra.mxu1 %v11638_v17  ;;  %v1903_v49 = vpop.f32.mrf.mxu0  ;;  %v1978_v62 = vpop.f32.mrf.mxu1 }
 0x353   : >> { %8920 = vmatpush3.msra.mxu0 %v11636_v16  ;;  %8926 = vmatprep.subr.mxu1 %v9810_v32  ;;  %v1904_v0 = vadd.f32 %v1903_v49, %v1828_v58 }
 0x354   : >> { %8921 = vmatprep.subr.mxu0 %v9810_v32  ;;  %8927 = vmatpush3.msra.mxu1 %v11623_v5  ;;  %v8463_v61 = vpop.f32.mrf.mxu0  ;;  %v8470_v41 = vpop.f32.mrf.mxu1 }
 0x355   : >> { %8922 = vmatpush3.msra.mxu0 %v11645_v51  ;;  %8928 = vmatprep.subr.mxu1 %v9810_v32  ;;  %v1979_v29 = vadd.f32 %v1978_v62, %v1904_v0 }
 0x356   : >> { %8923 = vmatprep.mubr.msk.f32.mxu0 %vm9811_vm3, %v9810_v32  ;;  %8929 = vmatpush3.msra.mxu1 %v11629_v53 }
 0x357   : >> { %8930 = vmatprep.mubr.msk.f32.mxu1 %vm9811_vm3, %v9810_v32  ;;  %8933 = vmatprep.subr.mxu0 %v9810_v32 }
 0x358   : >> { %8924 = vmatmul.mubr.f32.vlgmr.msra.gmra.mxu0 %v11653_v21  ;;  %8931 = vmatmul.mubr.f32.vlgmr.msra.gmra.mxu1 %v6900_v59  ;;  %v2055_v46 = vpop.f32.mrf.mxu0  ;;  %v2128_v37 = vpop.f32.mrf.mxu1 }
 0x359   : >> { %8934 = vmatpush3.msra.mxu0 %v6939_v48  ;;  %8940 = vmatprep.subr.mxu1 %v9810_v32  ;;  %v2056_v31 = vadd.f32 %v2055_v46, %v1979_v29 }
 0x35a   : >> { %8935 = vmatprep.subr.mxu0 %v9810_v32  ;;  %8941 = vmatpush3.msra.mxu1 %v11623_v5  ;;  %v8477_v52 = vpop.f32.mrf.mxu0  ;;  %v8484_v9 = vpop.f32.mrf.mxu1  ;;  %v7370_v5 = vsub.f32 %v11724_v23, %v7369_v22 }
 0x35b   : >> { %8936 = vmatpush3.msra.mxu0 %v6946_v6  ;;  %8942 = vmatprep.subr.mxu1 %v9810_v32  ;;  %v2129_v8 = vadd.f32 %v2128_v37, %v2056_v31 }
 0x35c   : >> { %8937 = vmatprep.mubr.msk.f32.mxu0 %vm9811_vm3, %v9810_v32  ;;  %8943 = vmatpush3.msra.mxu1 %v11629_v53  ;;  %v7371_v12 = vand.u32 4294901760, %v7370_v5 }
 0x35d   : >> { %8944 = vmatprep.mubr.msk.f32.mxu1 %vm9811_vm3, %v9810_v32  ;;  %8947 = vmatprep.subr.mxu0 %v9810_v32 }
 0x35e   : >> { %8938 = vmatmul.mubr.f32.vlgmr.msra.gmra.mxu0 %v11638_v17  ;;  %8945 = vmatmul.mubr.f32.vlgmr.msra.gmra.mxu1 %v11638_v17  ;;  %v2214_v16 = vpop.f32.mrf.mxu0  ;;  %v2295_v20 = vpop.f32.mrf.mxu1 }
 0x35f   : >> { %8948 = vmatpush3.msra.mxu0 %v11694_v27  ;;  %8954 = vmatprep.subr.mxu1 %v9810_v32  ;;  %v2296_v53 = vadd.f32 %v2295_v20, %v2214_v16 }
 0x360   : >> { %8949 = vmatprep.subr.mxu0 %v9810_v32  ;;  %8955 = vmatpush3.msra.mxu1 %v7410_v33  ;;  %v8491_v51 = vpop.f32.mrf.mxu0  ;;  %v8498_v60 = vpop.f32.mrf.mxu1 }
 0x361   : >> { %8950 = vmatpush3.msra.mxu0 %v11700_v30  ;;  %8956 = vmatprep.subr.mxu1 %v9810_v32 }
 0x362   : >> { %8951 = vmatprep.mubr.msk.f32.mxu0 %vm9811_vm3, %v9810_v32  ;;  %8957 = vmatpush3.msra.mxu1 %v7417_v39 }
 0x363   : >> { %8958 = vmatprep.mubr.msk.f32.mxu1 %vm9811_vm3, %v9810_v32  ;;  %8961 = vmatprep.subr.mxu0 %v9810_v32 }
 0x364   : >> { %8952 = vmatmul.mubr.f32.vlgmr.msra.gmra.mxu0 %v7371_v12  ;;  %8959 = vmatmul.mubr.f32.vlgmr.msra.gmra.mxu1 %v11709_v10  ;;  %v2371_v17 = vpop.f32.mrf.mxu0  ;;  %v2446_v24 = vpop.f32.mrf.mxu1 }
 0x365   : >> { %8962 = vmatpush3.msra.mxu0 %v11707_v18  ;;  %8968 = vmatprep.subr.mxu1 %v9810_v32  ;;  %v2372_v38 = vadd.f32 %v2371_v17, %v2296_v53 }
 0x366   : >> { %8963 = vmatprep.subr.mxu0 %v9810_v32  ;;  %8969 = vmatpush3.msra.mxu1 %v11694_v27  ;;  %v8505_v48 = vpop.f32.mrf.mxu0  ;;  %v8512_v21 = vpop.f32.mrf.mxu1 }
 0x367   : >> { %8964 = vmatpush3.msra.mxu0 %v11716_v63  ;;  %8970 = vmatprep.subr.mxu1 %v9810_v32  ;;  %v2447_v4 = vadd.f32 %v2446_v24, %v2372_v38 }
 0x368   : >> { %8965 = vmatprep.mubr.msk.f32.mxu0 %vm9811_vm3, %v9810_v32  ;;  %8971 = vmatpush3.msra.mxu1 %v11700_v30 }
 0x369   : >> { %8972 = vmatprep.mubr.msk.f32.mxu1 %vm9811_vm3, %v9810_v32  ;;  %8975 = vmatprep.subr.mxu0 %v9810_v32 }
 0x36a   : >> { %8966 = vmatmul.mubr.f32.vlgmr.msra.gmra.mxu0 %v11724_v23  ;;  %8973 = vmatmul.mubr.f32.vlgmr.msra.gmra.mxu1 %v7369_v22  ;;  %v2523_v35 = vpop.f32.mrf.mxu0  ;;  %v2596_v6 = vpop.f32.mrf.mxu1 }
 0x36b   : >> { %8976 = vmatpush3.msra.mxu0 %v7408_v1  ;;  %8982 = vmatprep.subr.mxu1 %v9810_v32  ;;  %v2524_v25 = vadd.f32 %v2523_v35, %v2447_v4 }
 0x36c   : >> { %8977 = vmatprep.subr.mxu0 %v9810_v32  ;;  %8983 = vmatpush3.msra.mxu1 %v11694_v27  ;;  %v8519_v59 = vpop.f32.mrf.mxu0  ;;  %v8526_v50 = vpop.f32.mrf.mxu1 }
 0x36d   : >> { %8978 = vmatpush3.msra.mxu0 %v7415_v47  ;;  %8984 = vmatprep.subr.mxu1 %v9810_v32  ;;  %v2597_v28 = vadd.f32 %v2596_v6, %v2524_v25 }
 0x36e   : >> { %8979 = vmatprep.mubr.msk.f32.mxu0 %vm9811_vm3, %v9810_v32  ;;  %8985 = vmatpush3.msra.mxu1 %v11700_v30 }
 0x36f   : >> { %8986 = vmatprep.mubr.msk.f32.mxu1 %vm9811_vm3, %v9810_v32  ;;  %8980 = vmatmul.mubr.f32.vlgmr.msra.gmra.mxu0 %v11709_v10  ;;  %v2600_v26 = vadd.f32 %v2597_v28, %v2129_v8 }
 0x370   : >> { %8987 = vmatmul.mubr.f32.vlgmr.msra.gmra.mxu1 %v11709_v10  ;;  %v2683_v11 = vpop.f32.mrf.mxu0  ;;  %v2764_v40 = vpop.f32.mrf.mxu1 }
 0x371   : >> { %v2765_v54 = vadd.f32 %v2764_v40, %v2683_v11 }
 0x372   : >> { %v8533_v55 = vpop.f32.mrf.mxu0  ;;  %v8540_v2 = vpop.f32.mrf.mxu1 }
 0x376   : >> { %v2840_v13 = vpop.f32.mrf.mxu0  ;;  %v2915_v19 = vpop.f32.mrf.mxu1 }
 0x377   : >> { %v2841_v57 = vadd.f32 %v2840_v13, %v2765_v54 }
 0x378   : >> { %v8547_v43 = vpop.f32.mrf.mxu0  ;;  %v8554_v45 = vpop.f32.mrf.mxu1 }
 0x379   : >> { %v2916_v27 = vadd.f32 %v2915_v19, %v2841_v57 }
 0x37c   : >> { %v2992_v34 = vpop.f32.mrf.mxu0  ;;  %v3065_v7 = vpop.f32.mrf.mxu1 }
 0x37d   : >> { %v2993_v3 = vadd.f32 %v2992_v34, %v2916_v27 }
 0x37e   : >> { %v8561_v32 = vpop.f32.mrf.mxu0  ;;  %v8568_v44 = vpop.f32.mrf.mxu1 }
 0x37f   : >> { %v3066_v42 = vadd.f32 %v3065_v7, %v2993_v3 }
 0x381   : >> { %v3069_v30 = vadd.f32 %v3066_v42, %v2600_v26 }
 0x382   : >> { %v3152_v56 = vpop.f32.mrf.mxu0  ;;  %v3233_v14 = vpop.f32.mrf.mxu1 }
 0x383   : >> { %v3234_v58 = vadd.f32 %v3233_v14, %v3152_v56 }
 0x384   : >> { %v8575_v18 = vpop.f32.mrf.mxu0  ;;  %v8582_v10 = vpop.f32.mrf.mxu1 }
 0x388   : >> { %v3309_v63 = vpop.f32.mrf.mxu0  ;;  %v3384_v49 = vpop.f32.mrf.mxu1 }
 0x389   : >> { %v3310_v62 = vadd.f32 %v3309_v63, %v3234_v58 }
 0x38a   : >> { %v8589_v0 = vpop.f32.mrf.mxu0  ;;  %v8596_v1 = vpop.f32.mrf.mxu1 }
 0x38b   : >> { %v3385_v23 = vadd.f32 %v3384_v49, %v3310_v62 }
 0x38e   : >> { %v3461_v61 = vpop.f32.mrf.mxu0  ;;  %v3534_v41 = vpop.f32.mrf.mxu1 }
 0x38f   : >> { %v3462_v29 = vadd.f32 %v3461_v61, %v3385_v23 }
 0x390   : >> { %v8603_v47 = vpop.f32.mrf.mxu0  ;;  %v8610_v15 = vpop.f32.mrf.mxu1 }
 0x391   : >> { %v3535_v22 = vadd.f32 %v3534_v41, %v3462_v29 }
 0x393   : >> { %v3538_v46 = vadd.f32 %v3535_v22, %v3069_v30 }
 0x394   : >> { %v3621_v37 = vpop.f32.mrf.mxu0  ;;  %v3702_v31 = vpop.f32.mrf.mxu1 }
 0x395   : >> { %v3703_v36 = vadd.f32 %v3702_v31, %v3621_v37 }
 0x396   : >> { %v8617_v52 = vpop.f32.mrf.mxu0  ;;  %v8624_v9 = vpop.f32.mrf.mxu1 }
 0x39a   : >> { %v3778_v8 = vpop.f32.mrf.mxu0  ;;  %v3853_v33 = vpop.f32.mrf.mxu1 }
 0x39b   : >> { %v3779_v5 = vadd.f32 %v3778_v8, %v3703_v36 }
 0x39c   : >> { %v8631_v39 = vpop.f32.mrf.mxu0  ;;  %v8638_v16 = vpop.f32.mrf.mxu1 }
 0x39d   : >> { %v3854_v20 = vadd.f32 %v3853_v33, %v3779_v5 }
 0x3a0   : >> { %v3930_v53 = vpop.f32.mrf.mxu0  ;;  %v4003_v12 = vpop.f32.mrf.mxu1 }
 0x3a1   : >> { %v3931_v51 = vadd.f32 %v3930_v53, %v3854_v20 }
 0x3a2   : >> { %v8645_v60 = vpop.f32.mrf.mxu0  ;;  %v8652_v17 = vpop.f32.mrf.mxu1 }
 0x3a3   : >> { %v4004_v24 = vadd.f32 %v4003_v12, %v3931_v51 }
 0x3a5   : >> { %v4007_v38 = vadd.f32 %v4004_v24, %v3538_v46 }
 0x3a6   : >> { %v4090_v48 = vpop.f32.mrf.mxu0  ;;  %v4171_v21 = vpop.f32.mrf.mxu1 }
 0x3a7   : >> { %v4172_v4 = vadd.f32 %v4171_v21, %v4090_v48 }
 0x3a8   : >> { %v8659_v35 = vpop.f32.mrf.mxu0  ;;  %v8666_v6 = vpop.f32.mrf.mxu1 }
 0x3ac   : >> { %v4247_v25 = vpop.f32.mrf.mxu0  ;;  %v4322_v59 = vpop.f32.mrf.mxu1 }
 0x3ad   : >> { %v4248_v50 = vadd.f32 %v4247_v25, %v4172_v4 }
 0x3ae   : >> { %v8673_v28 = vpop.f32.mrf.mxu0  ;;  %v8680_v26 = vpop.f32.mrf.mxu1 }
 0x3af   : >> { %v4323_v11 = vadd.f32 %v4322_v59, %v4248_v50 }
 0x3b2   : >> { %v4399_v40 = vpop.f32.mrf.mxu0  ;;  %v4472_v54 = vpop.f32.mrf.mxu1 }
 0x3b3   : >> { %v4400_v55 = vadd.f32 %v4399_v40, %v4323_v11 }
 0x3b4   : >> { %v8687_v2 = vpop.f32.mrf.mxu0  ;;  %v8694_v13 = vpop.f32.mrf.mxu1 }
 0x3b5   : >> { %v4473_v19 = vadd.f32 %v4472_v54, %v4400_v55 }
 0x3b7   : >> { %v4476_v57 = vadd.f32 %v4473_v19, %v4007_v38 }
 0x3b8   : >> { %v4559_v43 = vpop.f32.mrf.mxu0  ;;  %v4640_v45 = vpop.f32.mrf.mxu1 }
 0x3b9   : >> { %v4641_v27 = vadd.f32 %v4640_v45, %v4559_v43 }
 0x3ba   : >> { %v8701_v34 = vpop.f32.mrf.mxu0  ;;  %v8708_v7 = vpop.f32.mrf.mxu1 }
 0x3be   : >> { %v4716_v3 = vpop.f32.mrf.mxu0  ;;  %v4791_v32 = vpop.f32.mrf.mxu1 }
 0x3bf   : >> { %v4717_v44 = vadd.f32 %v4716_v3, %v4641_v27 }
 0x3c0   : >> { %v8715_v42 = vpop.f32.mrf.mxu0  ;;  %v8722_v30 = vpop.f32.mrf.mxu1 }
 0x3c1   : >> { %v4792_v56 = vadd.f32 %v4791_v32, %v4717_v44 }
 0x3c4   : >> { %v4868_v14 = vpop.f32.mrf.mxu0  ;;  %v4941_v58 = vpop.f32.mrf.mxu1 }
 0x3c5   : >> { %v4869_v18 = vadd.f32 %v4868_v14, %v4792_v56 }
 0x3c6   : >> { %v8729_v10 = vpop.f32.mrf.mxu0  ;;  %v8736_v63 = vpop.f32.mrf.mxu1 }
 0x3c7   : >> { %v4942_v49 = vadd.f32 %v4941_v58, %v4869_v18 }
 0x3c9   : >> { %v4945_v62 = vadd.f32 %v4942_v49, %v4476_v57 }
 0x3ca   : >> { %v5028_v0 = vpop.f32.mrf.mxu0  ;;  %v5109_v1 = vpop.f32.mrf.mxu1 }
 0x3cb   : >> { %v5110_v23 = vadd.f32 %v5109_v1, %v5028_v0 }
 0x3cc   : >> { %v8743_v61 = vpop.f32.mrf.mxu0  ;;  %v8750_v41 = vpop.f32.mrf.mxu1 }
 0x3d0   : >> { %v5185_v29 = vpop.f32.mrf.mxu0  ;;  %v5260_v47 = vpop.f32.mrf.mxu1 }
 0x3d1   : >> { %v5186_v15 = vadd.f32 %v5185_v29, %v5110_v23 }
 0x3d2   : >> { %v8757_v22 = vpop.f32.mrf.mxu0  ;;  %v8764_v46 = vpop.f32.mrf.mxu1 }
 0x3d3   : >> { %v5261_v37 = vadd.f32 %v5260_v47, %v5186_v15 }
 0x3d6   : >> { %v5337_v31 = vpop.f32.mrf.mxu0  ;;  %v5410_v36 = vpop.f32.mrf.mxu1 }
 0x3d7   : >> { %v5338_v52 = vadd.f32 %v5337_v31, %v5261_v37 }
 0x3d8   : >> { %v8771_v9 = vpop.f32.mrf.mxu0  ;;  %v8778_v8 = vpop.f32.mrf.mxu1 }
 0x3d9   : >> { %v5411_v33 = vadd.f32 %v5410_v36, %v5338_v52 }
 0x3db   : >> { %v5414_v5 = vadd.f32 %v5411_v33, %v4945_v62 }
 0x3dc   : >> { %v5497_v39 = vpop.f32.mrf.mxu0  ;;  %v5578_v16 = vpop.f32.mrf.mxu1 }
 0x3dd   : >> { %v5579_v20 = vadd.f32 %v5578_v16, %v5497_v39 }
 0x3de   : >> { %v8785_v53 = vpop.f32.mrf.mxu0  ;;  %v8792_v12 = vpop.f32.mrf.mxu1 }
 0x3e2   : >> { %v5654_v51 = vpop.f32.mrf.mxu0  ;;  %v5729_v60 = vpop.f32.mrf.mxu1 }
 0x3e3   : >> { %v5655_v17 = vadd.f32 %v5654_v51, %v5579_v20 }
 0x3e4   : >> { %v8799_v24 = vpop.f32.mrf.mxu0  ;;  %v8806_v38 = vpop.f32.mrf.mxu1 }
 0x3e5   : >> { %v5730_v48 = vadd.f32 %v5729_v60, %v5655_v17 }
 0x3e8   : >> { %v5806_v21 = vpop.f32.mrf.mxu0  ;;  %v5879_v4 = vpop.f32.mrf.mxu1 }
 0x3e9   : >> { %v5807_v35 = vadd.f32 %v5806_v21, %v5730_v48 }
 0x3ea   : >> { %v8813_v6 = vpop.f32.mrf.mxu0  ;;  %v8820_v25 = vpop.f32.mrf.mxu1 }
 0x3eb   : >> { %v5880_v59 = vadd.f32 %v5879_v4, %v5807_v35 }
 0x3ed   : >> { %v5883_v50 = vadd.f32 %v5880_v59, %v5414_v5 }
 0x3ee   : >> { %v5966_v28 = vpop.f32.mrf.mxu0  ;;  %v6047_v26 = vpop.f32.mrf.mxu1 }
 0x3ef   : >> { %v6048_v41 = vadd.f32 %v6047_v26, %v5966_v28 }
 0x3f0   : >> { %v8827_v11 = vpop.f32.mrf.mxu0  ;;  %v8834_v40 = vpop.f32.mrf.mxu1 }
 0x3f4   : >> { %v6123_v54 = vpop.f32.mrf.mxu0  ;;  %v6198_v55 = vpop.f32.mrf.mxu1 }
 0x3f5   : >> { %v6124_v29 = vadd.f32 %v6123_v54, %v6048_v41 }
 0x3f6   : >> { %v8841_v2 = vpop.f32.mrf.mxu0  ;;  %v8848_v13 = vpop.f32.mrf.mxu1 }
 0x3f7   : >> { %v6199_v52 = vadd.f32 %v6198_v55, %v6124_v29 }
 0x3fa   : >> { %v6275_v19 = vpop.f32.mrf.mxu0  ;;  %v6348_v57 = vpop.f32.mrf.mxu1 }
 0x3fb   : >> { %v6276_v39 = vadd.f32 %v6275_v19, %v6199_v52 }
 0x3fc   : >> { %v8855_v43 = vpop.f32.mrf.mxu0  ;;  %v8862_v45 = vpop.f32.mrf.mxu1 }
 0x3fd   : >> { %v6349_v60 = vadd.f32 %v6348_v57, %v6276_v39 }
 0x3ff   : >> { %v6352_v25 = vadd.f32 %v6349_v60, %v5883_v50  ;;  %v7767_v50 = vld [vmem:[%s11804_s29] sm:$0xff] }
 0x400   : >> { %v6435_v27 = vpop.f32.mrf.mxu0  ;;  %v6516_v34 = vpop.f32.mrf.mxu1 }
 0x401   : >> { %v6517_v47 = vadd.f32 %v6516_v34, %v6435_v27  ;;  %v7768_v27 = vld [vmem:[%s11804_s29 + $0x10] sm:$0xff]  ;;  %v7769_v34 = vld [vmem:[%s11804_s29 + $0x20] sm:$0xff] }
 0x402   : >> { %v8869_v7 = vpop.f32.mrf.mxu0  ;;  %v8876_v3 = vpop.f32.mrf.mxu1 }
 0x403   : >> { %v7770_v7 = vld [vmem:[%s11804_s29 + $0x30] sm:$0xff]  ;;  %v7771_v3 = vld [vmem:[%s11804_s29 + $0x40] sm:$0xff] }
 0x406   : >> { %v6592_v32 = vpop.f32.mrf.mxu0  ;;  %v6667_v44 = vpop.f32.mrf.mxu1 }
 0x407   : >> { %v6593_v46 = vadd.f32 %v6592_v32, %v6517_v47  ;;  %v7772_v32 = vld [vmem:[%s11804_s29 + $0x50] sm:$0xff] }
 0x408   : >> { %v8883_v42 = vpop.f32.mrf.mxu0  ;;  %v8890_v30 = vpop.f32.mrf.mxu1 }
 0x409   : >> { %v6668_v8 = vadd.f32 %v6667_v44, %v6593_v46  ;;  %v7773_v44 = vld [vmem:[%s11804_s29 + $0x60] sm:$0xff]  ;;  %v7774_v42 = vld [vmem:[%s11804_s29 + $0x70] sm:$0xff] }
 0x40a   : >> { %v7775_v30 = vld [vmem:[%s11804_s29 + $0x80] sm:$0xff] }
 0x40c   : >> { %v6744_v56 = vpop.f32.mrf.mxu0  ;;  %v6817_v14 = vpop.f32.mrf.mxu1 }
 0x40d   : >> { %v6745_v12 = vadd.f32 %v6744_v56, %v6668_v8  ;;  %v7776_v56 = vld [vmem:[%s11804_s29 + $0x90] sm:$0xff] }
 0x40e   : >> { %v8897_v58 = vpop.f32.mrf.mxu0  ;;  %v8904_v18 = vpop.f32.mrf.mxu1 }
 0x40f   : >> { %v6818_v21 = vadd.f32 %v6817_v14, %v6745_v12  ;;  %v7777_v58 = vld [vmem:[%s11804_s29 + $0xa0] sm:$0xff]  ;;  %v7778_v18 = vld [vmem:[%s11804_s29 + $0xb0] sm:$0xff] }
 0x411   : >> { %v6821_v26 = vadd.f32 %v6818_v21, %v6352_v25 }
 0x412   : >> { %v6904_v10 = vpop.f32.mrf.mxu0  ;;  %v6985_v63 = vpop.f32.mrf.mxu1 }
 0x413   : >> { %v6986_v37 = vadd.f32 %v6985_v63, %v6904_v10  ;;  %v7779_v10 = vld [vmem:[%s11804_s29 + $0xc0] sm:$0xff]  ;;  %v7780_v63 = vld [vmem:[%s11804_s29 + $0xd0] sm:$0xff] }
 0x414   : >> { %v8911_v49 = vpop.f32.mrf.mxu0  ;;  %v8918_v62 = vpop.f32.mrf.mxu1 }
 0x415   : >> { %v7781_v49 = vld [vmem:[%s11804_s29 + $0xe0] sm:$0xff]  ;;  %v7782_v62 = vld [vmem:[%s11804_s29 + $0xf0] sm:$0xff] }
 0x418   : >> { %v7061_v0 = vpop.f32.mrf.mxu0  ;;  %v7136_v1 = vpop.f32.mrf.mxu1 }
 0x419   : >> { %v7062_v9 = vadd.f32 %v7061_v0, %v6986_v37 }
 0x41a   : >> { %v8925_v23 = vpop.f32.mrf.mxu0  ;;  %v8932_v61 = vpop.f32.mrf.mxu1 }
 0x41b   : >> { %v7137_v16 = vadd.f32 %v7136_v1, %v7062_v9 }
 0x41e   : >> { %v7213_v15 = vpop.f32.mrf.mxu0  ;;  %v7286_v22 = vpop.f32.mrf.mxu1 }
 0x41f   : >> { %v7214_v17 = vadd.f32 %v7213_v15, %v7137_v16 }
 0x420   : >> { %v8939_v31 = vpop.f32.mrf.mxu0  ;;  %v8946_v36 = vpop.f32.mrf.mxu1 }
 0x421   : >> { %v7287_v59 = vadd.f32 %v7286_v22, %v7214_v17 }
 0x423   : >> { %v7290_v55 = vadd.f32 %v7287_v59, %v6821_v26 }
 0x424   : >> { %v7373_v33 = vpop.f32.mrf.mxu0  ;;  %v7454_v5 = vpop.f32.mrf.mxu1 }
 0x425   : >> { %v7455_v51 = vadd.f32 %v7454_v5, %v7373_v33 }
 0x426   : >> { %v8953_v20 = vpop.f32.mrf.mxu0  ;;  %v8960_v53 = vpop.f32.mrf.mxu1 }
 0x42a   : >> { %v7530_v24 = vpop.f32.mrf.mxu0  ;;  %v7605_v38 = vpop.f32.mrf.mxu1 }
 0x42b   : >> { %v7531_v48 = vadd.f32 %v7530_v24, %v7455_v51 }
 0x42c   : >> { %v8967_v4 = vpop.f32.mrf.mxu0  ;;  %v8974_v35 = vpop.f32.mrf.mxu1 }
 0x42d   : >> { %v7606_v6 = vadd.f32 %v7605_v38, %v7531_v48 }
 0x42f   : >> { %v7682_v28 = vpop.f32.mrf.mxu0 }
 0x430   : >> { %v7683_v11 = vadd.f32 %v7682_v28, %v7606_v6  ;;  %v7755_v40 = vpop.f32.mrf.mxu1 }
 0x431   : >> { %v8981_v54 = vpop.f32.mrf.mxu0 }
 0x432   : >> { %v7756_v2 = vadd.f32 %v7755_v40, %v7683_v11  ;;  %v8988_v13 = vpop.f32.mrf.mxu1 }
 0x434   : >> { %v7759_v19 = vadd.f32 %v7756_v2, %v7290_v55 }
 0x436   : >> { %v8141_v57 = vmul.f32 -1.442695, %v7759_v19 }
 0x438   : >> { %9397 = vpow2.f32 %v8141_v57 }
 0x445   : >> { %v9398_v43 = vpop.eup %9397 }
 0x446   : >> { %v7763_v45 = vadd.f32 1.0, %v9398_v43 }
 0x448   : >> { %9399 = vrcp.f32 %v7763_v45 }
 0x455   : >> { %v9400_v14 = vpop.eup %9399 }
 0x456   : >> { %v7783_v0 = vmul.f32 %v9400_v14, %v7767_v50  ;;  %v7784_v1 = vmul.f32 %v9400_v14, %v7768_v27  ;;  %v7785_v23 = vmul.f32 %v9400_v14, %v7769_v34  ;;  %v7786_v61 = vmul.f32 %v9400_v14, %v7770_v7 }
 0x457   : >> { %v7787_v41 = vmul.f32 %v9400_v14, %v7771_v3  ;;  %v7788_v29 = vmul.f32 %v9400_v14, %v7772_v32  ;;  %v7789_v47 = vmul.f32 %v9400_v14, %v7773_v44  ;;  %v7790_v15 = vmul.f32 %v9400_v14, %v7774_v42 }
 0x458   : >> { %v7791_v22 = vmul.f32 %v9400_v14, %v7775_v30  ;;  %v7792_v46 = vmul.f32 %v9400_v14, %v7776_v56  ;;  %v7793_v37 = vmul.f32 %v9400_v14, %v7777_v58  ;;  %v7794_v31 = vmul.f32 %v9400_v14, %v7778_v18  ;;  %7799 = vst.msk [vmem:[%s11804_s29] sm:$0xff] %vm287_vm0, %v7783_v0 }
 0x459   : >> { %7800 = vst.msk [vmem:[%s11804_s29 + $0x10] sm:$0xff] %vm287_vm0, %v7784_v1  ;;  %7801 = vst.msk [vmem:[%s11804_s29 + $0x20] sm:$0xff] %vm287_vm0, %v7785_v23  ;;  %v7795_v36 = vmul.f32 %v9400_v14, %v7779_v10  ;;  %v7796_v52 = vmul.f32 %v9400_v14, %v7780_v63  ;;  %v7797_v9 = vmul.f32 %v9400_v14, %v7781_v49 }
 0x45a   : >> { %7802 = vst.msk [vmem:[%s11804_s29 + $0x30] sm:$0xff] %vm287_vm0, %v7786_v61  ;;  %v7798_v8 = vmul.f32 %v9400_v14, %v7782_v62  ;;  %7803 = vst.msk [vmem:[%s11804_s29 + $0x40] sm:$0xff] %vm287_vm0, %v7787_v41 }
 0x45b   : >> { %7804 = vst.msk [vmem:[%s11804_s29 + $0x50] sm:$0xff] %vm287_vm0, %v7788_v29  ;;  %7805 = vst.msk [vmem:[%s11804_s29 + $0x60] sm:$0xff] %vm287_vm0, %v7789_v47 }
 0x45c   : >> { %7806 = vst.msk [vmem:[%s11804_s29 + $0x70] sm:$0xff] %vm287_vm0, %v7790_v15  ;;  %7807 = vst.msk [vmem:[%s11804_s29 + $0x80] sm:$0xff] %vm287_vm0, %v7791_v22  ;;  %1193 = sbr.rel (!%p1191_p7) target bundleno = 619 (0x26b), region = 161 }
 0x45d   : >> { %7808 = vst.msk [vmem:[%s11804_s29 + $0x90] sm:$0xff] %vm287_vm0, %v7792_v46  ;;  %7809 = vst.msk [vmem:[%s11804_s29 + $0xa0] sm:$0xff] %vm287_vm0, %v7793_v37 }
 0x45e   : >> { %7810 = vst.msk [vmem:[%s11804_s29 + $0xb0] sm:$0xff] %vm287_vm0, %v7794_v31  ;;  %7811 = vst.msk [vmem:[%s11804_s29 + $0xc0] sm:$0xff] %vm287_vm0, %v7795_v36 }
 0x45f   : >> { %7812 = vst.msk [vmem:[%s11804_s29 + $0xd0] sm:$0xff] %vm287_vm0, %v7796_v52  ;;  %7813 = vst.msk [vmem:[%s11804_s29 + $0xe0] sm:$0xff] %vm287_vm0, %v7797_v9 }
 0x460   : >> { %7814 = vst.msk [vmem:[%s11804_s29 + $0xf0] sm:$0xff] %vm287_vm0, %v7798_v8 }
 0x461   : > { %9468 = shalt.err (!%p9465_p1)
}
 0x462   : > { %s9469_s23 = scalar_lea.hbm %s11861_s25, 4096  ;;  %s9473_s26 = scalar_lea.hbm %s11911_s4, 8192 }
 0x463   : > { %p9470_p4 = scmp.ne.s32.totalorder %s11861_s25, %s9469_s23  ;;  %p9474_p3 = scmp.lt.s32.totalorder %s11861_s25, %s11911_s4 }
 0x464   : > { %p9475_p11 = scmp.lt.s32.totalorder %s9473_s26, %s9469_s23 }
 0x465   : > { %p9471_p6 = pnand %p9470_p4, %p12014_p10 }
 0x466   : > { %p9476_p7 = por %p9475_p11, %p9474_p3 }
 0x467   : > { %p9472_p8 = pneg %p9471_p6 }
 0x469   : > { %p9477_p9 = pnand %p9476_p7, %p9472_p8 }
 0x46b   : > { %9480 = shalt.err (!%p9477_p9)
}
 0x46c   : > { %s9813_s29 = smov 128   ;;  %s9814_s14 = smov 8  }
 0x46d   : > { %8995 = dma.vmem_to_hbm [thread:$0]  (%p12014_p10), %s11864_s7, 4096, %s11861_s25, %s7816_s8, %s9813_s29, %s9813_s29, %s9814_s14  }
 0x46e PF: > { %s7844_s11 = sand.u32 1, %s9651_s15   ;;  %p12015_p12 = scmp.ne.s32.totalorder %s11922_s22, 0 }
 0x46f   : > { %p12016_p13 = scmp.ge.s32.totalorder %s9663_s18, 2  ;;  %s7845_s20 = scalar_lea.sflag [#allocation5], %s7844_s11 }
 0x471   : > { %p9006_p0 = pnand %p12016_p13, %p12015_p12 }
 0x473   : > { %p9007_p5 = pneg %p9006_p0 }
 0x475   : > { %9646 = dma.done.wait (%p9007_p5), %s7845_s20, 4096  }
 0x476   : > { %9648 = vsyncadd (%p9007_p5), %s7845_s20, 4294963200  ;;  %p18_p2 = scmp.ge.s32.totalorder %s9894_s27, 4   ;;  %s12017_s15 = smov %s9655_s16 }
 0x477   : > { %s12018_s16 = smov %s9659_s17  ;;  %s12019_s17 = smov %s9914_s9 }
 0x478   : > { %s12020_s18 = smov %s9894_s27  ;;  %20 = sbr.rel (!%p18_p2) target bundleno = 6 (0x6), region = 172 }
 0x47d   :  { %7850 = vsyncpa [#allocation4], 1 }
 0x47e   :  { %7852 = vsyncpa [#allocation4 + $0x1], 1 }
 0x47f   :  { %7853 = vsyncpa [#allocation7], 1 }
 0x480   :  { %7854 = vsyncpa [#allocation5], 1 }
 0x481   :  { %7856 = vsyncpa [#allocation5 + $0x1], 1 }

</bundles_post_ra>
